<compile_context>
chip_gen: v6e
topology: v6e:2x2x1
jax: 0.10.0
libtpu: 0.0.40
codegen_flags: <defaults>
</compile_context>

<pallas_src>
import jax
import jax.numpy as jnp
from jax import lax
from jax.experimental import pallas as pl
from jax.experimental.pallas import tpu as pltpu


def _make_decoder_kernel(num_layers, num_hiddens, num_steps, batch, num_kv, vocab):
    L, H, T, B, N, V = num_layers, num_hiddens, num_steps, batch, num_kv, vocab

    def kernel(xg_ref, enc_ref, kproj_ref, abias_ref, h0_ref,
               wq_ref, wv_ref, wg_ref, bg_ref, wd_ref, bd_ref,
               out_ref, attn_ref, hout_ref,
               feed_sc, attn_sc):
        # ---- small loop-invariant operands hoisted; GRU weights stay in VMEM (read per use) ----
        enc = enc_ref[...]            # (B, N, H) attention values
        kproj = kproj_ref[...]        # (B, N, H) = W_k(keys), precomputed in the wrapper
        abias = abias_ref[...]        # (B, N) additive mask bias (0 valid / -1e6 masked)
        wq = wq_ref[...]              # (H, H)
        wv = wv_ref[...]              # (1, H) scoring row vector
        bg = bg_ref[...]              # (L, 1, 4H) summed gate biases

        def step(t, h):
            # ------------- additive attention (query = top-layer hidden) -------------
            qproj = jnp.dot(h[L - 1], wq, preferred_element_type=jnp.float32)    # (B, H)
            feats = jnp.tanh(qproj[:, None, :] + kproj)                          # (B, N, H)
            scores = jnp.sum(feats * wv, axis=-1) + abias                        # (B, N)
            m = jnp.max(scores, axis=-1, keepdims=True)
            e = jnp.exp(scores - m)
            attn = e / jnp.sum(e, axis=-1, keepdims=True)                        # (B, N)
            attn_sc[t] = attn                                                    # scratch, not output
            context = jnp.sum(attn[:, :, None] * enc, axis=1)                    # (B, H)

            # --------- stacked GRU step, summed-gate layout [r | z | n_in | n_h] ---------
            xg_t = xg_ref[t]                      # (B, 4H) precomputed x-embedding gate term
            feed = context
            new_h = []
            for l in range(L):
                inp = jnp.concatenate([feed, h[l]], axis=-1)                     # (B, 2H)
                gates = jnp.dot(inp, wg_ref[l],
                                preferred_element_type=jnp.float32) + bg[l]      # (B, 4H)
                if l == 0:
                    gates = gates + xg_t
                r = jax.nn.sigmoid(gates[:, 0:H])
                z = jax.nn.sigmoid(gates[:, H:2 * H])
                n = jnp.tanh(gates[:, 2 * H:3 * H] + r * gates[:, 3 * H:4 * H])
                h_l = (1.0 - z) * n + z * h[l]
                new_h.append(h_l)
                feed = h_l

            # stash the top-layer hidden; dense projection is batched after the loop
            feed_sc[pl.ds(t * B, B), :] = feed
            return tuple(new_h)

        h_init = tuple(h0_ref[l] for l in range(L))
        h_final = lax.fori_loop(0, T, step, h_init, unroll=(T <= 8))

        # ---- single writebacks after the recurrence ----
        for l in range(L):
            hout_ref[l] = h_final[l]
        attn_ref[...] = attn_sc[...]
        logits = jnp.dot(feed_sc[...], wd_ref[...],
                         preferred_element_type=jnp.float32) + bd_ref[...]       # (T*B, V), one matmul
        out_ref[...] = logits

    return kernel


def prepare_decoder_params(p):
    """One-time repacking of parameters for the kernel (pure function of the weights)."""
    H = p["wq"].shape[0]
    E = p["embedding"].shape[1]
    L = p["whh"].shape[0]
    f32 = jnp.float32
    wih_in = p["wih"][:, :H, :].astype(f32)          # (L, H, 3H): context / lower-layer rows
    whh = p["whh"].astype(f32)                       # (L, H, 3H)
    zero = jnp.zeros((L, H, H), f32)
    # summed-gate weights: rows [input ; hidden], columns [r | z | n_in | n_h]  -> (L, 2H, 4H)
    top = jnp.concatenate([wih_in[..., :2 * H], wih_in[..., 2 * H:], zero], axis=-1)
    bot = jnp.concatenate([whh[..., :2 * H], zero, whh[..., 2 * H:]], axis=-1)
    wg = jnp.concatenate([top, bot], axis=1)
    bih, bhh = p["bih"].astype(f32), p["bhh"].astype(f32)
    bg = jnp.concatenate([bih[..., :2 * H] + bhh[..., :2 * H],
                          bih[..., 2 * H:], bhh[..., 2 * H:]], axis=-1)          # (L, 1, 4H)
    # embedding -> gate weight (feeds layer 0 only); zero block for the n_h columns
    wx = jnp.concatenate([p["wih"][0, H:H + E, :].astype(f32),
                          jnp.zeros((E, H), f32)], axis=-1)                      # (E, 4H)
    return {
        "embedding": p["embedding"].astype(f32),
        "wq": p["wq"].astype(f32), "wk": p["wk"].astype(f32),
        "wv_row": p["wv"].reshape(1, H).astype(f32),
        "wg": wg, "bg": bg, "wx": wx,
        "wd": p["wd"].astype(f32), "bd": p["bd"].astype(f32),
    }


def _decoder_forward(x_tokens, enc_outputs, hidden_state, enc_valid_lens, prep):
    """Returns (outputs (B,T,V), new_hidden (L,B,H), attention_weights (T,B,N))."""
    B, T = x_tokens.shape
    L, _, H = hidden_state.shape
    N = enc_outputs.shape[1]
    V = prep["wd"].shape[1]
    f32 = jnp.float32

    enc = enc_outputs.astype(f32)
    # per-call glue: runtime-dependent but time-invariant pieces hoisted out of the recurrence
    x_emb = jnp.transpose(prep["embedding"][x_tokens], (1, 0, 2))                # (T, B, E)
    xg = jnp.einsum("tbe,eg->tbg", x_emb, prep["wx"])                            # (T, B, 4H)
    kproj = jnp.einsum("bnh,hk->bnk", enc, prep["wk"])                           # (B, N, H)
    abias = jnp.where(jnp.arange(N)[None, :] < enc_valid_lens[:, None],
                      0.0, -1000000.0).astype(f32)                               # (B, N)

    kernel = _make_decoder_kernel(L, H, T, B, N, V)
    in_specs = [pl.BlockSpec(memory_space=pltpu.MemorySpace.VMEM) for _ in range(11)]
    out_specs = tuple(pl.BlockSpec(memory_space=pltpu.MemorySpace.VMEM) for _ in range(3))

    out_flat, attns, h_new = pl.pallas_call(
        kernel,
        out_shape=(
            jax.ShapeDtypeStruct((T * B, V), f32),     # logits (reshaped to (B,T,V) outside)
            jax.ShapeDtypeStruct((T, B, N), f32),      # attention weights
            jax.ShapeDtypeStruct((L, B, H), f32),      # final hidden state
        ),
        in_specs=in_specs,
        out_specs=out_specs,
        scratch_shapes=[pltpu.VMEM((T * B, H), f32),   # per-step top-layer hidden
                        pltpu.VMEM((T, B, N), f32)],   # per-step attention weights
    )(xg, enc, kproj, abias, hidden_state.astype(f32),
      prep["wq"], prep["wv_row"], prep["wg"], prep["bg"], prep["wd"], prep["bd"])

    # torch returns outputs.permute(1, 0, 2): (batch, num_steps, vocab)
    outputs = jnp.transpose(out_flat.reshape(T, B, V), (1, 0, 2))
    return outputs, h_new, attns


seq2seq_attention_decoder_forward = jax.jit(_decoder_forward)


def reference_forward(x_tokens, enc_outputs, hidden_state, enc_valid_lens, p):
    """Pure-JAX reference replicating the PyTorch forward semantics."""
    B, T = x_tokens.shape
    L, _, H = hidden_state.shape
    N = enc_outputs.shape[1]
    x_emb = jnp.transpose(p["embedding"][x_tokens], (1, 0, 2)).astype(jnp.float32)
    kproj = jnp.einsum("bnh,hk->bnk", enc_outputs, p["wk"])
    h = hidden_state
    outs, attns = [], []
    for t in range(T):
        q = h[-1]
        qproj = q @ p["wq"]
        feats = jnp.tanh(qproj[:, None, :] + kproj)
        scores = jnp.einsum("bnh,ho->bn", feats, p["wv"])
        mask = jnp.arange(N)[None, :] < enc_valid_lens[:, None]
        scores = jnp.where(mask, scores, -1000000.0)
        attn = jax.nn.softmax(scores, axis=-1)
        attns.append(attn)
        context = jnp.einsum("bn,bnh->bh", attn, enc_outputs)
        layer_in = jnp.concatenate([context, x_emb[t]], axis=-1)
        new_h = []
        for l in range(L):
            w_ih = p["wih"][l] if l == 0 else p["wih"][l][:H, :]
            gi = layer_in @ w_ih + p["bih"][l, 0]
            gh = h[l] @ p["whh"][l] + p["bhh"][l, 0]
            r = jax.nn.sigmoid(gi[:, :H] + gh[:, :H])
            z = jax.nn.sigmoid(gi[:, H:2 * H] + gh[:, H:2 * H])
            n = jnp.tanh(gi[:, 2 * H:] + r * gh[:, 2 * H:])
            hl = (1.0 - z) * n + z * h[l]
            new_h.append(hl)
            layer_in = hl
        h = jnp.stack(new_h)
        outs.append(layer_in @ p["wd"] + p["bd"][0])
    return jnp.transpose(jnp.stack(outs), (1, 0, 2)), h, jnp.stack(attns)


def init_params(key, vocab_size, embed_size, num_hiddens, num_layers):
    H, E, L, V = num_hiddens, embed_size, num_layers, vocab_size
    ks = jax.random.split(key, 10)
    scale = 0.1

    def rnd(k, shape):
        return (scale * jax.random.normal(k, shape)).astype(jnp.float32)

    # GRU W_ih per layer: layer 0 input dim is H+E, deeper layers input dim is H (zero padded)
    wih = []
    for l in range(L):
        kl = jax.random.fold_in(ks[4], l)
        if l == 0:
            wih.append(rnd(kl, (H + E, 3 * H)))
        else:
            w = rnd(kl, (H, 3 * H))
            wih.append(jnp.concatenate([w, jnp.zeros((E, 3 * H), jnp.float32)], axis=0))
    whh = jnp.stack([rnd(jax.random.fold_in(ks[5], l), (H, 3 * H)) for l in range(L)])
    bih = jnp.stack([rnd(jax.random.fold_in(ks[6], l), (1, 3 * H)) for l in range(L)])
    bhh = jnp.stack([rnd(jax.random.fold_in(ks[7], l), (1, 3 * H)) for l in range(L)])

    return {
        "embedding": rnd(ks[0], (V, E)),
        "wq": rnd(ks[1], (H, H)),
        "wk": rnd(ks[2], (H, H)),
        "wv": rnd(ks[3], (H, 1)),
        "wih": jnp.stack(wih),
        "whh": whh,
        "bih": bih,
        "bhh": bhh,
        "wd": rnd(ks[8], (H, V)),
        "bd": rnd(ks[9], (1, V)),
    }
    # TODO(synk): dropout is identity here (p=0 / eval mode), matching the module's default dropout=0.


if __name__ == "__main__":
    vocab_size, embed_size, num_hiddens, num_layers = 32, 16, 32, 2
    batch, num_steps, num_enc_steps = 4, 6, 8

    key = jax.random.PRNGKey(0)
    k_par, k_tok, k_enc, k_hid = jax.random.split(key, 4)

    params = init_params(k_par, vocab_size, embed_size, num_hiddens, num_layers)
    prep = jax.block_until_ready(prepare_decoder_params(params))   # one-time weight repacking

    x_tokens = jax.random.randint(k_tok, (batch, num_steps), 0, vocab_size)
    enc_outputs = jax.random.normal(k_enc, (batch, num_enc_steps, num_hiddens),
                                    dtype=jnp.float32)
    hidden_state = jax.random.normal(k_hid, (num_layers, batch, num_hiddens),
                                     dtype=jnp.float32)
    enc_valid_lens = jnp.array([8, 6, 4, 2], dtype=jnp.int32)

    outputs, new_hidden, attn_w = jax.block_until_ready(
        seq2seq_attention_decoder_forward(x_tokens, enc_outputs, hidden_state,
                                          enc_valid_lens, prep))

    ref_out, ref_hid, ref_attn = reference_forward(x_tokens, enc_outputs, hidden_state,
                                                   enc_valid_lens, params)

    assert outputs.shape == (batch, num_steps, vocab_size)
    assert new_hidden.shape == (num_layers, batch, num_hiddens)
    assert attn_w.shape == (num_steps, batch, num_enc_steps)
    import numpy as np
    np.testing.assert_allclose(np.asarray(outputs), np.asarray(ref_out), atol=1e-4, rtol=1e-4)
    np.testing.assert_allclose(np.asarray(new_hidden), np.asarray(ref_hid), atol=1e-4, rtol=1e-4)
    np.testing.assert_allclose(np.asarray(attn_w), np.asarray(ref_attn), atol=1e-4, rtol=1e-4)

    print("KERNEL_OK")
</pallas_src>

<mosaic_0001>
module attributes {stable_mosaic.version = 11 : i64} {
  func.func @kernel(%arg0: memref<6x4x128xf32, #tpu.memory_space<vmem>>, %arg1: memref<4x8x32xf32, #tpu.memory_space<vmem>>, %arg2: memref<4x8x32xf32, #tpu.memory_space<vmem>>, %arg3: memref<4x8xf32, #tpu.memory_space<vmem>>, %arg4: memref<2x4x32xf32, #tpu.memory_space<vmem>>, %arg5: memref<32x32xf32, #tpu.memory_space<vmem>>, %arg6: memref<1x32xf32, #tpu.memory_space<vmem>>, %arg7: memref<2x64x128xf32, #tpu.memory_space<vmem>>, %arg8: memref<2x1x128xf32, #tpu.memory_space<vmem>>, %arg9: memref<32x32xf32, #tpu.memory_space<vmem>>, %arg10: memref<1x32xf32, #tpu.memory_space<vmem>>, %arg11: memref<24x32xf32, #tpu.memory_space<vmem>>, %arg12: memref<6x4x8xf32, #tpu.memory_space<vmem>>, %arg13: memref<2x4x32xf32, #tpu.memory_space<vmem>>, %arg14: memref<24x32xf32, #tpu.memory_space<vmem>>, %arg15: memref<6x4x8xf32, #tpu.memory_space<vmem>>) attributes {dimension_semantics = [], scalar_prefetch = 0 : i64, scratch_operands = 2 : i64, tpu.core_type = #tpu.core_type<tc>} {
    %c0 = arith.constant 0 : index
    %c0_0 = arith.constant 0 : index
    %c0_1 = arith.constant 0 : index
    %0 = vector.load %arg1[%c0, %c0_0, %c0_1] : memref<4x8x32xf32, #tpu.memory_space<vmem>>, vector<4x8x32xf32>
    %c0_2 = arith.constant 0 : index
    %c0_3 = arith.constant 0 : index
    %c0_4 = arith.constant 0 : index
    %1 = vector.load %arg2[%c0_2, %c0_3, %c0_4] : memref<4x8x32xf32, #tpu.memory_space<vmem>>, vector<4x8x32xf32>
    %c0_5 = arith.constant 0 : index
    %c0_6 = arith.constant 0 : index
    %2 = vector.load %arg3[%c0_5, %c0_6] : memref<4x8xf32, #tpu.memory_space<vmem>>, vector<4x8xf32>
    %c0_7 = arith.constant 0 : index
    %c0_8 = arith.constant 0 : index
    %3 = vector.load %arg5[%c0_7, %c0_8] : memref<32x32xf32, #tpu.memory_space<vmem>>, vector<32x32xf32>
    %c0_9 = arith.constant 0 : index
    %c0_10 = arith.constant 0 : index
    %4 = vector.load %arg6[%c0_9, %c0_10] : memref<1x32xf32, #tpu.memory_space<vmem>>, vector<1x32xf32>
    %c0_11 = arith.constant 0 : index
    %c0_12 = arith.constant 0 : index
    %c0_13 = arith.constant 0 : index
    %5 = vector.load %arg8[%c0_11, %c0_12, %c0_13] : memref<2x1x128xf32, #tpu.memory_space<vmem>>, vector<2x1x128xf32>
    %c0_14 = arith.constant 0 : index
    %c0_15 = arith.constant 0 : index
    %c0_16 = arith.constant 0 : index
    %6 = vector.load %arg4[%c0_14, %c0_15, %c0_16] : memref<2x4x32xf32, #tpu.memory_space<vmem>>, vector<1x4x32xf32>
    %7 = vector.shape_cast %6 : vector<1x4x32xf32> to vector<4x32xf32>
    %c1 = arith.constant 1 : index
    %c0_17 = arith.constant 0 : index
    %c0_18 = arith.constant 0 : index
    %8 = vector.load %arg4[%c1, %c0_17, %c0_18] : memref<2x4x32xf32, #tpu.memory_space<vmem>>, vector<1x4x32xf32>
    %9 = vector.shape_cast %8 : vector<1x4x32xf32> to vector<4x32xf32>
    %c0_i32 = arith.constant 0 : i32
    %cst = arith.constant dense<0.000000e+00> : vector<4x32xf32>
    %10 = tpu.matmul %9, %3, %cst {dimension_numbers = #tpu.dot_dimension_numbers<[1], [0], [0], [1], [0, 0, 1, 1], [], []>} : vector<4x32xf32>, vector<32x32xf32>, vector<4x32xf32> -> vector<4x32xf32>
    %11 = vector.shape_cast %10 : vector<4x32xf32> to vector<4x1x32xf32>
    %12 = vector.broadcast %11 : vector<4x1x32xf32> to vector<4x8x32xf32>
    %13 = arith.addf %12, %1 : vector<4x8x32xf32>
    %14 = math.tanh %13 : vector<4x8x32xf32>
    %15 = vector.shape_cast %4 : vector<1x32xf32> to vector<1x1x32xf32>
    %16 = vector.broadcast %15 : vector<1x1x32xf32> to vector<4x8x32xf32>
    %17 = arith.mulf %14, %16 : vector<4x8x32xf32>
    %cst_19 = arith.constant dense<0.000000e+00> : vector<4x8xf32>
    %18 = vector.multi_reduction <add>, %17, %cst_19 [2] : vector<4x8x32xf32> to vector<4x8xf32>
    %19 = arith.addf %18, %2 : vector<4x8xf32>
    %cst_20 = arith.constant dense<0xFF800000> : vector<4xf32>
    %20 = vector.multi_reduction <maximumf>, %19, %cst_20 [1] : vector<4x8xf32> to vector<4xf32>
    %21 = vector.shape_cast %20 : vector<4xf32> to vector<4x1xf32>
    %22 = vector.broadcast %21 : vector<4x1xf32> to vector<4x8xf32>
    %23 = arith.subf %19, %22 : vector<4x8xf32>
    %24 = math.exp %23 : vector<4x8xf32>
    %cst_21 = arith.constant dense<0.000000e+00> : vector<4xf32>
    %25 = vector.multi_reduction <add>, %24, %cst_21 [1] : vector<4x8xf32> to vector<4xf32>
    %26 = vector.shape_cast %25 : vector<4xf32> to vector<4x1xf32>
    %27 = vector.broadcast %26 : vector<4x1xf32> to vector<4x8xf32>
    %28 = arith.divf %24, %27 : vector<4x8xf32>
    %29 = arith.index_cast %c0_i32 : i32 to index
    %c0_22 = arith.constant 0 : index
    %c0_23 = arith.constant 0 : index
    %30 = vector.load %arg15[%29, %c0_22, %c0_23] : memref<6x4x8xf32, #tpu.memory_space<vmem>>, vector<1x4x8xf32>
    %31 = vector.shape_cast %30 : vector<1x4x8xf32> to vector<4x8xf32>
    %32 = vector.shape_cast %28 : vector<4x8xf32> to vector<1x4x8xf32>
    tpu.vector_store %arg15[%29, %c0_22, %c0_23], %32 {strides = array<i32>} : memref<6x4x8xf32, #tpu.memory_space<vmem>>, vector<1x4x8xf32>,
    %33 = vector.shape_cast %28 : vector<4x8xf32> to vector<4x8x1xf32>
    %34 = vector.broadcast %33 : vector<4x8x1xf32> to vector<4x8x32xf32>
    %35 = arith.mulf %34, %0 : vector<4x8x32xf32>
    %cst_24 = arith.constant dense<0.000000e+00> : vector<4x32xf32>
    %36 = vector.multi_reduction <add>, %35, %cst_24 [1] : vector<4x8x32xf32> to vector<4x32xf32>
    %37 = arith.index_cast %c0_i32 : i32 to index
    %c0_25 = arith.constant 0 : index
    %c0_26 = arith.constant 0 : index
    %38 = vector.load %arg0[%37, %c0_25, %c0_26] : memref<6x4x128xf32, #tpu.memory_space<vmem>>, vector<1x4x128xf32>
    %39 = vector.shape_cast %38 : vector<1x4x128xf32> to vector<4x128xf32>
    %40 = tpu.concatenate %36, %7 in 1 : vector<4x32xf32>, vector<4x32xf32> -> vector<4x64xf32>
    %c0_27 = arith.constant 0 : index
    %c0_28 = arith.constant 0 : index
    %c0_29 = arith.constant 0 : index
    %41 = vector.load %arg7[%c0_27, %c0_28, %c0_29] : memref<2x64x128xf32, #tpu.memory_space<vmem>>, vector<1x64x128xf32>
    %42 = vector.shape_cast %41 : vector<1x64x128xf32> to vector<64x128xf32>
    %cst_30 = arith.constant dense<0.000000e+00> : vector<4x128xf32>
    %43 = tpu.matmul %40, %42, %cst_30 {dimension_numbers = #tpu.dot_dimension_numbers<[1], [0], [0], [1], [0, 0, 1, 1], [], []>} : vector<4x64xf32>, vector<64x128xf32>, vector<4x128xf32> -> vector<4x128xf32>
    %44 = vector.extract_strided_slice %5 {offsets = [0, 0, 0], sizes = [1, 1, 128], strides = [1, 1, 1]} : vector<2x1x128xf32> to vector<1x1x128xf32>
    %45 = vector.shape_cast %44 : vector<1x1x128xf32> to vector<1x128xf32>
    %46 = vector.broadcast %45 : vector<1x128xf32> to vector<4x128xf32>
    %47 = arith.addf %43, %46 : vector<4x128xf32>
    %48 = arith.addf %47, %39 : vector<4x128xf32>
    %49 = vector.extract_strided_slice %48 {offsets = [0, 0], sizes = [4, 32], strides = [1, 1]} : vector<4x128xf32> to vector<4x32xf32>
    %50 = arith.negf %49 : vector<4x32xf32>
    %51 = math.exp %50 : vector<4x32xf32>
    %cst_31 = arith.constant 1.000000e+00 : f32
    %52 = vector.broadcast %cst_31 : f32 to vector<4x32xf32>
    %53 = arith.addf %52, %51 : vector<4x32xf32>
    %54 = arith.divf %52, %53 : vector<4x32xf32>
    %55 = vector.extract_strided_slice %48 {offsets = [0, 32], sizes = [4, 32], strides = [1, 1]} : vector<4x128xf32> to vector<4x32xf32>
    %56 = arith.negf %55 : vector<4x32xf32>
    %57 = math.exp %56 : vector<4x32xf32>
    %cst_32 = arith.constant 1.000000e+00 : f32
    %58 = vector.broadcast %cst_32 : f32 to vector<4x32xf32>
    %59 = arith.addf %58, %57 : vector<4x32xf32>
    %60 = arith.divf %58, %59 : vector<4x32xf32>
    %61 = vector.extract_strided_slice %48 {offsets = [0, 64], sizes = [4, 32], strides = [1, 1]} : vector<4x128xf32> to vector<4x32xf32>
    %62 = vector.extract_strided_slice %48 {offsets = [0, 96], sizes = [4, 32], strides = [1, 1]} : vector<4x128xf32> to vector<4x32xf32>
    %63 = arith.mulf %54, %62 : vector<4x32xf32>
    %64 = arith.addf %61, %63 : vector<4x32xf32>
    %65 = math.tanh %64 : vector<4x32xf32>
    %cst_33 = arith.constant 1.000000e+00 : f32
    %66 = vector.broadcast %cst_33 : f32 to vector<4x32xf32>
    %67 = arith.subf %66, %60 : vector<4x32xf32>
    %68 = arith.mulf %67, %65 : vector<4x32xf32>
    %69 = arith.mulf %60, %7 : vector<4x32xf32>
    %70 = arith.addf %68, %69 : vector<4x32xf32>
    %71 = tpu.concatenate %70, %9 in 1 : vector<4x32xf32>, vector<4x32xf32> -> vector<4x64xf32>
    %c1_34 = arith.constant 1 : index
    %c0_35 = arith.constant 0 : index
    %c0_36 = arith.constant 0 : index
    %72 = vector.load %arg7[%c1_34, %c0_35, %c0_36] : memref<2x64x128xf32, #tpu.memory_space<vmem>>, vector<1x64x128xf32>
    %73 = vector.shape_cast %72 : vector<1x64x128xf32> to vector<64x128xf32>
    %cst_37 = arith.constant dense<0.000000e+00> : vector<4x128xf32>
    %74 = tpu.matmul %71, %73, %cst_37 {dimension_numbers = #tpu.dot_dimension_numbers<[1], [0], [0], [1], [0, 0, 1, 1], [], []>} : vector<4x64xf32>, vector<64x128xf32>, vector<4x128xf32> -> vector<4x128xf32>
    %75 = vector.extract_strided_slice %5 {offsets = [1, 0, 0], sizes = [1, 1, 128], strides = [1, 1, 1]} : vector<2x1x128xf32> to vector<1x1x128xf32>
    %76 = vector.shape_cast %75 : vector<1x1x128xf32> to vector<1x128xf32>
    %77 = vector.broadcast %76 : vector<1x128xf32> to vector<4x128xf32>
    %78 = arith.addf %74, %77 : vector<4x128xf32>
    %79 = vector.extract_strided_slice %78 {offsets = [0, 0], sizes = [4, 32], strides = [1, 1]} : vector<4x128xf32> to vector<4x32xf32>
    %80 = arith.negf %79 : vector<4x32xf32>
    %81 = math.exp %80 : vector<4x32xf32>
    %cst_38 = arith.constant 1.000000e+00 : f32
    %82 = vector.broadcast %cst_38 : f32 to vector<4x32xf32>
    %83 = arith.addf %82, %81 : vector<4x32xf32>
    %84 = arith.divf %82, %83 : vector<4x32xf32>
    %85 = vector.extract_strided_slice %78 {offsets = [0, 32], sizes = [4, 32], strides = [1, 1]} : vector<4x128xf32> to vector<4x32xf32>
    %86 = arith.negf %85 : vector<4x32xf32>
    %87 = math.exp %86 : vector<4x32xf32>
    %cst_39 = arith.constant 1.000000e+00 : f32
    %88 = vector.broadcast %cst_39 : f32 to vector<4x32xf32>
    %89 = arith.addf %88, %87 : vector<4x32xf32>
    %90 = arith.divf %88, %89 : vector<4x32xf32>
    %91 = vector.extract_strided_slice %78 {offsets = [0, 64], sizes = [4, 32], strides = [1, 1]} : vector<4x128xf32> to vector<4x32xf32>
    %92 = vector.extract_strided_slice %78 {offsets = [0, 96], sizes = [4, 32], strides = [1, 1]} : vector<4x128xf32> to vector<4x32xf32>
    %93 = arith.mulf %84, %92 : vector<4x32xf32>
    %94 = arith.addf %91, %93 : vector<4x32xf32>
    %95 = math.tanh %94 : vector<4x32xf32>
    %cst_40 = arith.constant 1.000000e+00 : f32
    %96 = vector.broadcast %cst_40 : f32 to vector<4x32xf32>
    %97 = arith.subf %96, %90 : vector<4x32xf32>
    %98 = arith.mulf %97, %95 : vector<4x32xf32>
    %99 = arith.mulf %90, %9 : vector<4x32xf32>
    %100 = arith.addf %98, %99 : vector<4x32xf32>
    %c4_i32 = arith.constant 4 : i32
    %101 = arith.muli %c0_i32, %c4_i32 : i32
    %102 = arith.index_cast %101 : i32 to index
    %c0_41 = arith.constant 0 : index
    %103 = vector.load %arg14[%102, %c0_41] : memref<24x32xf32, #tpu.memory_space<vmem>>, vector<4x32xf32>
    tpu.vector_store %arg14[%102, %c0_41], %100 {strides = array<i32>} : memref<24x32xf32, #tpu.memory_space<vmem>>, vector<4x32xf32>,
    %c1_i32 = arith.constant 1 : i32
    %cst_42 = arith.constant dense<0.000000e+00> : vector<4x32xf32>
    %104 = tpu.matmul %100, %3, %cst_42 {dimension_numbers = #tpu.dot_dimension_numbers<[1], [0], [0], [1], [0, 0, 1, 1], [], []>} : vector<4x32xf32>, vector<32x32xf32>, vector<4x32xf32> -> vector<4x32xf32>
    %105 = vector.shape_cast %104 : vector<4x32xf32> to vector<4x1x32xf32>
    %106 = vector.broadcast %105 : vector<4x1x32xf32> to vector<4x8x32xf32>
    %107 = arith.addf %106, %1 : vector<4x8x32xf32>
    %108 = math.tanh %107 : vector<4x8x32xf32>
    %109 = vector.shape_cast %4 : vector<1x32xf32> to vector<1x1x32xf32>
    %110 = vector.broadcast %109 : vector<1x1x32xf32> to vector<4x8x32xf32>
    %111 = arith.mulf %108, %110 : vector<4x8x32xf32>
    %cst_43 = arith.constant dense<0.000000e+00> : vector<4x8xf32>
    %112 = vector.multi_reduction <add>, %111, %cst_43 [2] : vector<4x8x32xf32> to vector<4x8xf32>
    %113 = arith.addf %112, %2 : vector<4x8xf32>
    %cst_44 = arith.constant dense<0xFF800000> : vector<4xf32>
    %114 = vector.multi_reduction <maximumf>, %113, %cst_44 [1] : vector<4x8xf32> to vector<4xf32>
    %115 = vector.shape_cast %114 : vector<4xf32> to vector<4x1xf32>
    %116 = vector.broadcast %115 : vector<4x1xf32> to vector<4x8xf32>
    %117 = arith.subf %113, %116 : vector<4x8xf32>
    %118 = math.exp %117 : vector<4x8xf32>
    %cst_45 = arith.constant dense<0.000000e+00> : vector<4xf32>
    %119 = vector.multi_reduction <add>, %118, %cst_45 [1] : vector<4x8xf32> to vector<4xf32>
    %120 = vector.shape_cast %119 : vector<4xf32> to vector<4x1xf32>
    %121 = vector.broadcast %120 : vector<4x1xf32> to vector<4x8xf32>
    %122 = arith.divf %118, %121 : vector<4x8xf32>
    %123 = arith.index_cast %c1_i32 : i32 to index
    %c0_46 = arith.constant 0 : index
    %c0_47 = arith.constant 0 : index
    %124 = vector.load %arg15[%123, %c0_46, %c0_47] : memref<6x4x8xf32, #tpu.memory_space<vmem>>, vector<1x4x8xf32>
    %125 = vector.shape_cast %124 : vector<1x4x8xf32> to vector<4x8xf32>
    %126 = vector.shape_cast %122 : vector<4x8xf32> to vector<1x4x8xf32>
    tpu.vector_store %arg15[%123, %c0_46, %c0_47], %126 {strides = array<i32>} : memref<6x4x8xf32, #tpu.memory_space<vmem>>, vector<1x4x8xf32>,
    %127 = vector.shape_cast %122 : vector<4x8xf32> to vector<4x8x1xf32>
    %128 = vector.broadcast %127 : vector<4x8x1xf32> to vector<4x8x32xf32>
    %129 = arith.mulf %128, %0 : vector<4x8x32xf32>
    %cst_48 = arith.constant dense<0.000000e+00> : vector<4x32xf32>
    %130 = vector.multi_reduction <add>, %129, %cst_48 [1] : vector<4x8x32xf32> to vector<4x32xf32>
    %131 = arith.index_cast %c1_i32 : i32 to index
    %c0_49 = arith.constant 0 : index
    %c0_50 = arith.constant 0 : index
    %132 = vector.load %arg0[%131, %c0_49, %c0_50] : memref<6x4x128xf32, #tpu.memory_space<vmem>>, vector<1x4x128xf32>
    %133 = vector.shape_cast %132 : vector<1x4x128xf32> to vector<4x128xf32>
    %134 = tpu.concatenate %130, %70 in 1 : vector<4x32xf32>, vector<4x32xf32> -> vector<4x64xf32>
    %c0_51 = arith.constant 0 : index
    %c0_52 = arith.constant 0 : index
    %c0_53 = arith.constant 0 : index
    %135 = vector.load %arg7[%c0_51, %c0_52, %c0_53] : memref<2x64x128xf32, #tpu.memory_space<vmem>>, vector<1x64x128xf32>
    %136 = vector.shape_cast %135 : vector<1x64x128xf32> to vector<64x128xf32>
    %cst_54 = arith.constant dense<0.000000e+00> : vector<4x128xf32>
    %137 = tpu.matmul %134, %136, %cst_54 {dimension_numbers = #tpu.dot_dimension_numbers<[1], [0], [0], [1], [0, 0, 1, 1], [], []>} : vector<4x64xf32>, vector<64x128xf32>, vector<4x128xf32> -> vector<4x128xf32>
    %138 = vector.extract_strided_slice %5 {offsets = [0, 0, 0], sizes = [1, 1, 128], strides = [1, 1, 1]} : vector<2x1x128xf32> to vector<1x1x128xf32>
    %139 = vector.shape_cast %138 : vector<1x1x128xf32> to vector<1x128xf32>
    %140 = vector.broadcast %139 : vector<1x128xf32> to vector<4x128xf32>
    %141 = arith.addf %137, %140 : vector<4x128xf32>
    %142 = arith.addf %141, %133 : vector<4x128xf32>
    %143 = vector.extract_strided_slice %142 {offsets = [0, 0], sizes = [4, 32], strides = [1, 1]} : vector<4x128xf32> to vector<4x32xf32>
    %144 = arith.negf %143 : vector<4x32xf32>
    %145 = math.exp %144 : vector<4x32xf32>
    %cst_55 = arith.constant 1.000000e+00 : f32
    %146 = vector.broadcast %cst_55 : f32 to vector<4x32xf32>
    %147 = arith.addf %146, %145 : vector<4x32xf32>
    %148 = arith.divf %146, %147 : vector<4x32xf32>
    %149 = vector.extract_strided_slice %142 {offsets = [0, 32], sizes = [4, 32], strides = [1, 1]} : vector<4x128xf32> to vector<4x32xf32>
    %150 = arith.negf %149 : vector<4x32xf32>
    %151 = math.exp %150 : vector<4x32xf32>
    %cst_56 = arith.constant 1.000000e+00 : f32
    %152 = vector.broadcast %cst_56 : f32 to vector<4x32xf32>
    %153 = arith.addf %152, %151 : vector<4x32xf32>
    %154 = arith.divf %152, %153 : vector<4x32xf32>
    %155 = vector.extract_strided_slice %142 {offsets = [0, 64], sizes = [4, 32], strides = [1, 1]} : vector<4x128xf32> to vector<4x32xf32>
    %156 = vector.extract_strided_slice %142 {offsets = [0, 96], sizes = [4, 32], strides = [1, 1]} : vector<4x128xf32> to vector<4x32xf32>
    %157 = arith.mulf %148, %156 : vector<4x32xf32>
    %158 = arith.addf %155, %157 : vector<4x32xf32>
    %159 = math.tanh %158 : vector<4x32xf32>
    %cst_57 = arith.constant 1.000000e+00 : f32
    %160 = vector.broadcast %cst_57 : f32 to vector<4x32xf32>
    %161 = arith.subf %160, %154 : vector<4x32xf32>
    %162 = arith.mulf %161, %159 : vector<4x32xf32>
    %163 = arith.mulf %154, %70 : vector<4x32xf32>
    %164 = arith.addf %162, %163 : vector<4x32xf32>
    %165 = tpu.concatenate %164, %100 in 1 : vector<4x32xf32>, vector<4x32xf32> -> vector<4x64xf32>
    %c1_58 = arith.constant 1 : index
    %c0_59 = arith.constant 0 : index
    %c0_60 = arith.constant 0 : index
    %166 = vector.load %arg7[%c1_58, %c0_59, %c0_60] : memref<2x64x128xf32, #tpu.memory_space<vmem>>, vector<1x64x128xf32>
    %167 = vector.shape_cast %166 : vector<1x64x128xf32> to vector<64x128xf32>
    %cst_61 = arith.constant dense<0.000000e+00> : vector<4x128xf32>
    %168 = tpu.matmul %165, %167, %cst_61 {dimension_numbers = #tpu.dot_dimension_numbers<[1], [0], [0], [1], [0, 0, 1, 1], [], []>} : vector<4x64xf32>, vector<64x128xf32>, vector<4x128xf32> -> vector<4x128xf32>
    %169 = vector.extract_strided_slice %5 {offsets = [1, 0, 0], sizes = [1, 1, 128], strides = [1, 1, 1]} : vector<2x1x128xf32> to vector<1x1x128xf32>
    %170 = vector.shape_cast %169 : vector<1x1x128xf32> to vector<1x128xf32>
    %171 = vector.broadcast %170 : vector<1x128xf32> to vector<4x128xf32>
    %172 = arith.addf %168, %171 : vector<4x128xf32>
    %173 = vector.extract_strided_slice %172 {offsets = [0, 0], sizes = [4, 32], strides = [1, 1]} : vector<4x128xf32> to vector<4x32xf32>
    %174 = arith.negf %173 : vector<4x32xf32>
    %175 = math.exp %174 : vector<4x32xf32>
    %cst_62 = arith.constant 1.000000e+00 : f32
    %176 = vector.broadcast %cst_62 : f32 to vector<4x32xf32>
    %177 = arith.addf %176, %175 : vector<4x32xf32>
    %178 = arith.divf %176, %177 : vector<4x32xf32>
    %179 = vector.extract_strided_slice %172 {offsets = [0, 32], sizes = [4, 32], strides = [1, 1]} : vector<4x128xf32> to vector<4x32xf32>
    %180 = arith.negf %179 : vector<4x32xf32>
    %181 = math.exp %180 : vector<4x32xf32>
    %cst_63 = arith.constant 1.000000e+00 : f32
    %182 = vector.broadcast %cst_63 : f32 to vector<4x32xf32>
    %183 = arith.addf %182, %181 : vector<4x32xf32>
    %184 = arith.divf %182, %183 : vector<4x32xf32>
    %185 = vector.extract_strided_slice %172 {offsets = [0, 64], sizes = [4, 32], strides = [1, 1]} : vector<4x128xf32> to vector<4x32xf32>
    %186 = vector.extract_strided_slice %172 {offsets = [0, 96], sizes = [4, 32], strides = [1, 1]} : vector<4x128xf32> to vector<4x32xf32>
    %187 = arith.mulf %178, %186 : vector<4x32xf32>
    %188 = arith.addf %185, %187 : vector<4x32xf32>
    %189 = math.tanh %188 : vector<4x32xf32>
    %cst_64 = arith.constant 1.000000e+00 : f32
    %190 = vector.broadcast %cst_64 : f32 to vector<4x32xf32>
    %191 = arith.subf %190, %184 : vector<4x32xf32>
    %192 = arith.mulf %191, %189 : vector<4x32xf32>
    %193 = arith.mulf %184, %100 : vector<4x32xf32>
    %194 = arith.addf %192, %193 : vector<4x32xf32>
    %c4_i32_65 = arith.constant 4 : i32
    %195 = arith.muli %c1_i32, %c4_i32_65 : i32
    %196 = arith.index_cast %195 : i32 to index
    %c0_66 = arith.constant 0 : index
    %197 = vector.load %arg14[%196, %c0_66] : memref<24x32xf32, #tpu.memory_space<vmem>>, vector<4x32xf32>
    tpu.vector_store %arg14[%196, %c0_66], %194 {strides = array<i32>} : memref<24x32xf32, #tpu.memory_space<vmem>>, vector<4x32xf32>,
    %c2_i32 = arith.constant 2 : i32
    %cst_67 = arith.constant dense<0.000000e+00> : vector<4x32xf32>
    %198 = tpu.matmul %194, %3, %cst_67 {dimension_numbers = #tpu.dot_dimension_numbers<[1], [0], [0], [1], [0, 0, 1, 1], [], []>} : vector<4x32xf32>, vector<32x32xf32>, vector<4x32xf32> -> vector<4x32xf32>
    %199 = vector.shape_cast %198 : vector<4x32xf32> to vector<4x1x32xf32>
    %200 = vector.broadcast %199 : vector<4x1x32xf32> to vector<4x8x32xf32>
    %201 = arith.addf %200, %1 : vector<4x8x32xf32>
    %202 = math.tanh %201 : vector<4x8x32xf32>
    %203 = vector.shape_cast %4 : vector<1x32xf32> to vector<1x1x32xf32>
    %204 = vector.broadcast %203 : vector<1x1x32xf32> to vector<4x8x32xf32>
    %205 = arith.mulf %202, %204 : vector<4x8x32xf32>
    %cst_68 = arith.constant dense<0.000000e+00> : vector<4x8xf32>
    %206 = vector.multi_reduction <add>, %205, %cst_68 [2] : vector<4x8x32xf32> to vector<4x8xf32>
    %207 = arith.addf %206, %2 : vector<4x8xf32>
    %cst_69 = arith.constant dense<0xFF800000> : vector<4xf32>
    %208 = vector.multi_reduction <maximumf>, %207, %cst_69 [1] : vector<4x8xf32> to vector<4xf32>
    %209 = vector.shape_cast %208 : vector<4xf32> to vector<4x1xf32>
    %210 = vector.broadcast %209 : vector<4x1xf32> to vector<4x8xf32>
    %211 = arith.subf %207, %210 : vector<4x8xf32>
    %212 = math.exp %211 : vector<4x8xf32>
    %cst_70 = arith.constant dense<0.000000e+00> : vector<4xf32>
    %213 = vector.multi_reduction <add>, %212, %cst_70 [1] : vector<4x8xf32> to vector<4xf32>
    %214 = vector.shape_cast %213 : vector<4xf32> to vector<4x1xf32>
    %215 = vector.broadcast %214 : vector<4x1xf32> to vector<4x8xf32>
    %216 = arith.divf %212, %215 : vector<4x8xf32>
    %217 = arith.index_cast %c2_i32 : i32 to index
    %c0_71 = arith.constant 0 : index
    %c0_72 = arith.constant 0 : index
    %218 = vector.load %arg15[%217, %c0_71, %c0_72] : memref<6x4x8xf32, #tpu.memory_space<vmem>>, vector<1x4x8xf32>
    %219 = vector.shape_cast %218 : vector<1x4x8xf32> to vector<4x8xf32>
    %220 = vector.shape_cast %216 : vector<4x8xf32> to vector<1x4x8xf32>
    tpu.vector_store %arg15[%217, %c0_71, %c0_72], %220 {strides = array<i32>} : memref<6x4x8xf32, #tpu.memory_space<vmem>>, vector<1x4x8xf32>,
    %221 = vector.shape_cast %216 : vector<4x8xf32> to vector<4x8x1xf32>
    %222 = vector.broadcast %221 : vector<4x8x1xf32> to vector<4x8x32xf32>
    %223 = arith.mulf %222, %0 : vector<4x8x32xf32>
    %cst_73 = arith.constant dense<0.000000e+00> : vector<4x32xf32>
    %224 = vector.multi_reduction <add>, %223, %cst_73 [1] : vector<4x8x32xf32> to vector<4x32xf32>
    %225 = arith.index_cast %c2_i32 : i32 to index
    %c0_74 = arith.constant 0 : index
    %c0_75 = arith.constant 0 : index
    %226 = vector.load %arg0[%225, %c0_74, %c0_75] : memref<6x4x128xf32, #tpu.memory_space<vmem>>, vector<1x4x128xf32>
    %227 = vector.shape_cast %226 : vector<1x4x128xf32> to vector<4x128xf32>
    %228 = tpu.concatenate %224, %164 in 1 : vector<4x32xf32>, vector<4x32xf32> -> vector<4x64xf32>
    %c0_76 = arith.constant 0 : index
    %c0_77 = arith.constant 0 : index
    %c0_78 = arith.constant 0 : index
    %229 = vector.load %arg7[%c0_76, %c0_77, %c0_78] : memref<2x64x128xf32, #tpu.memory_space<vmem>>, vector<1x64x128xf32>
    %230 = vector.shape_cast %229 : vector<1x64x128xf32> to vector<64x128xf32>
    %cst_79 = arith.constant dense<0.000000e+00> : vector<4x128xf32>
    %231 = tpu.matmul %228, %230, %cst_79 {dimension_numbers = #tpu.dot_dimension_numbers<[1], [0], [0], [1], [0, 0, 1, 1], [], []>} : vector<4x64xf32>, vector<64x128xf32>, vector<4x128xf32> -> vector<4x128xf32>
    %232 = vector.extract_strided_slice %5 {offsets = [0, 0, 0], sizes = [1, 1, 128], strides = [1, 1, 1]} : vector<2x1x128xf32> to vector<1x1x128xf32>
    %233 = vector.shape_cast %232 : vector<1x1x128xf32> to vector<1x128xf32>
    %234 = vector.broadcast %233 : vector<1x128xf32> to vector<4x128xf32>
    %235 = arith.addf %231, %234 : vector<4x128xf32>
    %236 = arith.addf %235, %227 : vector<4x128xf32>
    %237 = vector.extract_strided_slice %236 {offsets = [0, 0], sizes = [4, 32], strides = [1, 1]} : vector<4x128xf32> to vector<4x32xf32>
    %238 = arith.negf %237 : vector<4x32xf32>
    %239 = math.exp %238 : vector<4x32xf32>
    %cst_80 = arith.constant 1.000000e+00 : f32
    %240 = vector.broadcast %cst_80 : f32 to vector<4x32xf32>
    %241 = arith.addf %240, %239 : vector<4x32xf32>
    %242 = arith.divf %240, %241 : vector<4x32xf32>
    %243 = vector.extract_strided_slice %236 {offsets = [0, 32], sizes = [4, 32], strides = [1, 1]} : vector<4x128xf32> to vector<4x32xf32>
    %244 = arith.negf %243 : vector<4x32xf32>
    %245 = math.exp %244 : vector<4x32xf32>
    %cst_81 = arith.constant 1.000000e+00 : f32
    %246 = vector.broadcast %cst_81 : f32 to vector<4x32xf32>
    %247 = arith.addf %246, %245 : vector<4x32xf32>
    %248 = arith.divf %246, %247 : vector<4x32xf32>
    %249 = vector.extract_strided_slice %236 {offsets = [0, 64], sizes = [4, 32], strides = [1, 1]} : vector<4x128xf32> to vector<4x32xf32>
    %250 = vector.extract_strided_slice %236 {offsets = [0, 96], sizes = [4, 32], strides = [1, 1]} : vector<4x128xf32> to vector<4x32xf32>
    %251 = arith.mulf %242, %250 : vector<4x32xf32>
    %252 = arith.addf %249, %251 : vector<4x32xf32>
    %253 = math.tanh %252 : vector<4x32xf32>
    %cst_82 = arith.constant 1.000000e+00 : f32
    %254 = vector.broadcast %cst_82 : f32 to vector<4x32xf32>
    %255 = arith.subf %254, %248 : vector<4x32xf32>
    %256 = arith.mulf %255, %253 : vector<4x32xf32>
    %257 = arith.mulf %248, %164 : vector<4x32xf32>
    %258 = arith.addf %256, %257 : vector<4x32xf32>
    %259 = tpu.concatenate %258, %194 in 1 : vector<4x32xf32>, vector<4x32xf32> -> vector<4x64xf32>
    %c1_83 = arith.constant 1 : index
    %c0_84 = arith.constant 0 : index
    %c0_85 = arith.constant 0 : index
    %260 = vector.load %arg7[%c1_83, %c0_84, %c0_85] : memref<2x64x128xf32, #tpu.memory_space<vmem>>, vector<1x64x128xf32>
    %261 = vector.shape_cast %260 : vector<1x64x128xf32> to vector<64x128xf32>
    %cst_86 = arith.constant dense<0.000000e+00> : vector<4x128xf32>
    %262 = tpu.matmul %259, %261, %cst_86 {dimension_numbers = #tpu.dot_dimension_numbers<[1], [0], [0], [1], [0, 0, 1, 1], [], []>} : vector<4x64xf32>, vector<64x128xf32>, vector<4x128xf32> -> vector<4x128xf32>
    %263 = vector.extract_strided_slice %5 {offsets = [1, 0, 0], sizes = [1, 1, 128], strides = [1, 1, 1]} : vector<2x1x128xf32> to vector<1x1x128xf32>
    %264 = vector.shape_cast %263 : vector<1x1x128xf32> to vector<1x128xf32>
    %265 = vector.broadcast %264 : vector<1x128xf32> to vector<4x128xf32>
    %266 = arith.addf %262, %265 : vector<4x128xf32>
    %267 = vector.extract_strided_slice %266 {offsets = [0, 0], sizes = [4, 32], strides = [1, 1]} : vector<4x128xf32> to vector<4x32xf32>
    %268 = arith.negf %267 : vector<4x32xf32>
    %269 = math.exp %268 : vector<4x32xf32>
    %cst_87 = arith.constant 1.000000e+00 : f32
    %270 = vector.broadcast %cst_87 : f32 to vector<4x32xf32>
    %271 = arith.addf %270, %269 : vector<4x32xf32>
    %272 = arith.divf %270, %271 : vector<4x32xf32>
    %273 = vector.extract_strided_slice %266 {offsets = [0, 32], sizes = [4, 32], strides = [1, 1]} : vector<4x128xf32> to vector<4x32xf32>
    %274 = arith.negf %273 : vector<4x32xf32>
    %275 = math.exp %274 : vector<4x32xf32>
    %cst_88 = arith.constant 1.000000e+00 : f32
    %276 = vector.broadcast %cst_88 : f32 to vector<4x32xf32>
    %277 = arith.addf %276, %275 : vector<4x32xf32>
    %278 = arith.divf %276, %277 : vector<4x32xf32>
    %279 = vector.extract_strided_slice %266 {offsets = [0, 64], sizes = [4, 32], strides = [1, 1]} : vector<4x128xf32> to vector<4x32xf32>
    %280 = vector.extract_strided_slice %266 {offsets = [0, 96], sizes = [4, 32], strides = [1, 1]} : vector<4x128xf32> to vector<4x32xf32>
    %281 = arith.mulf %272, %280 : vector<4x32xf32>
    %282 = arith.addf %279, %281 : vector<4x32xf32>
    %283 = math.tanh %282 : vector<4x32xf32>
    %cst_89 = arith.constant 1.000000e+00 : f32
    %284 = vector.broadcast %cst_89 : f32 to vector<4x32xf32>
    %285 = arith.subf %284, %278 : vector<4x32xf32>
    %286 = arith.mulf %285, %283 : vector<4x32xf32>
    %287 = arith.mulf %278, %194 : vector<4x32xf32>
    %288 = arith.addf %286, %287 : vector<4x32xf32>
    %c4_i32_90 = arith.constant 4 : i32
    %289 = arith.muli %c2_i32, %c4_i32_90 : i32
    %290 = arith.index_cast %289 : i32 to index
    %c0_91 = arith.constant 0 : index
    %291 = vector.load %arg14[%290, %c0_91] : memref<24x32xf32, #tpu.memory_space<vmem>>, vector<4x32xf32>
    tpu.vector_store %arg14[%290, %c0_91], %288 {strides = array<i32>} : memref<24x32xf32, #tpu.memory_space<vmem>>, vector<4x32xf32>,
    %c3_i32 = arith.constant 3 : i32
    %cst_92 = arith.constant dense<0.000000e+00> : vector<4x32xf32>
    %292 = tpu.matmul %288, %3, %cst_92 {dimension_numbers = #tpu.dot_dimension_numbers<[1], [0], [0], [1], [0, 0, 1, 1], [], []>} : vector<4x32xf32>, vector<32x32xf32>, vector<4x32xf32> -> vector<4x32xf32>
    %293 = vector.shape_cast %292 : vector<4x32xf32> to vector<4x1x32xf32>
    %294 = vector.broadcast %293 : vector<4x1x32xf32> to vector<4x8x32xf32>
    %295 = arith.addf %294, %1 : vector<4x8x32xf32>
    %296 = math.tanh %295 : vector<4x8x32xf32>
    %297 = vector.shape_cast %4 : vector<1x32xf32> to vector<1x1x32xf32>
    %298 = vector.broadcast %297 : vector<1x1x32xf32> to vector<4x8x32xf32>
    %299 = arith.mulf %296, %298 : vector<4x8x32xf32>
    %cst_93 = arith.constant dense<0.000000e+00> : vector<4x8xf32>
    %300 = vector.multi_reduction <add>, %299, %cst_93 [2] : vector<4x8x32xf32> to vector<4x8xf32>
    %301 = arith.addf %300, %2 : vector<4x8xf32>
    %cst_94 = arith.constant dense<0xFF800000> : vector<4xf32>
    %302 = vector.multi_reduction <maximumf>, %301, %cst_94 [1] : vector<4x8xf32> to vector<4xf32>
    %303 = vector.shape_cast %302 : vector<4xf32> to vector<4x1xf32>
    %304 = vector.broadcast %303 : vector<4x1xf32> to vector<4x8xf32>
    %305 = arith.subf %301, %304 : vector<4x8xf32>
    %306 = math.exp %305 : vector<4x8xf32>
    %cst_95 = arith.constant dense<0.000000e+00> : vector<4xf32>
    %307 = vector.multi_reduction <add>, %306, %cst_95 [1] : vector<4x8xf32> to vector<4xf32>
    %308 = vector.shape_cast %307 : vector<4xf32> to vector<4x1xf32>
    %309 = vector.broadcast %308 : vector<4x1xf32> to vector<4x8xf32>
    %310 = arith.divf %306, %309 : vector<4x8xf32>
    %311 = arith.index_cast %c3_i32 : i32 to index
    %c0_96 = arith.constant 0 : index
    %c0_97 = arith.constant 0 : index
    %312 = vector.load %arg15[%311, %c0_96, %c0_97] : memref<6x4x8xf32, #tpu.memory_space<vmem>>, vector<1x4x8xf32>
    %313 = vector.shape_cast %312 : vector<1x4x8xf32> to vector<4x8xf32>
    %314 = vector.shape_cast %310 : vector<4x8xf32> to vector<1x4x8xf32>
    tpu.vector_store %arg15[%311, %c0_96, %c0_97], %314 {strides = array<i32>} : memref<6x4x8xf32, #tpu.memory_space<vmem>>, vector<1x4x8xf32>,
    %315 = vector.shape_cast %310 : vector<4x8xf32> to vector<4x8x1xf32>
    %316 = vector.broadcast %315 : vector<4x8x1xf32> to vector<4x8x32xf32>
    %317 = arith.mulf %316, %0 : vector<4x8x32xf32>
    %cst_98 = arith.constant dense<0.000000e+00> : vector<4x32xf32>
    %318 = vector.multi_reduction <add>, %317, %cst_98 [1] : vector<4x8x32xf32> to vector<4x32xf32>
    %319 = arith.index_cast %c3_i32 : i32 to index
    %c0_99 = arith.constant 0 : index
    %c0_100 = arith.constant 0 : index
    %320 = vector.load %arg0[%319, %c0_99, %c0_100] : memref<6x4x128xf32, #tpu.memory_space<vmem>>, vector<1x4x128xf32>
    %321 = vector.shape_cast %320 : vector<1x4x128xf32> to vector<4x128xf32>
    %322 = tpu.concatenate %318, %258 in 1 : vector<4x32xf32>, vector<4x32xf32> -> vector<4x64xf32>
    %c0_101 = arith.constant 0 : index
    %c0_102 = arith.constant 0 : index
    %c0_103 = arith.constant 0 : index
    %323 = vector.load %arg7[%c0_101, %c0_102, %c0_103] : memref<2x64x128xf32, #tpu.memory_space<vmem>>, vector<1x64x128xf32>
    %324 = vector.shape_cast %323 : vector<1x64x128xf32> to vector<64x128xf32>
    %cst_104 = arith.constant dense<0.000000e+00> : vector<4x128xf32>
    %325 = tpu.matmul %322, %324, %cst_104 {dimension_numbers = #tpu.dot_dimension_numbers<[1], [0], [0], [1], [0, 0, 1, 1], [], []>} : vector<4x64xf32>, vector<64x128xf32>, vector<4x128xf32> -> vector<4x128xf32>
    %326 = vector.extract_strided_slice %5 {offsets = [0, 0, 0], sizes = [1, 1, 128], strides = [1, 1, 1]} : vector<2x1x128xf32> to vector<1x1x128xf32>
    %327 = vector.shape_cast %326 : vector<1x1x128xf32> to vector<1x128xf32>
    %328 = vector.broadcast %327 : vector<1x128xf32> to vector<4x128xf32>
    %329 = arith.addf %325, %328 : vector<4x128xf32>
    %330 = arith.addf %329, %321 : vector<4x128xf32>
    %331 = vector.extract_strided_slice %330 {offsets = [0, 0], sizes = [4, 32], strides = [1, 1]} : vector<4x128xf32> to vector<4x32xf32>
    %332 = arith.negf %331 : vector<4x32xf32>
    %333 = math.exp %332 : vector<4x32xf32>
    %cst_105 = arith.constant 1.000000e+00 : f32
    %334 = vector.broadcast %cst_105 : f32 to vector<4x32xf32>
    %335 = arith.addf %334, %333 : vector<4x32xf32>
    %336 = arith.divf %334, %335 : vector<4x32xf32>
    %337 = vector.extract_strided_slice %330 {offsets = [0, 32], sizes = [4, 32], strides = [1, 1]} : vector<4x128xf32> to vector<4x32xf32>
    %338 = arith.negf %337 : vector<4x32xf32>
    %339 = math.exp %338 : vector<4x32xf32>
    %cst_106 = arith.constant 1.000000e+00 : f32
    %340 = vector.broadcast %cst_106 : f32 to vector<4x32xf32>
    %341 = arith.addf %340, %339 : vector<4x32xf32>
    %342 = arith.divf %340, %341 : vector<4x32xf32>
    %343 = vector.extract_strided_slice %330 {offsets = [0, 64], sizes = [4, 32], strides = [1, 1]} : vector<4x128xf32> to vector<4x32xf32>
    %344 = vector.extract_strided_slice %330 {offsets = [0, 96], sizes = [4, 32], strides = [1, 1]} : vector<4x128xf32> to vector<4x32xf32>
    %345 = arith.mulf %336, %344 : vector<4x32xf32>
    %346 = arith.addf %343, %345 : vector<4x32xf32>
    %347 = math.tanh %346 : vector<4x32xf32>
    %cst_107 = arith.constant 1.000000e+00 : f32
    %348 = vector.broadcast %cst_107 : f32 to vector<4x32xf32>
    %349 = arith.subf %348, %342 : vector<4x32xf32>
    %350 = arith.mulf %349, %347 : vector<4x32xf32>
    %351 = arith.mulf %342, %258 : vector<4x32xf32>
    %352 = arith.addf %350, %351 : vector<4x32xf32>
    %353 = tpu.concatenate %352, %288 in 1 : vector<4x32xf32>, vector<4x32xf32> -> vector<4x64xf32>
    %c1_108 = arith.constant 1 : index
    %c0_109 = arith.constant 0 : index
    %c0_110 = arith.constant 0 : index
    %354 = vector.load %arg7[%c1_108, %c0_109, %c0_110] : memref<2x64x128xf32, #tpu.memory_space<vmem>>, vector<1x64x128xf32>
    %355 = vector.shape_cast %354 : vector<1x64x128xf32> to vector<64x128xf32>
    %cst_111 = arith.constant dense<0.000000e+00> : vector<4x128xf32>
    %356 = tpu.matmul %353, %355, %cst_111 {dimension_numbers = #tpu.dot_dimension_numbers<[1], [0], [0], [1], [0, 0, 1, 1], [], []>} : vector<4x64xf32>, vector<64x128xf32>, vector<4x128xf32> -> vector<4x128xf32>
    %357 = vector.extract_strided_slice %5 {offsets = [1, 0, 0], sizes = [1, 1, 128], strides = [1, 1, 1]} : vector<2x1x128xf32> to vector<1x1x128xf32>
    %358 = vector.shape_cast %357 : vector<1x1x128xf32> to vector<1x128xf32>
    %359 = vector.broadcast %358 : vector<1x128xf32> to vector<4x128xf32>
    %360 = arith.addf %356, %359 : vector<4x128xf32>
    %361 = vector.extract_strided_slice %360 {offsets = [0, 0], sizes = [4, 32], strides = [1, 1]} : vector<4x128xf32> to vector<4x32xf32>
    %362 = arith.negf %361 : vector<4x32xf32>
    %363 = math.exp %362 : vector<4x32xf32>
    %cst_112 = arith.constant 1.000000e+00 : f32
    %364 = vector.broadcast %cst_112 : f32 to vector<4x32xf32>
    %365 = arith.addf %364, %363 : vector<4x32xf32>
    %366 = arith.divf %364, %365 : vector<4x32xf32>
    %367 = vector.extract_strided_slice %360 {offsets = [0, 32], sizes = [4, 32], strides = [1, 1]} : vector<4x128xf32> to vector<4x32xf32>
    %368 = arith.negf %367 : vector<4x32xf32>
    %369 = math.exp %368 : vector<4x32xf32>
    %cst_113 = arith.constant 1.000000e+00 : f32
    %370 = vector.broadcast %cst_113 : f32 to vector<4x32xf32>
    %371 = arith.addf %370, %369 : vector<4x32xf32>
    %372 = arith.divf %370, %371 : vector<4x32xf32>
    %373 = vector.extract_strided_slice %360 {offsets = [0, 64], sizes = [4, 32], strides = [1, 1]} : vector<4x128xf32> to vector<4x32xf32>
    %374 = vector.extract_strided_slice %360 {offsets = [0, 96], sizes = [4, 32], strides = [1, 1]} : vector<4x128xf32> to vector<4x32xf32>
    %375 = arith.mulf %366, %374 : vector<4x32xf32>
    %376 = arith.addf %373, %375 : vector<4x32xf32>
    %377 = math.tanh %376 : vector<4x32xf32>
    %cst_114 = arith.constant 1.000000e+00 : f32
    %378 = vector.broadcast %cst_114 : f32 to vector<4x32xf32>
    %379 = arith.subf %378, %372 : vector<4x32xf32>
    %380 = arith.mulf %379, %377 : vector<4x32xf32>
    %381 = arith.mulf %372, %288 : vector<4x32xf32>
    %382 = arith.addf %380, %381 : vector<4x32xf32>
    %c4_i32_115 = arith.constant 4 : i32
    %383 = arith.muli %c3_i32, %c4_i32_115 : i32
    %384 = arith.index_cast %383 : i32 to index
    %c0_116 = arith.constant 0 : index
    %385 = vector.load %arg14[%384, %c0_116] : memref<24x32xf32, #tpu.memory_space<vmem>>, vector<4x32xf32>
    tpu.vector_store %arg14[%384, %c0_116], %382 {strides = array<i32>} : memref<24x32xf32, #tpu.memory_space<vmem>>, vector<4x32xf32>,
    %c4_i32_117 = arith.constant 4 : i32
    %cst_118 = arith.constant dense<0.000000e+00> : vector<4x32xf32>
    %386 = tpu.matmul %382, %3, %cst_118 {dimension_numbers = #tpu.dot_dimension_numbers<[1], [0], [0], [1], [0, 0, 1, 1], [], []>} : vector<4x32xf32>, vector<32x32xf32>, vector<4x32xf32> -> vector<4x32xf32>
    %387 = vector.shape_cast %386 : vector<4x32xf32> to vector<4x1x32xf32>
    %388 = vector.broadcast %387 : vector<4x1x32xf32> to vector<4x8x32xf32>
    %389 = arith.addf %388, %1 : vector<4x8x32xf32>
    %390 = math.tanh %389 : vector<4x8x32xf32>
    %391 = vector.shape_cast %4 : vector<1x32xf32> to vector<1x1x32xf32>
    %392 = vector.broadcast %391 : vector<1x1x32xf32> to vector<4x8x32xf32>
    %393 = arith.mulf %390, %392 : vector<4x8x32xf32>
    %cst_119 = arith.constant dense<0.000000e+00> : vector<4x8xf32>
    %394 = vector.multi_reduction <add>, %393, %cst_119 [2] : vector<4x8x32xf32> to vector<4x8xf32>
    %395 = arith.addf %394, %2 : vector<4x8xf32>
    %cst_120 = arith.constant dense<0xFF800000> : vector<4xf32>
    %396 = vector.multi_reduction <maximumf>, %395, %cst_120 [1] : vector<4x8xf32> to vector<4xf32>
    %397 = vector.shape_cast %396 : vector<4xf32> to vector<4x1xf32>
    %398 = vector.broadcast %397 : vector<4x1xf32> to vector<4x8xf32>
    %399 = arith.subf %395, %398 : vector<4x8xf32>
    %400 = math.exp %399 : vector<4x8xf32>
    %cst_121 = arith.constant dense<0.000000e+00> : vector<4xf32>
    %401 = vector.multi_reduction <add>, %400, %cst_121 [1] : vector<4x8xf32> to vector<4xf32>
    %402 = vector.shape_cast %401 : vector<4xf32> to vector<4x1xf32>
    %403 = vector.broadcast %402 : vector<4x1xf32> to vector<4x8xf32>
    %404 = arith.divf %400, %403 : vector<4x8xf32>
    %405 = arith.index_cast %c4_i32_117 : i32 to index
    %c0_122 = arith.constant 0 : index
    %c0_123 = arith.constant 0 : index
    %406 = vector.load %arg15[%405, %c0_122, %c0_123] : memref<6x4x8xf32, #tpu.memory_space<vmem>>, vector<1x4x8xf32>
    %407 = vector.shape_cast %406 : vector<1x4x8xf32> to vector<4x8xf32>
    %408 = vector.shape_cast %404 : vector<4x8xf32> to vector<1x4x8xf32>
    tpu.vector_store %arg15[%405, %c0_122, %c0_123], %408 {strides = array<i32>} : memref<6x4x8xf32, #tpu.memory_space<vmem>>, vector<1x4x8xf32>,
    %409 = vector.shape_cast %404 : vector<4x8xf32> to vector<4x8x1xf32>
    %410 = vector.broadcast %409 : vector<4x8x1xf32> to vector<4x8x32xf32>
    %411 = arith.mulf %410, %0 : vector<4x8x32xf32>
    %cst_124 = arith.constant dense<0.000000e+00> : vector<4x32xf32>
    %412 = vector.multi_reduction <add>, %411, %cst_124 [1] : vector<4x8x32xf32> to vector<4x32xf32>
    %413 = arith.index_cast %c4_i32_117 : i32 to index
    %c0_125 = arith.constant 0 : index
    %c0_126 = arith.constant 0 : index
    %414 = vector.load %arg0[%413, %c0_125, %c0_126] : memref<6x4x128xf32, #tpu.memory_space<vmem>>, vector<1x4x128xf32>
    %415 = vector.shape_cast %414 : vector<1x4x128xf32> to vector<4x128xf32>
    %416 = tpu.concatenate %412, %352 in 1 : vector<4x32xf32>, vector<4x32xf32> -> vector<4x64xf32>
    %c0_127 = arith.constant 0 : index
    %c0_128 = arith.constant 0 : index
    %c0_129 = arith.constant 0 : index
    %417 = vector.load %arg7[%c0_127, %c0_128, %c0_129] : memref<2x64x128xf32, #tpu.memory_space<vmem>>, vector<1x64x128xf32>
    %418 = vector.shape_cast %417 : vector<1x64x128xf32> to vector<64x128xf32>
    %cst_130 = arith.constant dense<0.000000e+00> : vector<4x128xf32>
    %419 = tpu.matmul %416, %418, %cst_130 {dimension_numbers = #tpu.dot_dimension_numbers<[1], [0], [0], [1], [0, 0, 1, 1], [], []>} : vector<4x64xf32>, vector<64x128xf32>, vector<4x128xf32> -> vector<4x128xf32>
    %420 = vector.extract_strided_slice %5 {offsets = [0, 0, 0], sizes = [1, 1, 128], strides = [1, 1, 1]} : vector<2x1x128xf32> to vector<1x1x128xf32>
    %421 = vector.shape_cast %420 : vector<1x1x128xf32> to vector<1x128xf32>
    %422 = vector.broadcast %421 : vector<1x128xf32> to vector<4x128xf32>
    %423 = arith.addf %419, %422 : vector<4x128xf32>
    %424 = arith.addf %423, %415 : vector<4x128xf32>
    %425 = vector.extract_strided_slice %424 {offsets = [0, 0], sizes = [4, 32], strides = [1, 1]} : vector<4x128xf32> to vector<4x32xf32>
    %426 = arith.negf %425 : vector<4x32xf32>
    %427 = math.exp %426 : vector<4x32xf32>
    %cst_131 = arith.constant 1.000000e+00 : f32
    %428 = vector.broadcast %cst_131 : f32 to vector<4x32xf32>
    %429 = arith.addf %428, %427 : vector<4x32xf32>
    %430 = arith.divf %428, %429 : vector<4x32xf32>
    %431 = vector.extract_strided_slice %424 {offsets = [0, 32], sizes = [4, 32], strides = [1, 1]} : vector<4x128xf32> to vector<4x32xf32>
    %432 = arith.negf %431 : vector<4x32xf32>
    %433 = math.exp %432 : vector<4x32xf32>
    %cst_132 = arith.constant 1.000000e+00 : f32
    %434 = vector.broadcast %cst_132 : f32 to vector<4x32xf32>
    %435 = arith.addf %434, %433 : vector<4x32xf32>
    %436 = arith.divf %434, %435 : vector<4x32xf32>
    %437 = vector.extract_strided_slice %424 {offsets = [0, 64], sizes = [4, 32], strides = [1, 1]} : vector<4x128xf32> to vector<4x32xf32>
    %438 = vector.extract_strided_slice %424 {offsets = [0, 96], sizes = [4, 32], strides = [1, 1]} : vector<4x128xf32> to vector<4x32xf32>
    %439 = arith.mulf %430, %438 : vector<4x32xf32>
    %440 = arith.addf %437, %439 : vector<4x32xf32>
    %441 = math.tanh %440 : vector<4x32xf32>
    %cst_133 = arith.constant 1.000000e+00 : f32
    %442 = vector.broadcast %cst_133 : f32 to vector<4x32xf32>
    %443 = arith.subf %442, %436 : vector<4x32xf32>
    %444 = arith.mulf %443, %441 : vector<4x32xf32>
    %445 = arith.mulf %436, %352 : vector<4x32xf32>
    %446 = arith.addf %444, %445 : vector<4x32xf32>
    %447 = tpu.concatenate %446, %382 in 1 : vector<4x32xf32>, vector<4x32xf32> -> vector<4x64xf32>
    %c1_134 = arith.constant 1 : index
    %c0_135 = arith.constant 0 : index
    %c0_136 = arith.constant 0 : index
    %448 = vector.load %arg7[%c1_134, %c0_135, %c0_136] : memref<2x64x128xf32, #tpu.memory_space<vmem>>, vector<1x64x128xf32>
    %449 = vector.shape_cast %448 : vector<1x64x128xf32> to vector<64x128xf32>
    %cst_137 = arith.constant dense<0.000000e+00> : vector<4x128xf32>
    %450 = tpu.matmul %447, %449, %cst_137 {dimension_numbers = #tpu.dot_dimension_numbers<[1], [0], [0], [1], [0, 0, 1, 1], [], []>} : vector<4x64xf32>, vector<64x128xf32>, vector<4x128xf32> -> vector<4x128xf32>
    %451 = vector.extract_strided_slice %5 {offsets = [1, 0, 0], sizes = [1, 1, 128], strides = [1, 1, 1]} : vector<2x1x128xf32> to vector<1x1x128xf32>
    %452 = vector.shape_cast %451 : vector<1x1x128xf32> to vector<1x128xf32>
    %453 = vector.broadcast %452 : vector<1x128xf32> to vector<4x128xf32>
    %454 = arith.addf %450, %453 : vector<4x128xf32>
    %455 = vector.extract_strided_slice %454 {offsets = [0, 0], sizes = [4, 32], strides = [1, 1]} : vector<4x128xf32> to vector<4x32xf32>
    %456 = arith.negf %455 : vector<4x32xf32>
    %457 = math.exp %456 : vector<4x32xf32>
    %cst_138 = arith.constant 1.000000e+00 : f32
    %458 = vector.broadcast %cst_138 : f32 to vector<4x32xf32>
    %459 = arith.addf %458, %457 : vector<4x32xf32>
    %460 = arith.divf %458, %459 : vector<4x32xf32>
    %461 = vector.extract_strided_slice %454 {offsets = [0, 32], sizes = [4, 32], strides = [1, 1]} : vector<4x128xf32> to vector<4x32xf32>
    %462 = arith.negf %461 : vector<4x32xf32>
    %463 = math.exp %462 : vector<4x32xf32>
    %cst_139 = arith.constant 1.000000e+00 : f32
    %464 = vector.broadcast %cst_139 : f32 to vector<4x32xf32>
    %465 = arith.addf %464, %463 : vector<4x32xf32>
    %466 = arith.divf %464, %465 : vector<4x32xf32>
    %467 = vector.extract_strided_slice %454 {offsets = [0, 64], sizes = [4, 32], strides = [1, 1]} : vector<4x128xf32> to vector<4x32xf32>
    %468 = vector.extract_strided_slice %454 {offsets = [0, 96], sizes = [4, 32], strides = [1, 1]} : vector<4x128xf32> to vector<4x32xf32>
    %469 = arith.mulf %460, %468 : vector<4x32xf32>
    %470 = arith.addf %467, %469 : vector<4x32xf32>
    %471 = math.tanh %470 : vector<4x32xf32>
    %cst_140 = arith.constant 1.000000e+00 : f32
    %472 = vector.broadcast %cst_140 : f32 to vector<4x32xf32>
    %473 = arith.subf %472, %466 : vector<4x32xf32>
    %474 = arith.mulf %473, %471 : vector<4x32xf32>
    %475 = arith.mulf %466, %382 : vector<4x32xf32>
    %476 = arith.addf %474, %475 : vector<4x32xf32>
    %c4_i32_141 = arith.constant 4 : i32
    %477 = arith.muli %c4_i32_117, %c4_i32_141 : i32
    %478 = arith.index_cast %477 : i32 to index
    %c0_142 = arith.constant 0 : index
    %479 = vector.load %arg14[%478, %c0_142] : memref<24x32xf32, #tpu.memory_space<vmem>>, vector<4x32xf32>
    tpu.vector_store %arg14[%478, %c0_142], %476 {strides = array<i32>} : memref<24x32xf32, #tpu.memory_space<vmem>>, vector<4x32xf32>,
    %c5_i32 = arith.constant 5 : i32
    %cst_143 = arith.constant dense<0.000000e+00> : vector<4x32xf32>
    %480 = tpu.matmul %476, %3, %cst_143 {dimension_numbers = #tpu.dot_dimension_numbers<[1], [0], [0], [1], [0, 0, 1, 1], [], []>} : vector<4x32xf32>, vector<32x32xf32>, vector<4x32xf32> -> vector<4x32xf32>
    %481 = vector.shape_cast %480 : vector<4x32xf32> to vector<4x1x32xf32>
    %482 = vector.broadcast %481 : vector<4x1x32xf32> to vector<4x8x32xf32>
    %483 = arith.addf %482, %1 : vector<4x8x32xf32>
    %484 = math.tanh %483 : vector<4x8x32xf32>
    %485 = vector.shape_cast %4 : vector<1x32xf32> to vector<1x1x32xf32>
    %486 = vector.broadcast %485 : vector<1x1x32xf32> to vector<4x8x32xf32>
    %487 = arith.mulf %484, %486 : vector<4x8x32xf32>
    %cst_144 = arith.constant dense<0.000000e+00> : vector<4x8xf32>
    %488 = vector.multi_reduction <add>, %487, %cst_144 [2] : vector<4x8x32xf32> to vector<4x8xf32>
    %489 = arith.addf %488, %2 : vector<4x8xf32>
    %cst_145 = arith.constant dense<0xFF800000> : vector<4xf32>
    %490 = vector.multi_reduction <maximumf>, %489, %cst_145 [1] : vector<4x8xf32> to vector<4xf32>
    %491 = vector.shape_cast %490 : vector<4xf32> to vector<4x1xf32>
    %492 = vector.broadcast %491 : vector<4x1xf32> to vector<4x8xf32>
    %493 = arith.subf %489, %492 : vector<4x8xf32>
    %494 = math.exp %493 : vector<4x8xf32>
    %cst_146 = arith.constant dense<0.000000e+00> : vector<4xf32>
    %495 = vector.multi_reduction <add>, %494, %cst_146 [1] : vector<4x8xf32> to vector<4xf32>
    %496 = vector.shape_cast %495 : vector<4xf32> to vector<4x1xf32>
    %497 = vector.broadcast %496 : vector<4x1xf32> to vector<4x8xf32>
    %498 = arith.divf %494, %497 : vector<4x8xf32>
    %499 = arith.index_cast %c5_i32 : i32 to index
    %c0_147 = arith.constant 0 : index
    %c0_148 = arith.constant 0 : index
    %500 = vector.load %arg15[%499, %c0_147, %c0_148] : memref<6x4x8xf32, #tpu.memory_space<vmem>>, vector<1x4x8xf32>
    %501 = vector.shape_cast %500 : vector<1x4x8xf32> to vector<4x8xf32>
    %502 = vector.shape_cast %498 : vector<4x8xf32> to vector<1x4x8xf32>
    tpu.vector_store %arg15[%499, %c0_147, %c0_148], %502 {strides = array<i32>} : memref<6x4x8xf32, #tpu.memory_space<vmem>>, vector<1x4x8xf32>,
    %503 = vector.shape_cast %498 : vector<4x8xf32> to vector<4x8x1xf32>
    %504 = vector.broadcast %503 : vector<4x8x1xf32> to vector<4x8x32xf32>
    %505 = arith.mulf %504, %0 : vector<4x8x32xf32>
    %cst_149 = arith.constant dense<0.000000e+00> : vector<4x32xf32>
    %506 = vector.multi_reduction <add>, %505, %cst_149 [1] : vector<4x8x32xf32> to vector<4x32xf32>
    %507 = arith.index_cast %c5_i32 : i32 to index
    %c0_150 = arith.constant 0 : index
    %c0_151 = arith.constant 0 : index
    %508 = vector.load %arg0[%507, %c0_150, %c0_151] : memref<6x4x128xf32, #tpu.memory_space<vmem>>, vector<1x4x128xf32>
    %509 = vector.shape_cast %508 : vector<1x4x128xf32> to vector<4x128xf32>
    %510 = tpu.concatenate %506, %446 in 1 : vector<4x32xf32>, vector<4x32xf32> -> vector<4x64xf32>
    %c0_152 = arith.constant 0 : index
    %c0_153 = arith.constant 0 : index
    %c0_154 = arith.constant 0 : index
    %511 = vector.load %arg7[%c0_152, %c0_153, %c0_154] : memref<2x64x128xf32, #tpu.memory_space<vmem>>, vector<1x64x128xf32>
    %512 = vector.shape_cast %511 : vector<1x64x128xf32> to vector<64x128xf32>
    %cst_155 = arith.constant dense<0.000000e+00> : vector<4x128xf32>
    %513 = tpu.matmul %510, %512, %cst_155 {dimension_numbers = #tpu.dot_dimension_numbers<[1], [0], [0], [1], [0, 0, 1, 1], [], []>} : vector<4x64xf32>, vector<64x128xf32>, vector<4x128xf32> -> vector<4x128xf32>
    %514 = vector.extract_strided_slice %5 {offsets = [0, 0, 0], sizes = [1, 1, 128], strides = [1, 1, 1]} : vector<2x1x128xf32> to vector<1x1x128xf32>
    %515 = vector.shape_cast %514 : vector<1x1x128xf32> to vector<1x128xf32>
    %516 = vector.broadcast %515 : vector<1x128xf32> to vector<4x128xf32>
    %517 = arith.addf %513, %516 : vector<4x128xf32>
    %518 = arith.addf %517, %509 : vector<4x128xf32>
    %519 = vector.extract_strided_slice %518 {offsets = [0, 0], sizes = [4, 32], strides = [1, 1]} : vector<4x128xf32> to vector<4x32xf32>
    %520 = arith.negf %519 : vector<4x32xf32>
    %521 = math.exp %520 : vector<4x32xf32>
    %cst_156 = arith.constant 1.000000e+00 : f32
    %522 = vector.broadcast %cst_156 : f32 to vector<4x32xf32>
    %523 = arith.addf %522, %521 : vector<4x32xf32>
    %524 = arith.divf %522, %523 : vector<4x32xf32>
    %525 = vector.extract_strided_slice %518 {offsets = [0, 32], sizes = [4, 32], strides = [1, 1]} : vector<4x128xf32> to vector<4x32xf32>
    %526 = arith.negf %525 : vector<4x32xf32>
    %527 = math.exp %526 : vector<4x32xf32>
    %cst_157 = arith.constant 1.000000e+00 : f32
    %528 = vector.broadcast %cst_157 : f32 to vector<4x32xf32>
    %529 = arith.addf %528, %527 : vector<4x32xf32>
    %530 = arith.divf %528, %529 : vector<4x32xf32>
    %531 = vector.extract_strided_slice %518 {offsets = [0, 64], sizes = [4, 32], strides = [1, 1]} : vector<4x128xf32> to vector<4x32xf32>
    %532 = vector.extract_strided_slice %518 {offsets = [0, 96], sizes = [4, 32], strides = [1, 1]} : vector<4x128xf32> to vector<4x32xf32>
    %533 = arith.mulf %524, %532 : vector<4x32xf32>
    %534 = arith.addf %531, %533 : vector<4x32xf32>
    %535 = math.tanh %534 : vector<4x32xf32>
    %cst_158 = arith.constant 1.000000e+00 : f32
    %536 = vector.broadcast %cst_158 : f32 to vector<4x32xf32>
    %537 = arith.subf %536, %530 : vector<4x32xf32>
    %538 = arith.mulf %537, %535 : vector<4x32xf32>
    %539 = arith.mulf %530, %446 : vector<4x32xf32>
    %540 = arith.addf %538, %539 : vector<4x32xf32>
    %541 = tpu.concatenate %540, %476 in 1 : vector<4x32xf32>, vector<4x32xf32> -> vector<4x64xf32>
    %c1_159 = arith.constant 1 : index
    %c0_160 = arith.constant 0 : index
    %c0_161 = arith.constant 0 : index
    %542 = vector.load %arg7[%c1_159, %c0_160, %c0_161] : memref<2x64x128xf32, #tpu.memory_space<vmem>>, vector<1x64x128xf32>
    %543 = vector.shape_cast %542 : vector<1x64x128xf32> to vector<64x128xf32>
    %cst_162 = arith.constant dense<0.000000e+00> : vector<4x128xf32>
    %544 = tpu.matmul %541, %543, %cst_162 {dimension_numbers = #tpu.dot_dimension_numbers<[1], [0], [0], [1], [0, 0, 1, 1], [], []>} : vector<4x64xf32>, vector<64x128xf32>, vector<4x128xf32> -> vector<4x128xf32>
    %545 = vector.extract_strided_slice %5 {offsets = [1, 0, 0], sizes = [1, 1, 128], strides = [1, 1, 1]} : vector<2x1x128xf32> to vector<1x1x128xf32>
    %546 = vector.shape_cast %545 : vector<1x1x128xf32> to vector<1x128xf32>
    %547 = vector.broadcast %546 : vector<1x128xf32> to vector<4x128xf32>
    %548 = arith.addf %544, %547 : vector<4x128xf32>
    %549 = vector.extract_strided_slice %548 {offsets = [0, 0], sizes = [4, 32], strides = [1, 1]} : vector<4x128xf32> to vector<4x32xf32>
    %550 = arith.negf %549 : vector<4x32xf32>
    %551 = math.exp %550 : vector<4x32xf32>
    %cst_163 = arith.constant 1.000000e+00 : f32
    %552 = vector.broadcast %cst_163 : f32 to vector<4x32xf32>
    %553 = arith.addf %552, %551 : vector<4x32xf32>
    %554 = arith.divf %552, %553 : vector<4x32xf32>
    %555 = vector.extract_strided_slice %548 {offsets = [0, 32], sizes = [4, 32], strides = [1, 1]} : vector<4x128xf32> to vector<4x32xf32>
    %556 = arith.negf %555 : vector<4x32xf32>
    %557 = math.exp %556 : vector<4x32xf32>
    %cst_164 = arith.constant 1.000000e+00 : f32
    %558 = vector.broadcast %cst_164 : f32 to vector<4x32xf32>
    %559 = arith.addf %558, %557 : vector<4x32xf32>
    %560 = arith.divf %558, %559 : vector<4x32xf32>
    %561 = vector.extract_strided_slice %548 {offsets = [0, 64], sizes = [4, 32], strides = [1, 1]} : vector<4x128xf32> to vector<4x32xf32>
    %562 = vector.extract_strided_slice %548 {offsets = [0, 96], sizes = [4, 32], strides = [1, 1]} : vector<4x128xf32> to vector<4x32xf32>
    %563 = arith.mulf %554, %562 : vector<4x32xf32>
    %564 = arith.addf %561, %563 : vector<4x32xf32>
    %565 = math.tanh %564 : vector<4x32xf32>
    %cst_165 = arith.constant 1.000000e+00 : f32
    %566 = vector.broadcast %cst_165 : f32 to vector<4x32xf32>
    %567 = arith.subf %566, %560 : vector<4x32xf32>
    %568 = arith.mulf %567, %565 : vector<4x32xf32>
    %569 = arith.mulf %560, %476 : vector<4x32xf32>
    %570 = arith.addf %568, %569 : vector<4x32xf32>
    %c4_i32_166 = arith.constant 4 : i32
    %571 = arith.muli %c5_i32, %c4_i32_166 : i32
    %572 = arith.index_cast %571 : i32 to index
    %c0_167 = arith.constant 0 : index
    %573 = vector.load %arg14[%572, %c0_167] : memref<24x32xf32, #tpu.memory_space<vmem>>, vector<4x32xf32>
    tpu.vector_store %arg14[%572, %c0_167], %570 {strides = array<i32>} : memref<24x32xf32, #tpu.memory_space<vmem>>, vector<4x32xf32>,
    %c6_i32 = arith.constant 6 : i32
    %c0_168 = arith.constant 0 : index
    %c0_169 = arith.constant 0 : index
    %c0_170 = arith.constant 0 : index
    %574 = vector.load %arg13[%c0_168, %c0_169, %c0_170] : memref<2x4x32xf32, #tpu.memory_space<vmem>>, vector<1x4x32xf32>
    %575 = vector.shape_cast %574 : vector<1x4x32xf32> to vector<4x32xf32>
    %576 = vector.shape_cast %540 : vector<4x32xf32> to vector<1x4x32xf32>
    tpu.vector_store %arg13[%c0_168, %c0_169, %c0_170], %576 {strides = array<i32>} : memref<2x4x32xf32, #tpu.memory_space<vmem>>, vector<1x4x32xf32>,
    %c1_171 = arith.constant 1 : index
    %c0_172 = arith.constant 0 : index
    %c0_173 = arith.constant 0 : index
    %577 = vector.load %arg13[%c1_171, %c0_172, %c0_173] : memref<2x4x32xf32, #tpu.memory_space<vmem>>, vector<1x4x32xf32>
    %578 = vector.shape_cast %577 : vector<1x4x32xf32> to vector<4x32xf32>
    %579 = vector.shape_cast %570 : vector<4x32xf32> to vector<1x4x32xf32>
    tpu.vector_store %arg13[%c1_171, %c0_172, %c0_173], %579 {strides = array<i32>} : memref<2x4x32xf32, #tpu.memory_space<vmem>>, vector<1x4x32xf32>,
    %c0_174 = arith.constant 0 : index
    %c0_175 = arith.constant 0 : index
    %c0_176 = arith.constant 0 : index
    %580 = vector.load %arg15[%c0_174, %c0_175, %c0_176] : memref<6x4x8xf32, #tpu.memory_space<vmem>>, vector<6x4x8xf32>
    %c0_177 = arith.constant 0 : index
    %c0_178 = arith.constant 0 : index
    %c0_179 = arith.constant 0 : index
    %581 = vector.load %arg12[%c0_177, %c0_178, %c0_179] : memref<6x4x8xf32, #tpu.memory_space<vmem>>, vector<6x4x8xf32>
    tpu.vector_store %arg12[%c0_177, %c0_178, %c0_179], %580 {strides = array<i32>} : memref<6x4x8xf32, #tpu.memory_space<vmem>>, vector<6x4x8xf32>,
    %c0_180 = arith.constant 0 : index
    %c0_181 = arith.constant 0 : index
    %582 = vector.load %arg14[%c0_180, %c0_181] : memref<24x32xf32, #tpu.memory_space<vmem>>, vector<24x32xf32>
    %c0_182 = arith.constant 0 : index
    %c0_183 = arith.constant 0 : index
    %583 = vector.load %arg9[%c0_182, %c0_183] : memref<32x32xf32, #tpu.memory_space<vmem>>, vector<32x32xf32>
    %cst_184 = arith.constant dense<0.000000e+00> : vector<24x32xf32>
    %584 = tpu.matmul %582, %583, %cst_184 {dimension_numbers = #tpu.dot_dimension_numbers<[1], [0], [0], [1], [0, 0, 1, 1], [], []>} : vector<24x32xf32>, vector<32x32xf32>, vector<24x32xf32> -> vector<24x32xf32>
    %c0_185 = arith.constant 0 : index
    %c0_186 = arith.constant 0 : index
    %585 = vector.load %arg10[%c0_185, %c0_186] : memref<1x32xf32, #tpu.memory_space<vmem>>, vector<1x32xf32>
    %586 = vector.broadcast %585 : vector<1x32xf32> to vector<24x32xf32>
    %587 = arith.addf %584, %586 : vector<24x32xf32>
    %c0_187 = arith.constant 0 : index
    %c0_188 = arith.constant 0 : index
    %588 = vector.load %arg11[%c0_187, %c0_188] : memref<24x32xf32, #tpu.memory_space<vmem>>, vector<24x32xf32>
    tpu.vector_store %arg11[%c0_187, %c0_188], %587 {strides = array<i32>} : memref<24x32xf32, #tpu.memory_space<vmem>>, vector<24x32xf32>,
    return
  }
}

</mosaic_0001>

<bundles_post_ra>
// kernel: _decoder_forward.1
= control target key start
LH: loop header
LB: loop body
LE: loop exit
PB: predicated region body
PF: predicated region fallthrough
CT: control target
= control target key end

     0   :  { %19 = vsyncpa [#allocation5], 0  ;;  %v140_v1 = vlaneseq  ;;  %v4727_v2 = vmov 0.0   ;;  %vm4728_vm0 = vmmov 0   ;;  %s6227_s0 = inlined_call_operand.vmem [shape: f32[6,4,128], index: 0, kind: input, shape index: {}]   ;;  %s6228_s1 = inlined_call_operand.vmem [shape: f32[4,8,32], index: 1, kind: input, shape index: {}]   ;;  %s6229_s2 = inlined_call_operand.vmem [shape: f32[4,8,32], index: 2, kind: input, shape index: {}]   ;;  %s6230_s3 = inlined_call_operand.vmem [shape: f32[4,8], index: 3, kind: input, shape index: {}]   ;;  %s6231_s4 = inlined_call_operand.vmem [shape: f32[2,4,32], index: 4, kind: input, shape index: {}]   ;;  %s6232_s5 = inlined_call_operand.vmem [shape: f32[32,32], index: 5, kind: input, shape index: {}]   ;;  %s6233_s6 = inlined_call_operand.vmem [shape: f32[1,32], index: 6, kind: input, shape index: {}]   ;;  %s6234_s7 = inlined_call_operand.vmem [shape: f32[2,64,128], index: 7, kind: input, shape index: {}]   ;;  %s6235_s8 = inlined_call_operand.vmem [shape: f32[2,1,128], index: 8, kind: input, shape index: {}]   ;;  %s6236_s9 = inlined_call_operand.vmem [shape: f32[32,32], index: 9, kind: input, shape index: {}]   ;;  %s6237_s10 = inlined_call_operand.vmem [shape: f32[1,32], index: 10, kind: input, shape index: {}]   ;;  %s6238_s11 = inlined_call_operand.hbm [shape: f32[24,32], index: 11, kind: output, shape index: {0}]   ;;  %s6239_s12 = inlined_call_operand.hbm [shape: f32[6,4,8], index: 12, kind: output, shape index: {1}]   ;;  %s6240_s13 = inlined_call_operand.hbm [shape: f32[2,4,32], index: 13, kind: output, shape index: {2}]  }
   0x1   :  { %v4813_v0 = vld [vmem:[%s6232_s5 + $0x18] sm:$0xff]  ;;  %4091 = vmatprep.subr.mxu1 %v4727_v2  ;;  %v4819_v3 = vld [vmem:[%s6232_s5 + $0x10] sm:$0xff]  ;;  %4099 = vmatprep.mubr.msk.f32.mxu1 %vm4728_vm0, %v4727_v2  ;;  %v4832_v5 = vld [vmem:[%s6232_s5 + $0x8] sm:$0xff] }
   0x2   :  { %4092 = vmatpush3.msra.mxu1 %v4813_v0  ;;  %v4825_v4 = vshrl.u32 %v140_v1, 7  ;;  %4121 = vmatprep.subr.mxu0 %v4727_v2  ;;  %v4837_v6 = vld [vmem:[%s6230_s3] sm:$0xf] }
   0x3   :  { %4093 = vmatprep.subr.mxu1 %v4727_v2  ;;  %4137 = vmatprep.mubr.msk.f32.mxu0 %vm4728_vm0, %v4727_v2 }
   0x4   :  { %20 = vsyncpa [#allocation7], 0  ;;  %4094 = vmatpush3.msra.mxu1 %v4819_v3  ;;  %v4843_v7 = vsub.s32 1, %v4825_v4  ;;  %v4846_v8 = vsub.s32 2, %v4825_v4  ;;  %v4852_v9 = vld [vmem:[%s6232_s5] sm:$0xff]  ;;  %vm62_vm1 = vcmask 261120  }
   0x5   :  { %4095 = vmatprep.subr.mxu1 %v4727_v2  ;;  %v4858_v10 = vld [vmem:[%s6231_s4 + $0x4] sm:$0xf]  ;;  %v4729_v13 = vmov 1966171168   ;;  %v4875_v18 = vsub.s32 0, %v4825_v4  ;;  %v4889_v27 = vld [vmem:[%s6229_s2 + $0x8] sm:$0xff] }
   0x6   :  { %4096 = vmatpush3.msra.mxu1 %v4832_v5  ;;  %v222_v11 = vrot.slane %v4837_v6, %v4843_v7  ;;  %v229_v12 = vrot.slane %v4837_v6, %v4846_v8  ;;  %v138_v14 = vunpack.c.l.s4 %v4729_v13  ;;  %v4882_v23 = vld [vmem:[%s6229_s2] sm:$0xff]  ;;  %v4894_v28 = vld [vmem:[%s6229_s2 + $0x10] sm:$0xff]  ;;  %v4902_v33 = vld [vmem:[%s6229_s2 + $0x18] sm:$0xff]  ;;  %v4730_v51 = vmov 0   ;;  %s4731_s3 = smov 32   ;;  %s4732_s23 = smov 64  }
   0x7   :  { %4097 = vmatprep.subr.mxu1 %v4727_v2  ;;  %v4911_v38 = vld [vmem:[%s6233_s6] ss:$0 sm:$0xff]  ;;  %4416 = vset.pattern.permute.xlu1 %v4730_v51  ;;  %v4922_v52 = vsub.s32 3, %v4825_v4  ;;  %v215_v54 = vrot.slane %v4837_v6, %v4875_v18  ;;  %v265_v13 = vand.u32 127, %v140_v1  ;;  %vm282_vm2 = vcmask 1041409   ;;  %s4733_s19 = smov 96  }
   0x8   :  { %4098 = vmatpush3.msra.mxu1 %v4852_v9  ;;  %224 = vbcast.lane.b32.xlu1 %v222_v11, 256  ;;  %v139_v15 = vunpack.c.0.s8 %v138_v14  ;;  %vm284_vm3 = vcmask 1042434   ;;  %vm286_vm4 = vcmask 1043459   ;;  %vm289_vm5 = vcmask 60416  }
   0x9   :  { %4100 = vmatmul.mubr.msk.f32.vlgmr.msra.gmra.mxu1 %vm62_vm1, %v4858_v10  ;;  %4102 = vmatprep.subr.mxu1 %v4727_v2  ;;  %v236_v53 = vrot.slane %v4837_v6, %v4922_v52  ;;  %vm495_vm6 = vcmask 523264   ;;  %vm720_vm7 = vcmask 257024  }
   0xa   :  { %4118 = vmatprep.mubr.msk.f32.mxu1 %vm4728_vm0, %v4727_v2  ;;  %v4872_v16 = vsub.s32 %v139_v15, %v4825_v4  ;;  %4415 = vset.pattern.permute.xlu0 %v4730_v51  ;;  %v4942_v15 = vsub.s32 %v265_v13, %v4825_v4 }
   0xc   :  { %231 = vbcast.lane.b32.xlu1 %v229_v12, 256 }
  0x7a   :  { %v4928_v55 = vpop.permute.xlu1 %224 }
  0x7e   :  { %v4930_v56 = vpop.permute.xlu1 %231 }
  0xc9   :  { %v132_v17 = vpop.f32.mrf.mxu1 }
  0xca   :  { %v143_v19 = vrot.slane %v132_v17, %v4872_v16 }
  0xcb   :  { %v4101_v20 = vpop.f32.mrf.mxu1 }
  0xcc   :  { %v144_v21 = vcombine.high %v143_v19, %v143_v19  ;;  %v151_v22 = vrot.slane %v143_v19, %v4872_v16 }
  0xce   :  { %v158_v24 = vrot.slane %v144_v21, %v4872_v16  ;;  %v159_v25 = vcombine.high %v151_v22, %v151_v22  ;;  %v164_v26 = vrot.slane %v151_v22, %v4875_v18 }
  0xd0   :  { %v160_v29 = vcombine.high %v158_v24, %v158_v24  ;;  %v168_v30 = vrot.slane %v158_v24, %v4875_v18  ;;  %v172_v31 = vrot.slane %v159_v25, %v4875_v18  ;;  %v181_v32 = vadd.f32 %v164_v26, %v4882_v23 }
  0xd2   :  { %v176_v34 = vrot.slane %v160_v29, %v4875_v18  ;;  %v182_v35 = vadd.f32 %v168_v30, %v4889_v27  ;;  %v183_v36 = vadd.f32 %v172_v31, %v4894_v28  ;;  %4417 = vtanh.f32 %v181_v32 }
  0xd4   :  { %v184_v37 = vadd.f32 %v176_v34, %v4902_v33  ;;  %4419 = vtanh.f32 %v182_v35 }
  0xd5   :  { %4421 = vtanh.f32 %v183_v36 }
  0xd6   :  { %4423 = vtanh.f32 %v184_v37 }
  0xdf   :  { %v4418_v39 = vpop.eup %4417 }
  0xe0   :  { %v195_v40 = vmul.f32 %v4418_v39, %v4911_v38 }
  0xe1   :  { %v4420_v41 = vpop.eup %4419 }
  0xe2   :  { %v4422_v42 = vpop.eup %4421  ;;  %v199_v43 = vsel %vm62_vm1, %v195_v40, 0.0  ;;  %v196_v44 = vmul.f32 %v4420_v41, %v4911_v38 }
  0xe3   :  { %v4424_v45 = vpop.eup %4423  ;;  %200 = vadd.xlane.f32.xlu0 %v199_v43  ;;  %v197_v46 = vmul.f32 %v4422_v42, %v4911_v38 }
  0xe4   :  { %v198_v48 = vmul.f32 %v4424_v45, %v4911_v38  ;;  %v202_v49 = vsel %vm62_vm1, %v196_v44, 0.0 }
  0xe5   :  { %v205_v47 = vsel %vm62_vm1, %v197_v46, 0.0 }
  0xe6   :  { %206 = vadd.xlane.f32.xlu1 %v205_v47  ;;  %v208_v50 = vsel %vm62_vm1, %v198_v48, 0.0 }
  0xe7   :  { %203 = vadd.xlane.f32.xlu0 %v202_v49 }
  0xea   :  { %209 = vadd.xlane.f32.xlu1 %v208_v50 }
  0xfb   :  { %238 = vbcast.lane.b32.xlu1 %v236_v53, 256 }
  0xfd   :  { %217 = vbcast.lane.b32.xlu0 %v215_v54, 256 }
 0x16c   :  { %v201_v57 = vpop.xlane.xlu0 %200 }
 0x16f   :  { %v207_v58 = vpop.xlane.xlu1 %206 }
 0x170   :  { %v204_v59 = vpop.xlane.xlu0 %203  ;;  %v246_v63 = vadd.f32 %v4930_v56, %v207_v58 }
 0x171   :  { %v245_v60 = vadd.f32 %v4928_v55, %v204_v59 }
 0x173   :  { %v210_v61 = vpop.xlane.xlu1 %209  ;;  %256 = vperm.xlu1 %4416, %v245_v60  }
 0x174   :  { %v4933_v62 = vpop.permute.xlu0 %217 }
 0x175   :  { %v244_v11 = vadd.f32 %v4933_v62, %v201_v57 }
 0x177   :  { %v4937_v6 = vpop.permute.xlu1 %238  ;;  %259 = vperm.xlu1 %4416, %v246_v63   ;;  %253 = vperm.xlu0 %4415, %v244_v11  }
 0x178   :  { %v247_v12 = vadd.f32 %v4937_v6, %v210_v61 }
 0x17b   :  { %262 = vperm.xlu0 %4415, %v247_v12  }
 0x1ee   :  { %v257_v14 = vpop.permute.xlu1 %256 }
 0x1ef   :  { %v273_v20 = vrot.slane %v257_v14, %v4942_v15 }
 0x1f2   :  { %v260_v17 = vpop.permute.xlu1 %259  ;;  %v254_v19 = vpop.permute.xlu0 %253 }
 0x1f3   :  { %v269_v21 = vrot.slane %v254_v19, %v4942_v15  ;;  %v277_v22 = vrot.slane %v260_v17, %v4942_v15 }
 0x1f5   :  { %v283_v24 = vsel %vm282_vm2, %v273_v20, %v269_v21 }
 0x1f6   :  { %v263_v25 = vpop.permute.xlu0 %262  ;;  %v285_v4 = vsel %vm284_vm3, %v277_v22, %v283_v24 }
 0x1f7   :  { %v281_v1 = vrot.slane %v263_v25, %v4942_v15 }
 0x1f9   :  { %v287_v26 = vsel %vm286_vm4, %v281_v1, %v285_v4 }
 0x1fa   :  { %v290_v29 = vsel %vm289_vm5, %v287_v26, -inf }
 0x1fb   :  { %291 = vmax.xlane.f32.xlu1 %v290_v29  ;;  %v4971_v29 = vld [vmem:[%s6234_s7 + $0x38] sm:$0xff] }
 0x1fc   :  { %4103 = vmatpush3.msra.mxu1 %v4971_v29 }
 0x1fd   :  { %4104 = vmatprep.subr.mxu1 %v4727_v2 }
 0x284   :  { %v292_v30 = vpop.xlane.xlu1 %291 }
 0x285   :  { %v297_v31 = vrot.slane %v292_v30, %v4875_v18  ;;  %v301_v32 = vrot.slane %v292_v30, %v4843_v7  ;;  %v305_v34 = vrot.slane %v292_v30, %v4846_v8  ;;  %v309_v39 = vrot.slane %v292_v30, %v4922_v52  ;;  %v59_v30 = vld [vmem:[%s6231_s4] sm:$0xf] }
 0x287   :  { %v314_v35 = vsub.f32 %v244_v11, %v297_v31  ;;  %v315_v36 = vsub.f32 %v245_v60, %v301_v32  ;;  %v316_v40 = vsub.f32 %v246_v63, %v305_v34  ;;  %v317_v42 = vsub.f32 %v247_v12, %v309_v39  ;;  %v4981_v31 = vld [vmem:[%s6234_s7 + $0x30] sm:$0xff]  ;;  %v4989_v32 = vld [vmem:[%s6234_s7 + $0x28] sm:$0xff]  ;;  %v4996_v34 = vld [vmem:[%s6234_s7 + $0x20] sm:$0xff] }
 0x288   :  { %4105 = vmatpush3.msra.mxu1 %v4981_v31  ;;  %v5022_v39 = vld [vmem:[%s6234_s7] sm:$0xff] }
 0x289   :  { %v318_v37 = vmul.f32 1.442695, %v314_v35  ;;  %v320_v41 = vmul.f32 1.442695, %v315_v36  ;;  %v322_v43 = vmul.f32 1.442695, %v316_v40  ;;  %4106 = vmatprep.subr.mxu1 %v4727_v2 }
 0x28a   :  { %v324_v44 = vmul.f32 1.442695, %v317_v42  ;;  %4107 = vmatpush3.msra.mxu1 %v4989_v32  ;;  %v5002_v35 = vld [vmem:[%s6234_s7 + $0x18] sm:$0xff]  ;;  %v5008_v36 = vld [vmem:[%s6234_s7 + $0x10] sm:$0xff]  ;;  %v5031_v40 = vld [vmem:[%s6228_s1] sm:$0xff] }
 0x28b   :  { %4425 = vpow2.f32 %v318_v37  ;;  %4108 = vmatprep.subr.mxu1 %v4727_v2  ;;  %v5015_v37 = vld [vmem:[%s6234_s7 + $0x8] sm:$0xff] }
 0x28c   :  { %4427 = vpow2.f32 %v320_v41  ;;  %4109 = vmatpush3.msra.mxu1 %v4996_v34  ;;  %v5036_v41 = vld [vmem:[%s6228_s1 + $0x8] sm:$0xff] }
 0x28d   :  { %4429 = vpow2.f32 %v322_v43  ;;  %4110 = vmatprep.subr.mxu1 %v4727_v2 }
 0x28e   :  { %4431 = vpow2.f32 %v324_v44  ;;  %4111 = vmatpush3.msra.mxu1 %v5002_v35 }
 0x28f   :  { %4112 = vmatprep.subr.mxu1 %v4727_v2 }
 0x290   :  { %4113 = vmatpush3.msra.mxu1 %v5008_v36 }
 0x291   :  { %4114 = vmatprep.subr.mxu1 %v4727_v2 }
 0x292   :  { %4115 = vmatpush3.msra.mxu1 %v5015_v37 }
 0x293   :  { %4116 = vmatprep.subr.mxu1 %v4727_v2 }
 0x294   :  { %4117 = vmatpush3.msra.mxu1 %v5022_v39 }
 0x295   :  { %4140 = vmatprep.subr.mxu1 %v4727_v2 }
 0x298   :  { %v4426_v45 = vpop.eup %4425 }
 0x299   :  { %331 = vperm.xlu0 %4415, %v4426_v45   ;;  %v4428_v46 = vpop.eup %4427 }
 0x29a   :  { %v4430_v47 = vpop.eup %4429 }
 0x29b   :  { %v4432_v48 = vpop.eup %4431 }
 0x29d   :  { %334 = vperm.xlu0 %4415, %v4428_v46  }
 0x2a1   :  { %337 = vperm.xlu0 %4415, %v4430_v47  }
 0x2a5   :  { %340 = vperm.xlu0 %4415, %v4432_v48  }
 0x314   :  { %v332_v49 = vpop.permute.xlu0 %331 }
 0x315   :  { %v345_v57 = vrot.slane %v332_v49, %v4942_v15 }
 0x318   :  { %v335_v50 = vpop.permute.xlu0 %334 }
 0x319   :  { %v349_v53 = vrot.slane %v335_v50, %v4942_v15 }
 0x31b   :  { %v358_v60 = vsel %vm282_vm2, %v349_v53, %v345_v57 }
 0x31c   :  { %v338_v51 = vpop.permute.xlu0 %337 }
 0x31d   :  { %v353_v54 = vrot.slane %v338_v51, %v4942_v15 }
 0x31f   :  { %v359_v61 = vsel %vm284_vm3, %v353_v54, %v358_v60  ;;  %v5054_v60 = vld [vmem:[%s6228_s1 + $0x18] sm:$0xff] }
 0x320   :  { %v341_v58 = vpop.permute.xlu0 %340 }
 0x321   :  { %v357_v59 = vrot.slane %v341_v58, %v4942_v15 }
 0x323   :  { %v360_v63 = vsel %vm286_vm4, %v357_v59, %v359_v61 }
 0x324   :  { %v362_v11 = vsel %vm289_vm5, %v360_v63, 0.0 }
 0x325   :  { %363 = vadd.xlane.f32.xlu0 %v362_v11 }
 0x3ae   :  { %v364_v12 = vpop.xlane.xlu0 %363 }
 0x3af   :  { %v369_v13 = vrot.slane %v364_v12, %v4875_v18  ;;  %v373_v14 = vrot.slane %v364_v12, %v4843_v7  ;;  %v377_v17 = vrot.slane %v364_v12, %v4846_v8  ;;  %v381_v19 = vrot.slane %v364_v12, %v4922_v52 }
 0x3b1   :  { %4433 = vrcp.f32 %v369_v13 }
 0x3b2   :  { %4435 = vrcp.f32 %v373_v14 }
 0x3b3   :  { %4437 = vrcp.f32 %v377_v17 }
 0x3b4   :  { %4439 = vrcp.f32 %v381_v19 }
 0x3be   :  { %v4434_v20 = vpop.eup %4433 }
 0x3bf   :  { %v4436_v21 = vpop.eup %4435  ;;  %v387_v22 = vmul.f32 %v4434_v20, %v4426_v45 }
 0x3c0   :  { %v4438_v24 = vpop.eup %4437  ;;  %v389_v25 = vmul.f32 %v4436_v21, %v4428_v46  ;;  %v5043_v46 = vld [vmem:[%s6228_s1 + $0x10] sm:$0xff] }
 0x3c1   :  { %399 = vperm.xlu1 %4416, %v387_v22   ;;  %v391_v1 = vmul.f32 %v4438_v24, %v4430_v47  ;;  %v4440_v4 = vpop.eup %4439 }
 0x3c2   :  { %402 = vperm.xlu0 %4415, %v389_v25   ;;  %v393_v26 = vmul.f32 %v4440_v4, %v4432_v48 }
 0x3c5   :  { %405 = vperm.xlu1 %4416, %v391_v1  }
 0x3c9   :  { %408 = vperm.xlu1 %4416, %v393_v26  }
 0x3cd   :  { %477 = vrot.lane.b32.xlu1 %v59_v30, %s4731_s3 }
 0x43c   :  { %v400_v42 = vpop.permute.xlu1 %399 }
 0x43d   :  { %v403_v43 = vpop.permute.xlu0 %402  ;;  %v435_v44 = vmul.f32 %v400_v42, %v5031_v40  ;;  %v413_v54 = vrot.slane %v400_v42, %v4942_v15 }
 0x43e   :  { %v436_v45 = vmul.f32 %v403_v43, %v5036_v41  ;;  %v417_v51 = vrot.slane %v403_v43, %v4942_v15 }
 0x43f   :  { %v439_v47 = vsel %vm62_vm1, %v435_v44, 0.0 }
 0x440   :  { %v446_v48 = vsel %vm62_vm1, %v436_v45, 0.0  ;;  %v440_v49 = vrot.slane %v439_v47, 4  ;;  %v406_v50 = vpop.permute.xlu1 %405  ;;  %v426_v17 = vsel %vm282_vm2, %v417_v51, %v413_v54 }
 0x441   :  { %v447_v53 = vrot.slane %v446_v48, 4  ;;  %v437_v57 = vmul.f32 %v406_v50, %v5043_v46  ;;  %v421_v59 = vrot.slane %v406_v50, %v4942_v15 }
 0x442   :  { %v441_v58 = vadd.f32 %v440_v49, %v439_v47 }
 0x443   :  { %v448_v61 = vadd.f32 %v447_v53, %v446_v48  ;;  %v453_v63 = vsel %vm62_vm1, %v437_v57, 0.0  ;;  %v427_v22 = vsel %vm284_vm3, %v421_v59, %v426_v17 }
 0x444   :  { %v442_v11 = vrot.slane %v441_v58, 2  ;;  %v454_v12 = vrot.slane %v453_v63, 4  ;;  %v409_v13 = vpop.permute.xlu1 %408 }
 0x445   :  { %v449_v14 = vrot.slane %v448_v61, 2  ;;  %v425_v19 = vrot.slane %v409_v13, %v4942_v15  ;;  %v438_v20 = vmul.f32 %v409_v13, %v5054_v60  ;;  %v467_v13 = vld [vmem:[%s6227_s0] sm:$0xf] }
 0x446   :  { %v443_v21 = vadd.f32 %v442_v11, %v441_v58  ;;  %v455_v24 = vadd.f32 %v454_v12, %v453_v63 }
 0x447   :  { %v450_v25 = vadd.f32 %v449_v14, %v448_v61  ;;  %v428_v1 = vsel %vm286_vm4, %v425_v19, %v427_v22  ;;  %v460_v4 = vsel %vm62_vm1, %v438_v20, 0.0 }
 0x448   :  { %v456_v26 = vrot.slane %v455_v24, 2  ;;  %430 = vst.msk [vmem:[#allocation3] sm:$0xf] %vm289_vm5, %v428_v1  ;;  %v461_v30 = vrot.slane %v460_v4, 4  ;;  %v444_v43 = vrot.slane %v443_v21, 1  ;;  %v5065_v58 = vpop.permute.xlu1 %477 }
 0x449   :  { %v451_v42 = vrot.slane %v450_v25, 1 }
 0x44a   :  { %v457_v44 = vadd.f32 %v456_v26, %v455_v24  ;;  %v462_v45 = vadd.f32 %v461_v30, %v460_v4  ;;  %v445_v50 = vadd.f32 %v444_v43, %v443_v21  ;;  %v5097_v4 = vld [vmem:[%s6234_s7 + $0x78] sm:$0xff]  ;;  %v5102_v26 = vld [vmem:[%s6234_s7 + $0x70] sm:$0xff]  ;;  %v5109_v30 = vld [vmem:[%s6234_s7 + $0x68] sm:$0xff] }
 0x44b   :  { %v452_v49 = vadd.f32 %v451_v42, %v450_v25  ;;  %4122 = vmatpush3.msra.mxu0 %v5097_v4  ;;  %v5116_v42 = vld [vmem:[%s6234_s7 + $0x60] sm:$0xff]  ;;  %v5123_v43 = vld [vmem:[%s6234_s7 + $0x58] sm:$0xff] }
 0x44c   :  { %v458_v47 = vrot.slane %v457_v44, 1  ;;  %v463_v48 = vrot.slane %v462_v45, 2  ;;  %4123 = vmatprep.subr.mxu0 %v4727_v2 }
 0x44d   :  { %v472_v61 = vsel %vm282_vm2, %v452_v49, %v445_v50  ;;  %4124 = vmatpush3.msra.mxu0 %v5102_v26 }
 0x44e   :  { %v464_v51 = vadd.f32 %v463_v48, %v462_v45  ;;  %v459_v53 = vadd.f32 %v458_v47, %v457_v44  ;;  %4125 = vmatprep.subr.mxu0 %v4727_v2  ;;  %v5130_v45 = vld [vmem:[%s6234_s7 + $0x50] sm:$0xff]  ;;  %v5138_v47 = vld [vmem:[%s6234_s7 + $0x48] sm:$0xff]  ;;  %v5149_v48 = vld [vmem:[%s6234_s7 + $0x40] sm:$0xff] }
 0x44f   :  { %v3690_v54 = vld [vmem:[#allocation3] sm:$0xf]  ;;  %4126 = vmatpush3.msra.mxu0 %v5109_v30 }
 0x450   :  { %v465_v57 = vrot.slane %v464_v51, 1  ;;  %3696 = vst.msk [vmem:[#allocation6] sm:$0xf] %vm289_vm5, %v3690_v54  ;;  %v473_v63 = vsel %vm284_vm3, %v459_v53, %v472_v61  ;;  %4127 = vmatprep.subr.mxu0 %v4727_v2 }
 0x451   :  { %4128 = vmatpush3.msra.mxu0 %v5116_v42 }
 0x452   :  { %v466_v59 = vadd.f32 %v465_v57, %v464_v51  ;;  %4129 = vmatprep.subr.mxu0 %v4727_v2 }
 0x453   :  { %4130 = vmatpush3.msra.mxu0 %v5123_v43 }
 0x454   :  { %v474_v11 = vsel %vm286_vm4, %v466_v59, %v473_v63  ;;  %4131 = vmatprep.subr.mxu0 %v4727_v2 }
 0x455   :  { %v480_v12 = vsel %vm62_vm1, %v474_v11, %v5065_v58  ;;  %4132 = vmatpush3.msra.mxu0 %v5130_v45 }
 0x456   :  { %4119 = vmatmul.mubr.msk.f32.vlgmr.msra.gmra.mxu1 %vm495_vm6, %v480_v12  ;;  %4133 = vmatprep.subr.mxu0 %v4727_v2 }
 0x457   :  { %4141 = vmatpush3.msra.mxu1 %v4813_v0  ;;  %4148 = vmatprep.mubr.msk.f32.mxu1 %vm4728_vm0, %v4727_v2  ;;  %v5086_v0 = vld [vmem:[%s6235_s8] ss:$0 sm:$0xff] }
 0x458   :  { %4142 = vmatprep.subr.mxu1 %v4727_v2  ;;  %4134 = vmatpush3.msra.mxu0 %v5138_v47 }
 0x459   :  { %4143 = vmatpush3.msra.mxu1 %v4819_v3  ;;  %4135 = vmatprep.subr.mxu0 %v4727_v2 }
 0x45a   :  { %4144 = vmatprep.subr.mxu1 %v4727_v2  ;;  %4136 = vmatpush3.msra.mxu0 %v5149_v48 }
 0x45b   :  { %4145 = vmatpush3.msra.mxu1 %v4832_v5  ;;  %4151 = vmatprep.subr.mxu0 %v4727_v2 }
 0x45c   :  { %4146 = vmatprep.subr.mxu1 %v4727_v2 }
 0x45d   :  { %4147 = vmatpush3.msra.mxu1 %v4852_v9 }
 0x45e   :  { %4170 = vmatprep.subr.mxu1 %v4727_v2 }
 0x516   :  { %v565_v3 = vpop.f32.mrf.mxu1 }
 0x517   :  { %v566_v14 = vadd.f32 %v5086_v0, %v565_v3 }
 0x518   :  { %v4120_v17 = vpop.f32.mrf.mxu1 }
 0x519   :  { %v569_v5 = vadd.f32 %v566_v14, %v467_v13 }
 0x51b   :  { %577 = vrot.lane.b32.xlu1 %v569_v5, %s4731_s3  ;;  %v3860_v19 = vmul.f32 -1.442695, %v569_v5 }
 0x51d   :  { %4441 = vpow2.f32 %v3860_v19 }
 0x52a   :  { %v4442_v9 = vpop.eup %4441 }
 0x52b   :  { %v573_v20 = vadd.f32 1.0, %v4442_v9 }
 0x52d   :  { %4443 = vrcp.f32 %v573_v20 }
 0x53a   :  { %v4444_v21 = vpop.eup %4443 }
 0x53b   :  { %v587_v49 = vsub.f32 1.0, %v4444_v21  ;;  %v593_v51 = vmul.f32 %v4444_v21, %v5065_v58 }
 0x58d   :  { %v578_v22 = vpop.permute.xlu1 %577 }
 0x58e   :  { %v580_v24 = vmul.f32 %v4444_v21, %v578_v22 }
 0x590   :  { %582 = vrot.lane.b32.xlu1 %v580_v24, %s4732_s23 }
 0x602   :  { %v583_v25 = vpop.permute.xlu1 %582 }
 0x603   :  { %v585_v1 = vadd.f32 %v583_v25, %v569_v5 }
 0x605   :  { %4445 = vtanh.f32 %v585_v1 }
 0x612   :  { %v4446_v44 = vpop.eup %4445 }
 0x613   :  { %589 = vrot.lane.b32.xlu0 %v4446_v44, %s4733_s19 }
 0x617   :  { %599 = vrot.lane.b32.xlu0 %v4858_v10, %s4731_s3 }
 0x685   :  { %v590_v50 = vpop.permute.xlu0 %589 }
 0x686   :  { %v592_v53 = vmul.f32 %v590_v50, %v587_v49 }
 0x688   :  { %v5154_v54 = vadd.f32 %v593_v51, %v592_v53 }
 0x689   :  { %v600_v10 = vpop.permute.xlu0 %599 }
 0x68a   :  { %596 = vrot.lane.b32.xlu1 %v5154_v54, %s4733_s19 }
 0x6fc   :  { %v597_v57 = vpop.permute.xlu1 %596 }
 0x6fd   :  { %v602_v59 = vsel %vm62_vm1, %v597_v57, %v600_v10 }
 0x6fe   :  { %4138 = vmatmul.mubr.msk.f32.vlgmr.msra.gmra.mxu0 %vm495_vm6, %v602_v59 }
 0x6ff   :  { %4152 = vmatpush3.msra.mxu0 %v4971_v29  ;;  %4167 = vmatprep.mubr.msk.f32.mxu0 %vm4728_vm0, %v4727_v2  ;;  %v5181_v29 = vld [vmem:[%s6235_s8 + $0x1] ss:$0 sm:$0xff] }
 0x700   :  { %4153 = vmatprep.subr.mxu0 %v4727_v2 }
 0x701   :  { %4154 = vmatpush3.msra.mxu0 %v4981_v31 }
 0x702   :  { %4155 = vmatprep.subr.mxu0 %v4727_v2 }
 0x703   :  { %4156 = vmatpush3.msra.mxu0 %v4989_v32 }
 0x704   :  { %4157 = vmatprep.subr.mxu0 %v4727_v2 }
 0x705   :  { %4158 = vmatpush3.msra.mxu0 %v4996_v34 }
 0x706   :  { %4159 = vmatprep.subr.mxu0 %v4727_v2 }
 0x707   :  { %4160 = vmatpush3.msra.mxu0 %v5002_v35 }
 0x708   :  { %4161 = vmatprep.subr.mxu0 %v4727_v2 }
 0x709   :  { %4162 = vmatpush3.msra.mxu0 %v5008_v36 }
 0x70a   :  { %4163 = vmatprep.subr.mxu0 %v4727_v2 }
 0x70b   :  { %4164 = vmatpush3.msra.mxu0 %v5015_v37 }
 0x70c   :  { %4165 = vmatprep.subr.mxu0 %v4727_v2 }
 0x70d   :  { %4166 = vmatpush3.msra.mxu0 %v5022_v39 }
 0x70e   :  { %4189 = vmatprep.subr.mxu0 %v4727_v2 }
 0x7be   :  { %v687_v31 = vpop.f32.mrf.mxu0 }
 0x7bf   :  { %v688_v32 = vadd.f32 %v5181_v29, %v687_v31 }
 0x7c0   :  { %v4139_v34 = vpop.f32.mrf.mxu0 }
 0x7c1   :  { %698 = vrot.lane.b32.xlu1 %v688_v32, %s4731_s3  ;;  %v3871_v35 = vmul.f32 -1.442695, %v688_v32 }
 0x7c3   :  { %4447 = vpow2.f32 %v3871_v35 }
 0x7d0   :  { %v4448_v36 = vpop.eup %4447 }
 0x7d1   :  { %v694_v37 = vadd.f32 1.0, %v4448_v36 }
 0x7d3   :  { %4449 = vrcp.f32 %v694_v37 }
 0x7e0   :  { %v4450_v58 = vpop.eup %4449 }
 0x7e1   :  { %v708_v13 = vsub.f32 1.0, %v4450_v58  ;;  %v714_v14 = vmul.f32 %v4450_v58, %v600_v10 }
 0x833   :  { %v699_v39 = vpop.permute.xlu1 %698 }
 0x834   :  { %v701_v61 = vmul.f32 %v4450_v58, %v699_v39 }
 0x836   :  { %703 = vrot.lane.b32.xlu0 %v701_v61, %s4732_s23 }
 0x8a8   :  { %v704_v63 = vpop.permute.xlu0 %703 }
 0x8a9   :  { %v706_v11 = vadd.f32 %v704_v63, %v688_v32 }
 0x8ab   :  { %4451 = vtanh.f32 %v706_v11 }
 0x8b8   :  { %v4452_v12 = vpop.eup %4451 }
 0x8b9   :  { %710 = vrot.lane.b32.xlu1 %v4452_v12, %s4733_s19 }
 0x92b   :  { %v711_v3 = vpop.permute.xlu1 %710 }
 0x92c   :  { %v713_v17 = vmul.f32 %v711_v3, %v708_v13 }
 0x92e   :  { %v5187_v5 = vadd.f32 %v714_v14, %v713_v17 }
 0x930   :  { %717 = vrot.lane.b32.xlu0 %v5187_v5, %s4733_s19 }
 0x9a2   :  { %v718_v19 = vpop.permute.xlu0 %717 }
 0x9a3   :  { %721 = vst.msk [vmem:[#allocation2] sm:$0xf] %vm720_vm7, %v718_v19  ;;  %4149 = vmatmul.mubr.msk.f32.vlgmr.msra.gmra.mxu1 %vm62_vm1, %v718_v19 }
 0x9a4   :  { %4171 = vmatpush3.msra.mxu1 %v5097_v4  ;;  %4186 = vmatprep.mubr.msk.f32.mxu1 %vm4728_vm0, %v4727_v2 }
 0x9a5   :  { %4172 = vmatprep.subr.mxu1 %v4727_v2 }
 0x9a6   :  { %4173 = vmatpush3.msra.mxu1 %v5102_v26 }
 0x9a7   :  { %4174 = vmatprep.subr.mxu1 %v4727_v2 }
 0x9a8   :  { %4175 = vmatpush3.msra.mxu1 %v5109_v30 }
 0x9a9   :  { %4176 = vmatprep.subr.mxu1 %v4727_v2 }
 0x9aa   :  { %4177 = vmatpush3.msra.mxu1 %v5116_v42 }
 0x9ab   :  { %4178 = vmatprep.subr.mxu1 %v4727_v2 }
 0x9ac   :  { %4179 = vmatpush3.msra.mxu1 %v5123_v43 }
 0x9ad   :  { %4180 = vmatprep.subr.mxu1 %v4727_v2 }
 0x9ae   :  { %4181 = vmatpush3.msra.mxu1 %v5130_v45 }
 0x9af   :  { %4182 = vmatprep.subr.mxu1 %v4727_v2 }
 0x9b0   :  { %4183 = vmatpush3.msra.mxu1 %v5138_v47 }
 0x9b1   :  { %4184 = vmatprep.subr.mxu1 %v4727_v2 }
 0x9b2   :  { %4185 = vmatpush3.msra.mxu1 %v5149_v48 }
 0x9b3   :  { %4200 = vmatprep.subr.mxu1 %v4727_v2 }
 0xa63   :  { %v790_v9 = vpop.f32.mrf.mxu1 }
 0xa64   :  { %v801_v20 = vrot.slane %v790_v9, %v4872_v16 }
 0xa65   :  { %v4150_v21 = vpop.f32.mrf.mxu1 }
 0xa66   :  { %v802_v22 = vcombine.high %v801_v20, %v801_v20  ;;  %v809_v24 = vrot.slane %v801_v20, %v4872_v16 }
 0xa68   :  { %v816_v25 = vrot.slane %v802_v22, %v4872_v16  ;;  %v817_v1 = vcombine.high %v809_v24, %v809_v24  ;;  %v822_v4 = vrot.slane %v809_v24, %v4875_v18 }
 0xa6a   :  { %v818_v26 = vcombine.high %v816_v25, %v816_v25  ;;  %v826_v30 = vrot.slane %v816_v25, %v4875_v18  ;;  %v830_v42 = vrot.slane %v817_v1, %v4875_v18  ;;  %v839_v43 = vadd.f32 %v822_v4, %v4882_v23 }
 0xa6c   :  { %v834_v44 = vrot.slane %v818_v26, %v4875_v18  ;;  %v840_v45 = vadd.f32 %v826_v30, %v4889_v27  ;;  %v841_v47 = vadd.f32 %v830_v42, %v4894_v28  ;;  %4453 = vtanh.f32 %v839_v43 }
 0xa6e   :  { %v842_v48 = vadd.f32 %v834_v44, %v4902_v33  ;;  %4455 = vtanh.f32 %v840_v45 }
 0xa6f   :  { %4457 = vtanh.f32 %v841_v47 }
 0xa70   :  { %4459 = vtanh.f32 %v842_v48 }
 0xa79   :  { %v4454_v49 = vpop.eup %4453 }
 0xa7a   :  { %v847_v50 = vmul.f32 %v4454_v49, %v4911_v38 }
 0xa7b   :  { %v4456_v51 = vpop.eup %4455 }
 0xa7c   :  { %v4458_v53 = vpop.eup %4457  ;;  %v851_v10 = vsel %vm62_vm1, %v847_v50, 0.0  ;;  %v848_v23 = vmul.f32 %v4456_v51, %v4911_v38 }
 0xa7d   :  { %852 = vadd.xlane.f32.xlu1 %v851_v10  ;;  %v849_v28 = vmul.f32 %v4458_v53, %v4911_v38  ;;  %v4460_v57 = vpop.eup %4459 }
 0xa7e   :  { %v854_v27 = vsel %vm62_vm1, %v848_v23, 0.0  ;;  %v850_v59 = vmul.f32 %v4460_v57, %v4911_v38 }
 0xa7f   :  { %855 = vadd.xlane.f32.xlu0 %v854_v27  ;;  %v857_v33 = vsel %vm62_vm1, %v849_v28, 0.0 }
 0xa80   :  { %v860_v31 = vsel %vm62_vm1, %v850_v59, 0.0 }
 0xa83   :  { %858 = vadd.xlane.f32.xlu0 %v857_v33 }
 0xa87   :  { %861 = vadd.xlane.f32.xlu0 %v860_v31 }
 0xb06   :  { %v853_v32 = vpop.xlane.xlu1 %852 }
 0xb07   :  { %v863_v34 = vadd.f32 %v853_v32, %v4933_v62 }
 0xb08   :  { %v856_v35 = vpop.xlane.xlu0 %855 }
 0xb09   :  { %v864_v36 = vadd.f32 %v856_v35, %v4928_v55  ;;  %872 = vperm.xlu1 %4416, %v863_v34  }
 0xb0b   :  { %875 = vperm.xlu0 %4415, %v864_v36  }
 0xb0c   :  { %v859_v37 = vpop.xlane.xlu0 %858 }
 0xb0d   :  { %v865_v58 = vadd.f32 %v859_v37, %v4930_v56 }
 0xb0f   :  { %878 = vperm.xlu1 %4416, %v865_v58  }
 0xb10   :  { %v862_v39 = vpop.xlane.xlu0 %861 }
 0xb11   :  { %v866_v61 = vadd.f32 %v862_v39, %v4937_v6 }
 0xb13   :  { %881 = vperm.xlu1 %4416, %v866_v61  }
 0xb84   :  { %v873_v38 = vpop.permute.xlu1 %872 }
 0xb85   :  { %v886_v3 = vrot.slane %v873_v38, %v4942_v15 }
 0xb86   :  { %v876_v63 = vpop.permute.xlu0 %875 }
 0xb87   :  { %v890_v12 = vrot.slane %v876_v63, %v4942_v15 }
 0xb89   :  { %v899_v19 = vsel %vm282_vm2, %v890_v12, %v886_v3 }
 0xb8a   :  { %v879_v11 = vpop.permute.xlu1 %878 }
 0xb8b   :  { %v894_v13 = vrot.slane %v879_v11, %v4942_v15 }
 0xb8d   :  { %v900_v9 = vsel %vm284_vm3, %v894_v13, %v899_v19 }
 0xb8e   :  { %v882_v14 = vpop.permute.xlu1 %881 }
 0xb8f   :  { %v898_v17 = vrot.slane %v882_v14, %v4942_v15 }
 0xb91   :  { %v901_v20 = vsel %vm286_vm4, %v898_v17, %v900_v9 }
 0xb92   :  { %v903_v21 = vsel %vm289_vm5, %v901_v20, -inf }
 0xb93   :  { %904 = vmax.xlane.f32.xlu1 %v903_v21 }
 0xc1c   :  { %v905_v22 = vpop.xlane.xlu1 %904 }
 0xc1d   :  { %v910_v24 = vrot.slane %v905_v22, %v4875_v18  ;;  %v914_v25 = vrot.slane %v905_v22, %v4843_v7  ;;  %v918_v1 = vrot.slane %v905_v22, %v4846_v8  ;;  %v922_v42 = vrot.slane %v905_v22, %v4922_v52 }
 0xc1f   :  { %v927_v4 = vsub.f32 %v863_v34, %v910_v24  ;;  %v928_v26 = vsub.f32 %v864_v36, %v914_v25  ;;  %v929_v43 = vsub.f32 %v865_v58, %v918_v1  ;;  %v930_v45 = vsub.f32 %v866_v61, %v922_v42 }
 0xc21   :  { %v931_v30 = vmul.f32 1.442695, %v927_v4  ;;  %v933_v44 = vmul.f32 1.442695, %v928_v26  ;;  %v935_v47 = vmul.f32 1.442695, %v929_v43 }
 0xc22   :  { %v937_v48 = vmul.f32 1.442695, %v930_v45 }
 0xc23   :  { %4461 = vpow2.f32 %v931_v30 }
 0xc24   :  { %4463 = vpow2.f32 %v933_v44 }
 0xc25   :  { %4465 = vpow2.f32 %v935_v47 }
 0xc26   :  { %4467 = vpow2.f32 %v937_v48 }
 0xc30   :  { %v4462_v49 = vpop.eup %4461 }
 0xc31   :  { %944 = vperm.xlu0 %4415, %v4462_v49   ;;  %v4464_v50 = vpop.eup %4463 }
 0xc32   :  { %v4466_v51 = vpop.eup %4465 }
 0xc33   :  { %v4468_v53 = vpop.eup %4467 }
 0xc35   :  { %947 = vperm.xlu0 %4415, %v4464_v50  }
 0xc39   :  { %950 = vperm.xlu0 %4415, %v4466_v51  }
 0xc3d   :  { %953 = vperm.xlu0 %4415, %v4468_v53  }
 0xcac   :  { %v945_v10 = vpop.permute.xlu0 %944 }
 0xcad   :  { %v958_v33 = vrot.slane %v945_v10, %v4942_v15 }
 0xcb0   :  { %v948_v23 = vpop.permute.xlu0 %947 }
 0xcb1   :  { %v962_v28 = vrot.slane %v948_v23, %v4942_v15 }
 0xcb3   :  { %v971_v32 = vsel %vm282_vm2, %v962_v28, %v958_v33 }
 0xcb4   :  { %v951_v27 = vpop.permute.xlu0 %950 }
 0xcb5   :  { %v966_v57 = vrot.slane %v951_v27, %v4942_v15 }
 0xcb7   :  { %v972_v34 = vsel %vm284_vm3, %v966_v57, %v971_v32 }
 0xcb8   :  { %v954_v59 = vpop.permute.xlu0 %953 }
 0xcb9   :  { %v970_v31 = vrot.slane %v954_v59, %v4942_v15 }
 0xcbb   :  { %v973_v35 = vsel %vm286_vm4, %v970_v31, %v972_v34 }
 0xcbc   :  { %v975_v36 = vsel %vm289_vm5, %v973_v35, 0.0 }
 0xcbd   :  { %976 = vadd.xlane.f32.xlu0 %v975_v36 }
 0xd46   :  { %v977_v37 = vpop.xlane.xlu0 %976 }
 0xd47   :  { %v982_v58 = vrot.slane %v977_v37, %v4875_v18  ;;  %v986_v39 = vrot.slane %v977_v37, %v4843_v7  ;;  %v990_v61 = vrot.slane %v977_v37, %v4846_v8  ;;  %v994_v38 = vrot.slane %v977_v37, %v4922_v52 }
 0xd49   :  { %4469 = vrcp.f32 %v982_v58 }
 0xd4a   :  { %4471 = vrcp.f32 %v986_v39 }
 0xd4b   :  { %4473 = vrcp.f32 %v990_v61 }
 0xd4c   :  { %4475 = vrcp.f32 %v994_v38 }
 0xd56   :  { %v4470_v63 = vpop.eup %4469 }
 0xd57   :  { %v4472_v11 = vpop.eup %4471  ;;  %v1000_v12 = vmul.f32 %v4470_v63, %v4462_v49 }
 0xd58   :  { %v4474_v13 = vpop.eup %4473  ;;  %v1002_v3 = vmul.f32 %v4472_v11, %v4464_v50 }
 0xd59   :  { %1012 = vperm.xlu1 %4416, %v1000_v12   ;;  %v1004_v14 = vmul.f32 %v4474_v13, %v4466_v51  ;;  %v4476_v17 = vpop.eup %4475 }
 0xd5a   :  { %1015 = vperm.xlu0 %4415, %v1002_v3   ;;  %v1006_v19 = vmul.f32 %v4476_v17, %v4468_v53 }
 0xd5d   :  { %1018 = vperm.xlu1 %4416, %v1004_v14  }
 0xd61   :  { %1021 = vperm.xlu1 %4416, %v1006_v19   ;;  %v5284_v19 = vld [vmem:[%s6232_s5 + $0x18] sm:$0xff] }
 0xdd4   :  { %v1013_v9 = vpop.permute.xlu1 %1012 }
 0xdd5   :  { %v1016_v20 = vpop.permute.xlu0 %1015  ;;  %v1049_v21 = vmul.f32 %v1013_v9, %v5031_v40  ;;  %v1026_v42 = vrot.slane %v1013_v9, %v4942_v15  ;;  %v5293_v9 = vld [vmem:[%s6232_s5 + $0x10] sm:$0xff] }
 0xdd6   :  { %v1050_v22 = vmul.f32 %v1016_v20, %v5036_v41  ;;  %v1030_v26 = vrot.slane %v1016_v20, %v4942_v15  ;;  %v5300_v20 = vld [vmem:[%s6232_s5 + $0x8] sm:$0xff] }
 0xdd7   :  { %v1053_v24 = vsel %vm62_vm1, %v1049_v21, 0.0  ;;  %v5307_v21 = vld [vmem:[%s6232_s5] sm:$0xff] }
 0xdd8   :  { %v1060_v25 = vsel %vm62_vm1, %v1050_v22, 0.0  ;;  %v1054_v1 = vrot.slane %v1053_v24, 4  ;;  %v1019_v4 = vpop.permute.xlu1 %1018  ;;  %v1039_v51 = vsel %vm282_vm2, %v1030_v26, %v1026_v42  ;;  %v3873_v22 = vld [vmem:[%s6227_s0 + $0x4] sm:$0xf] }
 0xdd9   :  { %v1061_v30 = vrot.slane %v1060_v25, 4  ;;  %v1051_v43 = vmul.f32 %v1019_v4, %v5043_v46  ;;  %v1034_v45 = vrot.slane %v1019_v4, %v4942_v15 }
 0xdda   :  { %v1055_v44 = vadd.f32 %v1054_v1, %v1053_v24 }
 0xddb   :  { %v1062_v47 = vadd.f32 %v1061_v30, %v1060_v25  ;;  %v1067_v40 = vsel %vm62_vm1, %v1051_v43, 0.0  ;;  %v1040_v27 = vsel %vm284_vm3, %v1034_v45, %v1039_v51 }
 0xddc   :  { %v1056_v41 = vrot.slane %v1055_v44, 2  ;;  %v1068_v48 = vrot.slane %v1067_v40, 4  ;;  %v1022_v49 = vpop.permute.xlu1 %1021 }
 0xddd   :  { %v1063_v50 = vrot.slane %v1062_v47, 2  ;;  %v1038_v53 = vrot.slane %v1022_v49, %v4942_v15  ;;  %v1052_v10 = vmul.f32 %v1022_v49, %v5054_v60 }
 0xdde   :  { %v1057_v23 = vadd.f32 %v1056_v41, %v1055_v44  ;;  %v1069_v46 = vadd.f32 %v1068_v48, %v1067_v40 }
 0xddf   :  { %v1064_v28 = vadd.f32 %v1063_v50, %v1062_v47  ;;  %v1041_v57 = vsel %vm286_vm4, %v1038_v53, %v1040_v27  ;;  %v1074_v33 = vsel %vm62_vm1, %v1052_v10, 0.0 }
 0xde0   :  { %v1070_v59 = vrot.slane %v1069_v46, 2  ;;  %1044 = vst.msk [vmem:[#allocation3 + $0x4] sm:$0xf] %vm289_vm5, %v1041_v57  ;;  %v1075_v31 = vrot.slane %v1074_v33, 4  ;;  %v1058_v34 = vrot.slane %v1057_v23, 1 }
 0xde1   :  { %v1065_v32 = vrot.slane %v1064_v28, 1 }
 0xde2   :  { %v1071_v35 = vadd.f32 %v1070_v59, %v1069_v46  ;;  %v1076_v36 = vadd.f32 %v1075_v31, %v1074_v33  ;;  %v1059_v39 = vadd.f32 %v1058_v34, %v1057_v23 }
 0xde3   :  { %v1066_v60 = vadd.f32 %v1065_v32, %v1064_v28 }
 0xde4   :  { %v1072_v37 = vrot.slane %v1071_v35, 1  ;;  %v1077_v58 = vrot.slane %v1076_v36, 2 }
 0xde5   :  { %v1087_v13 = vsel %vm282_vm2, %v1066_v60, %v1059_v39 }
 0xde6   :  { %v1078_v61 = vadd.f32 %v1077_v58, %v1076_v36  ;;  %v1073_v38 = vadd.f32 %v1072_v37, %v1071_v35 }
 0xde7   :  { %v3691_v63 = vld [vmem:[#allocation3 + $0x4] sm:$0xf] }
 0xde8   :  { %v1079_v11 = vrot.slane %v1078_v61, 1  ;;  %3697 = vst.msk [vmem:[#allocation6 + $0x4] sm:$0xf] %vm289_vm5, %v3691_v63  ;;  %v1088_v3 = vsel %vm284_vm3, %v1073_v38, %v1087_v13 }
 0xdea   :  { %v1080_v12 = vadd.f32 %v1079_v11, %v1078_v61 }
 0xdec   :  { %v1089_v14 = vsel %vm286_vm4, %v1080_v12, %v1088_v3 }
 0xded   :  { %v1091_v17 = vsel %vm62_vm1, %v1089_v14, %v5154_v54 }
 0xdee   :  { %4168 = vmatmul.mubr.msk.f32.vlgmr.msra.gmra.mxu0 %vm495_vm6, %v1091_v17 }
 0xdef   :  { %4190 = vmatpush3.msra.mxu0 %v5284_v19  ;;  %4197 = vmatprep.mubr.msk.f32.mxu0 %vm4728_vm0, %v4727_v2 }
 0xdf0   :  { %4191 = vmatprep.subr.mxu0 %v4727_v2 }
 0xdf1   :  { %4192 = vmatpush3.msra.mxu0 %v5293_v9 }
 0xdf2   :  { %4193 = vmatprep.subr.mxu0 %v4727_v2 }
 0xdf3   :  { %4194 = vmatpush3.msra.mxu0 %v5300_v20 }
 0xdf4   :  { %4195 = vmatprep.subr.mxu0 %v4727_v2 }
 0xdf5   :  { %4196 = vmatpush3.msra.mxu0 %v5307_v21 }
 0xdf6   :  { %4219 = vmatprep.subr.mxu0 %v4727_v2 }
 0xeae   :  { %v1169_v24 = vpop.f32.mrf.mxu0 }
 0xeaf   :  { %v1170_v25 = vadd.f32 %v5086_v0, %v1169_v24  ;;  %v5350_v24 = vld [vmem:[%s6229_s2] sm:$0xff] }
 0xeb0   :  { %v4169_v1 = vpop.f32.mrf.mxu0 }
 0xeb1   :  { %v1173_v4 = vadd.f32 %v3873_v22, %v1170_v25 }
 0xeb3   :  { %1181 = vrot.lane.b32.xlu1 %v1173_v4, %s4731_s3  ;;  %v3875_v26 = vmul.f32 -1.442695, %v1173_v4 }
 0xeb5   :  { %4477 = vpow2.f32 %v3875_v26 }
 0xec2   :  { %v4478_v30 = vpop.eup %4477 }
 0xec3   :  { %v1177_v42 = vadd.f32 1.0, %v4478_v30  ;;  %v5363_v30 = vld [vmem:[%s6229_s2 + $0x10] sm:$0xff] }
 0xec5   :  { %4479 = vrcp.f32 %v1177_v42 }
 0xed2   :  { %v4480_v43 = vpop.eup %4479 }
 0xed3   :  { %v1191_v0 = vsub.f32 1.0, %v4480_v43  ;;  %v1197_v49 = vmul.f32 %v4480_v43, %v5154_v54 }
 0xf25   :  { %v1182_v44 = vpop.permute.xlu1 %1181 }
 0xf26   :  { %v1184_v45 = vmul.f32 %v4480_v43, %v1182_v44  ;;  %v5369_v43 = vld [vmem:[%s6229_s2 + $0x18] sm:$0xff] }
 0xf28   :  { %1186 = vrot.lane.b32.xlu1 %v1184_v45, %s4732_s23 }
 0xf9a   :  { %v1187_v47 = vpop.permute.xlu1 %1186 }
 0xf9b   :  { %v1189_v40 = vadd.f32 %v1187_v47, %v1173_v4  ;;  %v5357_v4 = vld [vmem:[%s6229_s2 + $0x8] sm:$0xff]  ;;  %v5375_v47 = vld [vmem:[%s6233_s6] ss:$0 sm:$0xff] }
 0xf9d   :  { %4481 = vtanh.f32 %v1189_v40 }
 0xfaa   :  { %v4482_v41 = vpop.eup %4481 }
 0xfab   :  { %1193 = vrot.lane.b32.xlu1 %v4482_v41, %s4733_s19 }
0x101d   :  { %v1194_v48 = vpop.permute.xlu1 %1193 }
0x101e   :  { %v1196_v50 = vmul.f32 %v1194_v48, %v1191_v0 }
0x1020   :  { %v5319_v51 = vadd.f32 %v1197_v49, %v1196_v50 }
0x1022   :  { %1200 = vrot.lane.b32.xlu0 %v5319_v51, %s4733_s19 }
0x1094   :  { %v1201_v53 = vpop.permute.xlu0 %1200 }
0x1095   :  { %v1203_v10 = vsel %vm62_vm1, %v1201_v53, %v5187_v5 }
0x1096   :  { %4187 = vmatmul.mubr.msk.f32.vlgmr.msra.gmra.mxu1 %vm495_vm6, %v1203_v10 }
0x1097   :  { %4216 = vmatprep.mubr.msk.f32.mxu1 %vm4728_vm0, %v4727_v2 }
0x1156   :  { %v1281_v23 = vpop.f32.mrf.mxu1 }
0x1157   :  { %v1282_v27 = vadd.f32 %v5181_v29, %v1281_v23 }
0x1158   :  { %v4188_v46 = vpop.f32.mrf.mxu1 }
0x1159   :  { %1292 = vrot.lane.b32.xlu1 %v1282_v27, %s4731_s3  ;;  %v3885_v54 = vmul.f32 -1.442695, %v1282_v27 }
0x115b   :  { %4483 = vpow2.f32 %v3885_v54 }
0x1168   :  { %v4484_v28 = vpop.eup %4483 }
0x1169   :  { %v1288_v57 = vadd.f32 1.0, %v4484_v28 }
0x116b   :  { %4485 = vrcp.f32 %v1288_v57 }
0x1178   :  { %v4486_v33 = vpop.eup %4485 }
0x1179   :  { %v1302_v29 = vsub.f32 1.0, %v4486_v33  ;;  %v1308_v37 = vmul.f32 %v4486_v33, %v5187_v5 }
0x11cb   :  { %v1293_v59 = vpop.permute.xlu1 %1292 }
0x11cc   :  { %v1295_v31 = vmul.f32 %v4486_v33, %v1293_v59 }
0x11ce   :  { %1297 = vrot.lane.b32.xlu0 %v1295_v31, %s4732_s23 }
0x1240   :  { %v1298_v32 = vpop.permute.xlu0 %1297 }
0x1241   :  { %v1300_v34 = vadd.f32 %v1298_v32, %v1282_v27 }
0x1243   :  { %4487 = vtanh.f32 %v1300_v34 }
0x1250   :  { %v4488_v35 = vpop.eup %4487 }
0x1251   :  { %1304 = vrot.lane.b32.xlu1 %v4488_v35, %s4733_s19 }
0x12c3   :  { %v1305_v36 = vpop.permute.xlu1 %1304 }
0x12c4   :  { %v1307_v58 = vmul.f32 %v1305_v36, %v1302_v29 }
0x12c6   :  { %v5333_v60 = vadd.f32 %v1308_v37, %v1307_v58 }
0x12c8   :  { %1311 = vrot.lane.b32.xlu0 %v5333_v60, %s4733_s19 }
0x133a   :  { %v1312_v39 = vpop.permute.xlu0 %1311 }
0x133b   :  { %1314 = vst.msk [vmem:[#allocation2 + $0x4] sm:$0xf] %vm720_vm7, %v1312_v39  ;;  %4198 = vmatmul.mubr.msk.f32.vlgmr.msra.gmra.mxu0 %vm62_vm1, %v1312_v39 }
0x133c   :  { %4235 = vmatprep.mubr.msk.f32.mxu0 %vm4728_vm0, %v4727_v2 }
0x13fb   :  { %v1383_v61 = vpop.f32.mrf.mxu0 }
0x13fc   :  { %v1394_v38 = vrot.slane %v1383_v61, %v4872_v16 }
0x13fd   :  { %v4199_v63 = vpop.f32.mrf.mxu0 }
0x13fe   :  { %v1395_v11 = vcombine.high %v1394_v38, %v1394_v38  ;;  %v1402_v5 = vrot.slane %v1394_v38, %v4872_v16 }
0x1400   :  { %v1409_v12 = vrot.slane %v1395_v11, %v4872_v16  ;;  %v1410_v13 = vcombine.high %v1402_v5, %v1402_v5  ;;  %v1415_v3 = vrot.slane %v1402_v5, %v4875_v18 }
0x1402   :  { %v1411_v14 = vcombine.high %v1409_v12, %v1409_v12  ;;  %v1419_v17 = vrot.slane %v1409_v12, %v4875_v18  ;;  %v1423_v22 = vrot.slane %v1410_v13, %v4875_v18  ;;  %v1432_v25 = vadd.f32 %v5350_v24, %v1415_v3 }
0x1404   :  { %v1427_v1 = vrot.slane %v1411_v14, %v4875_v18  ;;  %v1433_v26 = vadd.f32 %v5357_v4, %v1419_v17  ;;  %v1434_v42 = vadd.f32 %v5363_v30, %v1423_v22  ;;  %4489 = vtanh.f32 %v1432_v25 }
0x1406   :  { %v1435_v44 = vadd.f32 %v5369_v43, %v1427_v1  ;;  %4491 = vtanh.f32 %v1433_v26 }
0x1407   :  { %4493 = vtanh.f32 %v1434_v42 }
0x1408   :  { %4495 = vtanh.f32 %v1435_v44 }
0x1411   :  { %v4490_v45 = vpop.eup %4489 }
0x1412   :  { %v1440_v40 = vmul.f32 %v5375_v47, %v4490_v45 }
0x1413   :  { %v4492_v41 = vpop.eup %4491 }
0x1414   :  { %v4494_v0 = vpop.eup %4493  ;;  %v1444_v48 = vsel %vm62_vm1, %v1440_v40, 0.0  ;;  %v1441_v49 = vmul.f32 %v5375_v47, %v4492_v41 }
0x1415   :  { %1445 = vadd.xlane.f32.xlu1 %v1444_v48  ;;  %v1442_v53 = vmul.f32 %v5375_v47, %v4494_v0  ;;  %v4496_v10 = vpop.eup %4495 }
0x1416   :  { %v1447_v50 = vsel %vm62_vm1, %v1441_v49, 0.0  ;;  %v1443_v27 = vmul.f32 %v5375_v47, %v4496_v10 }
0x1417   :  { %1448 = vadd.xlane.f32.xlu0 %v1447_v50  ;;  %v1450_v23 = vsel %vm62_vm1, %v1442_v53, 0.0 }
0x1418   :  { %v1453_v46 = vsel %vm62_vm1, %v1443_v27, 0.0 }
0x141b   :  { %1451 = vadd.xlane.f32.xlu0 %v1450_v23 }
0x141f   :  { %1454 = vadd.xlane.f32.xlu0 %v1453_v46 }
0x149e   :  { %v1446_v54 = vpop.xlane.xlu1 %1445 }
0x149f   :  { %v1456_v28 = vadd.f32 %v1446_v54, %v4933_v62 }
0x14a0   :  { %v1449_v57 = vpop.xlane.xlu0 %1448 }
0x14a1   :  { %v1457_v33 = vadd.f32 %v1449_v57, %v4928_v55  ;;  %1465 = vperm.xlu1 %4416, %v1456_v28  }
0x14a3   :  { %1468 = vperm.xlu0 %4415, %v1457_v33  }
0x14a4   :  { %v1452_v59 = vpop.xlane.xlu0 %1451 }
0x14a5   :  { %v1458_v31 = vadd.f32 %v1452_v59, %v4930_v56 }
0x14a7   :  { %1471 = vperm.xlu1 %4416, %v1458_v31  }
0x14a8   :  { %v1455_v32 = vpop.xlane.xlu0 %1454 }
0x14a9   :  { %v1459_v34 = vadd.f32 %v1455_v32, %v4937_v6 }
0x14ab   :  { %1474 = vperm.xlu1 %4416, %v1459_v34  }
0x151c   :  { %v1466_v35 = vpop.permute.xlu1 %1465 }
0x151d   :  { %v1479_v39 = vrot.slane %v1466_v35, %v4942_v15 }
0x151e   :  { %v1469_v29 = vpop.permute.xlu0 %1468 }
0x151f   :  { %v1483_v37 = vrot.slane %v1469_v29, %v4942_v15 }
0x1521   :  { %v1492_v38 = vsel %vm282_vm2, %v1483_v37, %v1479_v39 }
0x1522   :  { %v1472_v36 = vpop.permute.xlu1 %1471 }
0x1523   :  { %v1487_v58 = vrot.slane %v1472_v36, %v4942_v15 }
0x1525   :  { %v1493_v11 = vsel %vm284_vm3, %v1487_v58, %v1492_v38 }
0x1526   :  { %v1475_v61 = vpop.permute.xlu1 %1474 }
0x1527   :  { %v1491_v63 = vrot.slane %v1475_v61, %v4942_v15 }
0x1529   :  { %v1494_v5 = vsel %vm286_vm4, %v1491_v63, %v1493_v11 }
0x152a   :  { %v1496_v12 = vsel %vm289_vm5, %v1494_v5, -inf }
0x152b   :  { %1497 = vmax.xlane.f32.xlu1 %v1496_v12 }
0x15b4   :  { %v1498_v13 = vpop.xlane.xlu1 %1497 }
0x15b5   :  { %v1503_v3 = vrot.slane %v1498_v13, %v4875_v18  ;;  %v1507_v14 = vrot.slane %v1498_v13, %v4843_v7  ;;  %v1511_v17 = vrot.slane %v1498_v13, %v4846_v8  ;;  %v1515_v26 = vrot.slane %v1498_v13, %v4922_v52  ;;  %v5416_v13 = vld [vmem:[%s6234_s7 + $0x38] sm:$0xff] }
0x15b6   :  { %4201 = vmatpush3.msra.mxu1 %v5416_v13 }
0x15b7   :  { %v1520_v22 = vsub.f32 %v1456_v28, %v1503_v3  ;;  %v1521_v25 = vsub.f32 %v1457_v33, %v1507_v14  ;;  %v1522_v42 = vsub.f32 %v1458_v31, %v1511_v17  ;;  %v1523_v45 = vsub.f32 %v1459_v34, %v1515_v26  ;;  %4202 = vmatprep.subr.mxu1 %v4727_v2  ;;  %v5423_v3 = vld [vmem:[%s6234_s7 + $0x30] sm:$0xff]  ;;  %v5430_v14 = vld [vmem:[%s6234_s7 + $0x28] sm:$0xff]  ;;  %v5437_v17 = vld [vmem:[%s6234_s7 + $0x20] sm:$0xff] }
0x15b8   :  { %4203 = vmatpush3.msra.mxu1 %v5423_v3  ;;  %v5463_v26 = vld [vmem:[%s6234_s7] sm:$0xff] }
0x15b9   :  { %v1524_v1 = vmul.f32 1.442695, %v1520_v22  ;;  %v1526_v44 = vmul.f32 1.442695, %v1521_v25  ;;  %v1528_v40 = vmul.f32 1.442695, %v1522_v42  ;;  %4204 = vmatprep.subr.mxu1 %v4727_v2 }
0x15ba   :  { %v1530_v41 = vmul.f32 1.442695, %v1523_v45  ;;  %4205 = vmatpush3.msra.mxu1 %v5430_v14  ;;  %v5444_v22 = vld [vmem:[%s6234_s7 + $0x18] sm:$0xff]  ;;  %v5450_v25 = vld [vmem:[%s6234_s7 + $0x10] sm:$0xff]  ;;  %v5472_v45 = vld [vmem:[%s6228_s1] sm:$0xff] }
0x15bb   :  { %4497 = vpow2.f32 %v1524_v1  ;;  %4206 = vmatprep.subr.mxu1 %v4727_v2  ;;  %v5456_v1 = vld [vmem:[%s6234_s7 + $0x8] sm:$0xff] }
0x15bc   :  { %4499 = vpow2.f32 %v1526_v44  ;;  %4207 = vmatpush3.msra.mxu1 %v5437_v17 }
0x15bd   :  { %4501 = vpow2.f32 %v1528_v40  ;;  %4208 = vmatprep.subr.mxu1 %v4727_v2 }
0x15be   :  { %4503 = vpow2.f32 %v1530_v41  ;;  %4209 = vmatpush3.msra.mxu1 %v5444_v22  ;;  %v5478_v41 = vld [vmem:[%s6228_s1 + $0x8] sm:$0xff] }
0x15bf   :  { %4210 = vmatprep.subr.mxu1 %v4727_v2 }
0x15c0   :  { %4211 = vmatpush3.msra.mxu1 %v5450_v25 }
0x15c1   :  { %4212 = vmatprep.subr.mxu1 %v4727_v2 }
0x15c2   :  { %4213 = vmatpush3.msra.mxu1 %v5456_v1 }
0x15c3   :  { %4214 = vmatprep.subr.mxu1 %v4727_v2 }
0x15c4   :  { %4215 = vmatpush3.msra.mxu1 %v5463_v26 }
0x15c5   :  { %4238 = vmatprep.subr.mxu1 %v4727_v2 }
0x15c8   :  { %v4498_v0 = vpop.eup %4497 }
0x15c9   :  { %1537 = vperm.xlu0 %4415, %v4498_v0   ;;  %v4500_v48 = vpop.eup %4499 }
0x15ca   :  { %v4502_v49 = vpop.eup %4501 }
0x15cb   :  { %v4504_v50 = vpop.eup %4503 }
0x15cd   :  { %1540 = vperm.xlu0 %4415, %v4500_v48  }
0x15d1   :  { %1543 = vperm.xlu0 %4415, %v4502_v49  }
0x15d5   :  { %1546 = vperm.xlu0 %4415, %v4504_v50  }
0x1644   :  { %v1538_v53 = vpop.permute.xlu0 %1537 }
0x1645   :  { %v1551_v54 = vrot.slane %v1538_v53, %v4942_v15 }
0x1648   :  { %v1541_v10 = vpop.permute.xlu0 %1540 }
0x1649   :  { %v1555_v27 = vrot.slane %v1541_v10, %v4942_v15 }
0x164b   :  { %v1564_v57 = vsel %vm282_vm2, %v1555_v27, %v1551_v54 }
0x164c   :  { %v1544_v23 = vpop.permute.xlu0 %1543 }
0x164d   :  { %v1559_v46 = vrot.slane %v1544_v23, %v4942_v15 }
0x164f   :  { %v1565_v59 = vsel %vm284_vm3, %v1559_v46, %v1564_v57  ;;  %v5488_v46 = vld [vmem:[%s6228_s1 + $0x10] sm:$0xff] }
0x1650   :  { %v1547_v28 = vpop.permute.xlu0 %1546 }
0x1651   :  { %v1563_v33 = vrot.slane %v1547_v28, %v4942_v15 }
0x1653   :  { %v1566_v31 = vsel %vm286_vm4, %v1563_v33, %v1565_v59 }
0x1654   :  { %v1568_v32 = vsel %vm289_vm5, %v1566_v31, 0.0 }
0x1655   :  { %1569 = vadd.xlane.f32.xlu0 %v1568_v32 }
0x16de   :  { %v1570_v34 = vpop.xlane.xlu0 %1569 }
0x16df   :  { %v1575_v35 = vrot.slane %v1570_v34, %v4875_v18  ;;  %v1579_v29 = vrot.slane %v1570_v34, %v4843_v7  ;;  %v1583_v36 = vrot.slane %v1570_v34, %v4846_v8  ;;  %v1587_v37 = vrot.slane %v1570_v34, %v4922_v52 }
0x16e1   :  { %4505 = vrcp.f32 %v1575_v35 }
0x16e2   :  { %4507 = vrcp.f32 %v1579_v29 }
0x16e3   :  { %4509 = vrcp.f32 %v1583_v36 }
0x16e4   :  { %4511 = vrcp.f32 %v1587_v37  ;;  %v5498_v37 = vld [vmem:[%s6228_s1 + $0x18] sm:$0xff] }
0x16ee   :  { %v4506_v58 = vpop.eup %4505 }
0x16ef   :  { %v4508_v39 = vpop.eup %4507  ;;  %v1593_v61 = vmul.f32 %v4506_v58, %v4498_v0 }
0x16f0   :  { %v4510_v38 = vpop.eup %4509  ;;  %v1595_v63 = vmul.f32 %v4508_v39, %v4500_v48 }
0x16f1   :  { %1605 = vperm.xlu1 %4416, %v1593_v61   ;;  %v1597_v11 = vmul.f32 %v4510_v38, %v4502_v49  ;;  %v4512_v5 = vpop.eup %4511 }
0x16f2   :  { %1608 = vperm.xlu0 %4415, %v1595_v63   ;;  %v1599_v12 = vmul.f32 %v4512_v5, %v4504_v50 }
0x16f5   :  { %1611 = vperm.xlu1 %4416, %v1597_v11  }
0x16f9   :  { %1614 = vperm.xlu1 %4416, %v1599_v12  }
0x176c   :  { %v1606_v42 = vpop.permute.xlu1 %1605 }
0x176d   :  { %v1609_v44 = vpop.permute.xlu0 %1608  ;;  %v1642_v40 = vmul.f32 %v5472_v45, %v1606_v42  ;;  %v1619_v27 = vrot.slane %v1606_v42, %v4942_v15 }
0x176e   :  { %v1643_v0 = vmul.f32 %v5478_v41, %v1609_v44  ;;  %v1623_v10 = vrot.slane %v1609_v44, %v4942_v15 }
0x176f   :  { %v1646_v48 = vsel %vm62_vm1, %v1642_v40, 0.0 }
0x1770   :  { %v1653_v49 = vsel %vm62_vm1, %v1643_v0, 0.0  ;;  %v1647_v50 = vrot.slane %v1646_v48, 4  ;;  %v1612_v53 = vpop.permute.xlu1 %1611  ;;  %v1632_v29 = vsel %vm282_vm2, %v1623_v10, %v1619_v27 }
0x1771   :  { %v1654_v23 = vrot.slane %v1653_v49, 4  ;;  %v1644_v54 = vmul.f32 %v5488_v46, %v1612_v53  ;;  %v1627_v57 = vrot.slane %v1612_v53, %v4942_v15 }
0x1772   :  { %v1648_v28 = vadd.f32 %v1647_v50, %v1646_v48 }
0x1773   :  { %v1655_v33 = vadd.f32 %v1654_v23, %v1653_v49  ;;  %v1660_v59 = vsel %vm62_vm1, %v1644_v54, 0.0  ;;  %v1633_v61 = vsel %vm284_vm3, %v1627_v57, %v1632_v29 }
0x1774   :  { %v1649_v31 = vrot.slane %v1648_v28, 2  ;;  %v1661_v32 = vrot.slane %v1660_v59, 4  ;;  %v1615_v34 = vpop.permute.xlu1 %1614 }
0x1775   :  { %v1656_v35 = vrot.slane %v1655_v33, 2  ;;  %v1631_v36 = vrot.slane %v1615_v34, %v4942_v15  ;;  %v1645_v58 = vmul.f32 %v5498_v37, %v1615_v34 }
0x1776   :  { %v1650_v39 = vadd.f32 %v1649_v31, %v1648_v28  ;;  %v1662_v38 = vadd.f32 %v1661_v32, %v1660_v59 }
0x1777   :  { %v1657_v63 = vadd.f32 %v1656_v35, %v1655_v33  ;;  %v1634_v11 = vsel %vm286_vm4, %v1631_v36, %v1633_v61  ;;  %v1667_v5 = vsel %vm62_vm1, %v1645_v58, 0.0  ;;  %v5528_v35 = vld [vmem:[%s6235_s8] ss:$0 sm:$0xff] }
0x1778   :  { %v1663_v12 = vrot.slane %v1662_v38, 2  ;;  %1637 = vst.msk [vmem:[#allocation3 + $0x8] sm:$0xf] %vm289_vm5, %v1634_v11  ;;  %v1668_v42 = vrot.slane %v1667_v5, 4  ;;  %v1651_v40 = vrot.slane %v1650_v39, 1 }
0x1779   :  { %v1658_v44 = vrot.slane %v1657_v63, 1 }
0x177a   :  { %v1664_v0 = vadd.f32 %v1663_v12, %v1662_v38  ;;  %v1669_v48 = vadd.f32 %v1668_v42, %v1667_v5  ;;  %v1652_v10 = vadd.f32 %v1651_v40, %v1650_v39  ;;  %v5536_v5 = vld [vmem:[%s6234_s7 + $0x78] sm:$0xff]  ;;  %v5541_v12 = vld [vmem:[%s6234_s7 + $0x70] sm:$0xff]  ;;  %v5548_v42 = vld [vmem:[%s6234_s7 + $0x68] sm:$0xff] }
0x177b   :  { %v1659_v53 = vadd.f32 %v1658_v44, %v1657_v63  ;;  %4220 = vmatpush3.msra.mxu0 %v5536_v5  ;;  %v5555_v44 = vld [vmem:[%s6234_s7 + $0x60] sm:$0xff]  ;;  %v5562_v40 = vld [vmem:[%s6234_s7 + $0x58] sm:$0xff] }
0x177c   :  { %v1665_v49 = vrot.slane %v1664_v0, 1  ;;  %v1670_v50 = vrot.slane %v1669_v48, 2  ;;  %4221 = vmatprep.subr.mxu0 %v4727_v2 }
0x177d   :  { %v1680_v33 = vsel %vm282_vm2, %v1659_v53, %v1652_v10  ;;  %4222 = vmatpush3.msra.mxu0 %v5541_v12 }
0x177e   :  { %v1671_v23 = vadd.f32 %v1670_v50, %v1669_v48  ;;  %v1666_v27 = vadd.f32 %v1665_v49, %v1664_v0  ;;  %4223 = vmatprep.subr.mxu0 %v4727_v2  ;;  %v5569_v48 = vld [vmem:[%s6234_s7 + $0x50] sm:$0xff]  ;;  %v5577_v49 = vld [vmem:[%s6234_s7 + $0x48] sm:$0xff]  ;;  %v5586_v50 = vld [vmem:[%s6234_s7 + $0x40] sm:$0xff] }
0x177f   :  { %v3692_v54 = vld [vmem:[#allocation3 + $0x8] sm:$0xf]  ;;  %4224 = vmatpush3.msra.mxu0 %v5548_v42 }
0x1780   :  { %v1672_v28 = vrot.slane %v1671_v23, 1  ;;  %3698 = vst.msk [vmem:[#allocation6 + $0x8] sm:$0xf] %vm289_vm5, %v3692_v54  ;;  %v1681_v59 = vsel %vm284_vm3, %v1666_v27, %v1680_v33  ;;  %4225 = vmatprep.subr.mxu0 %v4727_v2 }
0x1781   :  { %4226 = vmatpush3.msra.mxu0 %v5555_v44 }
0x1782   :  { %v1673_v57 = vadd.f32 %v1672_v28, %v1671_v23  ;;  %4227 = vmatprep.subr.mxu0 %v4727_v2 }
0x1783   :  { %4228 = vmatpush3.msra.mxu0 %v5562_v40 }
0x1784   :  { %v1682_v31 = vsel %vm286_vm4, %v1673_v57, %v1681_v59  ;;  %4229 = vmatprep.subr.mxu0 %v4727_v2 }
0x1785   :  { %v1684_v32 = vsel %vm62_vm1, %v1682_v31, %v5319_v51  ;;  %4230 = vmatpush3.msra.mxu0 %v5569_v48 }
0x1786   :  { %4217 = vmatmul.mubr.msk.f32.vlgmr.msra.gmra.mxu1 %vm495_vm6, %v1684_v32  ;;  %4231 = vmatprep.subr.mxu0 %v4727_v2 }
0x1787   :  { %4239 = vmatpush3.msra.mxu1 %v5284_v19  ;;  %4246 = vmatprep.mubr.msk.f32.mxu1 %vm4728_vm0, %v4727_v2  ;;  %v3887_v19 = vld [vmem:[%s6227_s0 + $0x8] sm:$0xf] }
0x1788   :  { %4240 = vmatprep.subr.mxu1 %v4727_v2  ;;  %4232 = vmatpush3.msra.mxu0 %v5577_v49 }
0x1789   :  { %4241 = vmatpush3.msra.mxu1 %v5293_v9  ;;  %4233 = vmatprep.subr.mxu0 %v4727_v2 }
0x178a   :  { %4242 = vmatprep.subr.mxu1 %v4727_v2  ;;  %4234 = vmatpush3.msra.mxu0 %v5586_v50 }
0x178b   :  { %4243 = vmatpush3.msra.mxu1 %v5300_v20  ;;  %4249 = vmatprep.subr.mxu0 %v4727_v2 }
0x178c   :  { %4244 = vmatprep.subr.mxu1 %v4727_v2 }
0x178d   :  { %4245 = vmatpush3.msra.mxu1 %v5307_v21 }
0x178e   :  { %4268 = vmatprep.subr.mxu1 %v4727_v2 }
0x1846   :  { %v1762_v34 = vpop.f32.mrf.mxu1 }
0x1847   :  { %v1763_v9 = vadd.f32 %v5528_v35, %v1762_v34 }
0x1848   :  { %v4218_v29 = vpop.f32.mrf.mxu1 }
0x1849   :  { %v1766_v20 = vadd.f32 %v3887_v19, %v1763_v9 }
0x184b   :  { %1774 = vrot.lane.b32.xlu1 %v1766_v20, %s4731_s3  ;;  %v3889_v36 = vmul.f32 -1.442695, %v1766_v20 }
0x184d   :  { %4513 = vpow2.f32 %v3889_v36 }
0x185a   :  { %v4514_v21 = vpop.eup %4513 }
0x185b   :  { %v1770_v58 = vadd.f32 1.0, %v4514_v21 }
0x185d   :  { %4515 = vrcp.f32 %v1770_v58 }
0x186a   :  { %v4516_v39 = vpop.eup %4515 }
0x186b   :  { %v1784_v53 = vsub.f32 1.0, %v4516_v39  ;;  %v1790_v23 = vmul.f32 %v4516_v39, %v5319_v51 }
0x18bd   :  { %v1775_v61 = vpop.permute.xlu1 %1774 }
0x18be   :  { %v1777_v38 = vmul.f32 %v4516_v39, %v1775_v61 }
0x18c0   :  { %1779 = vrot.lane.b32.xlu1 %v1777_v38, %s4732_s23 }
0x1932   :  { %v1780_v63 = vpop.permute.xlu1 %1779 }
0x1933   :  { %v1782_v11 = vadd.f32 %v1780_v63, %v1766_v20 }
0x1935   :  { %4517 = vtanh.f32 %v1782_v11 }
0x1942   :  { %v4518_v0 = vpop.eup %4517 }
0x1943   :  { %1786 = vrot.lane.b32.xlu1 %v4518_v0, %s4733_s19 }
0x19b5   :  { %v1787_v10 = vpop.permute.xlu1 %1786 }
0x19b6   :  { %v1789_v27 = vmul.f32 %v1787_v10, %v1784_v53 }
0x19b8   :  { %v5591_v54 = vadd.f32 %v1790_v23, %v1789_v27 }
0x19ba   :  { %1793 = vrot.lane.b32.xlu0 %v5591_v54, %s4733_s19 }
0x1a2c   :  { %v1794_v28 = vpop.permute.xlu0 %1793 }
0x1a2d   :  { %v1796_v57 = vsel %vm62_vm1, %v1794_v28, %v5333_v60 }
0x1a2e   :  { %4236 = vmatmul.mubr.msk.f32.vlgmr.msra.gmra.mxu0 %vm495_vm6, %v1796_v57 }
0x1a2f   :  { %4250 = vmatpush3.msra.mxu0 %v5416_v13  ;;  %4265 = vmatprep.mubr.msk.f32.mxu0 %vm4728_vm0, %v4727_v2  ;;  %v5619_v13 = vld [vmem:[%s6235_s8 + $0x1] ss:$0 sm:$0xff] }
0x1a30   :  { %4251 = vmatprep.subr.mxu0 %v4727_v2 }
0x1a31   :  { %4252 = vmatpush3.msra.mxu0 %v5423_v3 }
0x1a32   :  { %4253 = vmatprep.subr.mxu0 %v4727_v2 }
0x1a33   :  { %4254 = vmatpush3.msra.mxu0 %v5430_v14 }
0x1a34   :  { %4255 = vmatprep.subr.mxu0 %v4727_v2 }
0x1a35   :  { %4256 = vmatpush3.msra.mxu0 %v5437_v17 }
0x1a36   :  { %4257 = vmatprep.subr.mxu0 %v4727_v2 }
0x1a37   :  { %4258 = vmatpush3.msra.mxu0 %v5444_v22 }
0x1a38   :  { %4259 = vmatprep.subr.mxu0 %v4727_v2 }
0x1a39   :  { %4260 = vmatpush3.msra.mxu0 %v5450_v25 }
0x1a3a   :  { %4261 = vmatprep.subr.mxu0 %v4727_v2 }
0x1a3b   :  { %4262 = vmatpush3.msra.mxu0 %v5456_v1 }
0x1a3c   :  { %4263 = vmatprep.subr.mxu0 %v4727_v2 }
0x1a3d   :  { %4264 = vmatpush3.msra.mxu0 %v5463_v26 }
0x1a3e   :  { %4287 = vmatprep.subr.mxu0 %v4727_v2 }
0x1aee   :  { %v1874_v51 = vpop.f32.mrf.mxu0 }
0x1aef   :  { %v1875_v3 = vadd.f32 %v5619_v13, %v1874_v51 }
0x1af0   :  { %v4237_v14 = vpop.f32.mrf.mxu0 }
0x1af1   :  { %1885 = vrot.lane.b32.xlu1 %v1875_v3, %s4731_s3  ;;  %v3899_v17 = vmul.f32 -1.442695, %v1875_v3 }
0x1af3   :  { %4519 = vpow2.f32 %v3899_v17 }
0x1b00   :  { %v4520_v22 = vpop.eup %4519 }
0x1b01   :  { %v1881_v25 = vadd.f32 1.0, %v4520_v22 }
0x1b03   :  { %4521 = vrcp.f32 %v1881_v25 }
0x1b10   :  { %v4522_v1 = vpop.eup %4521 }
0x1b11   :  { %v1895_v19 = vsub.f32 1.0, %v4522_v1  ;;  %v1901_v9 = vmul.f32 %v4522_v1, %v5333_v60 }
0x1b63   :  { %v1886_v26 = vpop.permute.xlu1 %1885 }
0x1b64   :  { %v1888_v33 = vmul.f32 %v4522_v1, %v1886_v26 }
0x1b66   :  { %1890 = vrot.lane.b32.xlu0 %v1888_v33, %s4732_s23 }
0x1bd8   :  { %v1891_v59 = vpop.permute.xlu0 %1890 }
0x1bd9   :  { %v1893_v31 = vadd.f32 %v1891_v59, %v1875_v3 }
0x1bdb   :  { %4523 = vtanh.f32 %v1893_v31 }
0x1be8   :  { %v4524_v32 = vpop.eup %4523 }
0x1be9   :  { %1897 = vrot.lane.b32.xlu1 %v4524_v32, %s4733_s19 }
0x1c5b   :  { %v1898_v34 = vpop.permute.xlu1 %1897 }
0x1c5c   :  { %v1900_v29 = vmul.f32 %v1898_v34, %v1895_v19 }
0x1c5e   :  { %v5626_v20 = vadd.f32 %v1901_v9, %v1900_v29 }
0x1c60   :  { %1904 = vrot.lane.b32.xlu0 %v5626_v20, %s4733_s19 }
0x1cd2   :  { %v1905_v36 = vpop.permute.xlu0 %1904 }
0x1cd3   :  { %1907 = vst.msk [vmem:[#allocation2 + $0x8] sm:$0xf] %vm720_vm7, %v1905_v36  ;;  %4247 = vmatmul.mubr.msk.f32.vlgmr.msra.gmra.mxu1 %vm62_vm1, %v1905_v36 }
0x1cd4   :  { %4269 = vmatpush3.msra.mxu1 %v5536_v5  ;;  %4284 = vmatprep.mubr.msk.f32.mxu1 %vm4728_vm0, %v4727_v2 }
0x1cd5   :  { %4270 = vmatprep.subr.mxu1 %v4727_v2 }
0x1cd6   :  { %4271 = vmatpush3.msra.mxu1 %v5541_v12 }
0x1cd7   :  { %4272 = vmatprep.subr.mxu1 %v4727_v2 }
0x1cd8   :  { %4273 = vmatpush3.msra.mxu1 %v5548_v42 }
0x1cd9   :  { %4274 = vmatprep.subr.mxu1 %v4727_v2 }
0x1cda   :  { %4275 = vmatpush3.msra.mxu1 %v5555_v44 }
0x1cdb   :  { %4276 = vmatprep.subr.mxu1 %v4727_v2 }
0x1cdc   :  { %4277 = vmatpush3.msra.mxu1 %v5562_v40 }
0x1cdd   :  { %4278 = vmatprep.subr.mxu1 %v4727_v2 }
0x1cde   :  { %4279 = vmatpush3.msra.mxu1 %v5569_v48 }
0x1cdf   :  { %4280 = vmatprep.subr.mxu1 %v4727_v2 }
0x1ce0   :  { %4281 = vmatpush3.msra.mxu1 %v5577_v49 }
0x1ce1   :  { %4282 = vmatprep.subr.mxu1 %v4727_v2 }
0x1ce2   :  { %4283 = vmatpush3.msra.mxu1 %v5586_v50 }
0x1ce3   :  { %4298 = vmatprep.subr.mxu1 %v4727_v2 }
0x1d93   :  { %v1976_v60 = vpop.f32.mrf.mxu1 }
0x1d94   :  { %v1987_v21 = vrot.slane %v1976_v60, %v4872_v16 }
0x1d95   :  { %v4248_v58 = vpop.f32.mrf.mxu1 }
0x1d96   :  { %v1988_v39 = vcombine.high %v1987_v21, %v1987_v21  ;;  %v1995_v61 = vrot.slane %v1987_v21, %v4872_v16 }
0x1d98   :  { %v2002_v38 = vrot.slane %v1988_v39, %v4872_v16  ;;  %v2003_v63 = vcombine.high %v1995_v61, %v1995_v61  ;;  %v2008_v11 = vrot.slane %v1995_v61, %v4875_v18 }
0x1d9a   :  { %v2004_v5 = vcombine.high %v2002_v38, %v2002_v38  ;;  %v2012_v12 = vrot.slane %v2002_v38, %v4875_v18  ;;  %v2016_v42 = vrot.slane %v2003_v63, %v4875_v18  ;;  %v2025_v44 = vadd.f32 %v5350_v24, %v2008_v11 }
0x1d9c   :  { %v2020_v40 = vrot.slane %v2004_v5, %v4875_v18  ;;  %v2026_v0 = vadd.f32 %v5357_v4, %v2012_v12  ;;  %v2027_v48 = vadd.f32 %v5363_v30, %v2016_v42  ;;  %4525 = vtanh.f32 %v2025_v44 }
0x1d9e   :  { %v2028_v49 = vadd.f32 %v5369_v43, %v2020_v40  ;;  %4527 = vtanh.f32 %v2026_v0 }
0x1d9f   :  { %4529 = vtanh.f32 %v2027_v48 }
0x1da0   :  { %4531 = vtanh.f32 %v2028_v49 }
0x1da9   :  { %v4526_v50 = vpop.eup %4525 }
0x1daa   :  { %v2033_v53 = vmul.f32 %v5375_v47, %v4526_v50 }
0x1dab   :  { %v4528_v10 = vpop.eup %4527 }
0x1dac   :  { %v4530_v23 = vpop.eup %4529  ;;  %v2037_v27 = vsel %vm62_vm1, %v2033_v53, 0.0  ;;  %v2034_v24 = vmul.f32 %v5375_v47, %v4528_v10 }
0x1dad   :  { %2038 = vadd.xlane.f32.xlu1 %v2037_v27  ;;  %v2035_v30 = vmul.f32 %v5375_v47, %v4530_v23  ;;  %v4532_v28 = vpop.eup %4531 }
0x1dae   :  { %v2040_v4 = vsel %vm62_vm1, %v2034_v24, 0.0  ;;  %v2036_v57 = vmul.f32 %v5375_v47, %v4532_v28 }
0x1daf   :  { %2041 = vadd.xlane.f32.xlu0 %v2040_v4  ;;  %v2043_v43 = vsel %vm62_vm1, %v2035_v30, 0.0 }
0x1db0   :  { %v2046_v51 = vsel %vm62_vm1, %v2036_v57, 0.0 }
0x1db3   :  { %2044 = vadd.xlane.f32.xlu0 %v2043_v43 }
0x1db7   :  { %2047 = vadd.xlane.f32.xlu0 %v2046_v51 }
0x1e36   :  { %v2039_v3 = vpop.xlane.xlu1 %2038 }
0x1e37   :  { %v2049_v14 = vadd.f32 %v2039_v3, %v4933_v62 }
0x1e38   :  { %v2042_v17 = vpop.xlane.xlu0 %2041 }
0x1e39   :  { %v2050_v22 = vadd.f32 %v2042_v17, %v4928_v55  ;;  %2058 = vperm.xlu1 %4416, %v2049_v14  }
0x1e3b   :  { %2061 = vperm.xlu0 %4415, %v2050_v22  }
0x1e3c   :  { %v2045_v25 = vpop.xlane.xlu0 %2044 }
0x1e3d   :  { %v2051_v1 = vadd.f32 %v2045_v25, %v4930_v56 }
0x1e3f   :  { %2064 = vperm.xlu1 %4416, %v2051_v1  }
0x1e40   :  { %v2048_v26 = vpop.xlane.xlu0 %2047 }
0x1e41   :  { %v2052_v33 = vadd.f32 %v2048_v26, %v4937_v6 }
0x1e43   :  { %2067 = vperm.xlu1 %4416, %v2052_v33  }
0x1eb4   :  { %v2059_v47 = vpop.permute.xlu1 %2058 }
0x1eb5   :  { %v2072_v34 = vrot.slane %v2059_v47, %v4942_v15 }
0x1eb6   :  { %v2062_v59 = vpop.permute.xlu0 %2061 }
0x1eb7   :  { %v2076_v32 = vrot.slane %v2062_v59, %v4942_v15 }
0x1eb9   :  { %v2085_v29 = vsel %vm282_vm2, %v2076_v32, %v2072_v34 }
0x1eba   :  { %v2065_v31 = vpop.permute.xlu1 %2064 }
0x1ebb   :  { %v2080_v19 = vrot.slane %v2065_v31, %v4942_v15 }
0x1ebd   :  { %v2086_v60 = vsel %vm284_vm3, %v2080_v19, %v2085_v29 }
0x1ebe   :  { %v2068_v9 = vpop.permute.xlu1 %2067 }
0x1ebf   :  { %v2084_v36 = vrot.slane %v2068_v9, %v4942_v15 }
0x1ec1   :  { %v2087_v21 = vsel %vm286_vm4, %v2084_v36, %v2086_v60 }
0x1ec2   :  { %v2089_v58 = vsel %vm289_vm5, %v2087_v21, -inf }
0x1ec3   :  { %2090 = vmax.xlane.f32.xlu1 %v2089_v58 }
0x1f4c   :  { %v2091_v39 = vpop.xlane.xlu1 %2090 }
0x1f4d   :  { %v2096_v61 = vrot.slane %v2091_v39, %v4875_v18  ;;  %v2100_v38 = vrot.slane %v2091_v39, %v4843_v7  ;;  %v2104_v63 = vrot.slane %v2091_v39, %v4846_v8  ;;  %v2108_v42 = vrot.slane %v2091_v39, %v4922_v52 }
0x1f4f   :  { %v2113_v11 = vsub.f32 %v2049_v14, %v2096_v61  ;;  %v2114_v5 = vsub.f32 %v2050_v22, %v2100_v38  ;;  %v2115_v44 = vsub.f32 %v2051_v1, %v2104_v63  ;;  %v2116_v0 = vsub.f32 %v2052_v33, %v2108_v42 }
0x1f51   :  { %v2117_v12 = vmul.f32 1.442695, %v2113_v11  ;;  %v2119_v40 = vmul.f32 1.442695, %v2114_v5  ;;  %v2121_v48 = vmul.f32 1.442695, %v2115_v44 }
0x1f52   :  { %v2123_v49 = vmul.f32 1.442695, %v2116_v0 }
0x1f53   :  { %4533 = vpow2.f32 %v2117_v12 }
0x1f54   :  { %4535 = vpow2.f32 %v2119_v40 }
0x1f55   :  { %4537 = vpow2.f32 %v2121_v48 }
0x1f56   :  { %4539 = vpow2.f32 %v2123_v49 }
0x1f60   :  { %v4534_v50 = vpop.eup %4533 }
0x1f61   :  { %2130 = vperm.xlu0 %4415, %v4534_v50   ;;  %v4536_v53 = vpop.eup %4535 }
0x1f62   :  { %v4538_v10 = vpop.eup %4537 }
0x1f63   :  { %v4540_v23 = vpop.eup %4539 }
0x1f65   :  { %2133 = vperm.xlu0 %4415, %v4536_v53  }
0x1f69   :  { %2136 = vperm.xlu0 %4415, %v4538_v10  }
0x1f6d   :  { %2139 = vperm.xlu0 %4415, %v4540_v23  }
0x1fdc   :  { %v2131_v27 = vpop.permute.xlu0 %2130 }
0x1fdd   :  { %v2144_v43 = vrot.slane %v2131_v27, %v4942_v15 }
0x1fe0   :  { %v2134_v24 = vpop.permute.xlu0 %2133 }
0x1fe1   :  { %v2148_v30 = vrot.slane %v2134_v24, %v4942_v15 }
0x1fe3   :  { %v2157_v51 = vsel %vm282_vm2, %v2148_v30, %v2144_v43 }
0x1fe4   :  { %v2137_v4 = vpop.permute.xlu0 %2136 }
0x1fe5   :  { %v2152_v28 = vrot.slane %v2137_v4, %v4942_v15 }
0x1fe7   :  { %v2158_v14 = vsel %vm284_vm3, %v2152_v28, %v2157_v51 }
0x1fe8   :  { %v2140_v57 = vpop.permute.xlu0 %2139 }
0x1fe9   :  { %v2156_v3 = vrot.slane %v2140_v57, %v4942_v15 }
0x1feb   :  { %v2159_v17 = vsel %vm286_vm4, %v2156_v3, %v2158_v14 }
0x1fec   :  { %v2161_v22 = vsel %vm289_vm5, %v2159_v17, 0.0 }
0x1fed   :  { %2162 = vadd.xlane.f32.xlu0 %v2161_v22 }
0x2076   :  { %v2163_v25 = vpop.xlane.xlu0 %2162 }
0x2077   :  { %v2168_v1 = vrot.slane %v2163_v25, %v4875_v18  ;;  %v2172_v26 = vrot.slane %v2163_v25, %v4843_v7  ;;  %v2176_v33 = vrot.slane %v2163_v25, %v4846_v8  ;;  %v2180_v47 = vrot.slane %v2163_v25, %v4922_v52 }
0x2079   :  { %4541 = vrcp.f32 %v2168_v1 }
0x207a   :  { %4543 = vrcp.f32 %v2172_v26 }
0x207b   :  { %4545 = vrcp.f32 %v2176_v33 }
0x207c   :  { %4547 = vrcp.f32 %v2180_v47 }
0x2086   :  { %v4542_v59 = vpop.eup %4541 }
0x2087   :  { %v4544_v31 = vpop.eup %4543  ;;  %v2186_v32 = vmul.f32 %v4542_v59, %v4534_v50 }
0x2088   :  { %v4546_v19 = vpop.eup %4545  ;;  %v2188_v34 = vmul.f32 %v4544_v31, %v4536_v53 }
0x2089   :  { %2198 = vperm.xlu1 %4416, %v2186_v32   ;;  %v2190_v9 = vmul.f32 %v4546_v19, %v4538_v10  ;;  %v4548_v29 = vpop.eup %4547 }
0x208a   :  { %2201 = vperm.xlu0 %4415, %v2188_v34   ;;  %v2192_v36 = vmul.f32 %v4548_v29, %v4540_v23 }
0x208d   :  { %2204 = vperm.xlu1 %4416, %v2190_v9  }
0x2091   :  { %2207 = vperm.xlu1 %4416, %v2192_v36   ;;  %v5723_v36 = vld [vmem:[%s6232_s5 + $0x18] sm:$0xff] }
0x2104   :  { %v2199_v60 = vpop.permute.xlu1 %2198 }
0x2105   :  { %v2202_v21 = vpop.permute.xlu0 %2201  ;;  %v2235_v58 = vmul.f32 %v5472_v45, %v2199_v60  ;;  %v2212_v42 = vrot.slane %v2199_v60, %v4942_v15  ;;  %v5732_v60 = vld [vmem:[%s6232_s5 + $0x10] sm:$0xff] }
0x2106   :  { %v2236_v39 = vmul.f32 %v5478_v41, %v2202_v21  ;;  %v2216_v5 = vrot.slane %v2202_v21, %v4942_v15  ;;  %v5739_v21 = vld [vmem:[%s6232_s5 + $0x8] sm:$0xff] }
0x2107   :  { %v2239_v61 = vsel %vm62_vm1, %v2235_v58, 0.0  ;;  %v5746_v58 = vld [vmem:[%s6232_s5] sm:$0xff] }
0x2108   :  { %v2246_v38 = vsel %vm62_vm1, %v2236_v39, 0.0  ;;  %v2240_v63 = vrot.slane %v2239_v61, 4  ;;  %v2205_v11 = vpop.permute.xlu1 %2204  ;;  %v2225_v10 = vsel %vm282_vm2, %v2216_v5, %v2212_v42  ;;  %v3901_v39 = vld [vmem:[%s6227_s0 + $0xc] sm:$0xf] }
0x2109   :  { %v2247_v12 = vrot.slane %v2246_v38, 4  ;;  %v2237_v44 = vmul.f32 %v5488_v46, %v2205_v11  ;;  %v2220_v0 = vrot.slane %v2205_v11, %v4942_v15 }
0x210a   :  { %v2241_v40 = vadd.f32 %v2240_v63, %v2239_v61 }
0x210b   :  { %v2248_v48 = vadd.f32 %v2247_v12, %v2246_v38  ;;  %v2253_v45 = vsel %vm62_vm1, %v2237_v44, 0.0  ;;  %v2226_v4 = vsel %vm284_vm3, %v2220_v0, %v2225_v10 }
0x210c   :  { %v2242_v41 = vrot.slane %v2241_v40, 2  ;;  %v2254_v49 = vrot.slane %v2253_v45, 4  ;;  %v2208_v50 = vpop.permute.xlu1 %2207 }
0x210d   :  { %v2249_v53 = vrot.slane %v2248_v48, 2  ;;  %v2224_v23 = vrot.slane %v2208_v50, %v4942_v15  ;;  %v2238_v27 = vmul.f32 %v5498_v37, %v2208_v50 }
0x210e   :  { %v2243_v24 = vadd.f32 %v2242_v41, %v2241_v40  ;;  %v2255_v46 = vadd.f32 %v2254_v49, %v2253_v45 }
0x210f   :  { %v2250_v30 = vadd.f32 %v2249_v53, %v2248_v48  ;;  %v2227_v28 = vsel %vm286_vm4, %v2224_v23, %v2226_v4  ;;  %v2260_v43 = vsel %vm62_vm1, %v2238_v27, 0.0 }
0x2110   :  { %v2256_v57 = vrot.slane %v2255_v46, 2  ;;  %2230 = vst.msk [vmem:[#allocation3 + $0xc] sm:$0xf] %vm289_vm5, %v2227_v28  ;;  %v2261_v51 = vrot.slane %v2260_v43, 4  ;;  %v2244_v14 = vrot.slane %v2243_v24, 1 }
0x2111   :  { %v2251_v3 = vrot.slane %v2250_v30, 1 }
0x2112   :  { %v2257_v17 = vadd.f32 %v2256_v57, %v2255_v46  ;;  %v2262_v22 = vadd.f32 %v2261_v51, %v2260_v43  ;;  %v2245_v26 = vadd.f32 %v2244_v14, %v2243_v24 }
0x2113   :  { %v2252_v37 = vadd.f32 %v2251_v3, %v2250_v30 }
0x2114   :  { %v2258_v25 = vrot.slane %v2257_v17, 1  ;;  %v2263_v1 = vrot.slane %v2262_v22, 2 }
0x2115   :  { %v2273_v19 = vsel %vm282_vm2, %v2252_v37, %v2245_v26 }
0x2116   :  { %v2264_v33 = vadd.f32 %v2263_v1, %v2262_v22  ;;  %v2259_v47 = vadd.f32 %v2258_v25, %v2257_v17 }
0x2117   :  { %v3693_v59 = vld [vmem:[#allocation3 + $0xc] sm:$0xf] }
0x2118   :  { %v2265_v31 = vrot.slane %v2264_v33, 1  ;;  %3699 = vst.msk [vmem:[#allocation6 + $0xc] sm:$0xf] %vm289_vm5, %v3693_v59  ;;  %v2274_v34 = vsel %vm284_vm3, %v2259_v47, %v2273_v19 }
0x211a   :  { %v2266_v32 = vadd.f32 %v2265_v31, %v2264_v33 }
0x211c   :  { %v2275_v9 = vsel %vm286_vm4, %v2266_v32, %v2274_v34 }
0x211d   :  { %v2277_v29 = vsel %vm62_vm1, %v2275_v9, %v5591_v54 }
0x211e   :  { %4266 = vmatmul.mubr.msk.f32.vlgmr.msra.gmra.mxu0 %vm495_vm6, %v2277_v29 }
0x211f   :  { %4288 = vmatpush3.msra.mxu0 %v5723_v36  ;;  %4295 = vmatprep.mubr.msk.f32.mxu0 %vm4728_vm0, %v4727_v2 }
0x2120   :  { %4289 = vmatprep.subr.mxu0 %v4727_v2 }
0x2121   :  { %4290 = vmatpush3.msra.mxu0 %v5732_v60 }
0x2122   :  { %4291 = vmatprep.subr.mxu0 %v4727_v2 }
0x2123   :  { %4292 = vmatpush3.msra.mxu0 %v5739_v21 }
0x2124   :  { %4293 = vmatprep.subr.mxu0 %v4727_v2 }
0x2125   :  { %4294 = vmatpush3.msra.mxu0 %v5746_v58 }
0x2126   :  { %4317 = vmatprep.subr.mxu0 %v4727_v2 }
0x21de   :  { %v2355_v61 = vpop.f32.mrf.mxu0 }
0x21df   :  { %v2356_v38 = vadd.f32 %v5528_v35, %v2355_v61  ;;  %v5789_v61 = vld [vmem:[%s6229_s2] sm:$0xff] }
0x21e0   :  { %v4267_v63 = vpop.f32.mrf.mxu0 }
0x21e1   :  { %v2359_v11 = vadd.f32 %v3901_v39, %v2356_v38 }
0x21e3   :  { %2367 = vrot.lane.b32.xlu1 %v2359_v11, %s4731_s3  ;;  %v3903_v5 = vmul.f32 -1.442695, %v2359_v11 }
0x21e5   :  { %4549 = vpow2.f32 %v3903_v5 }
0x21f2   :  { %v4550_v12 = vpop.eup %4549 }
0x21f3   :  { %v2363_v42 = vadd.f32 1.0, %v4550_v12  ;;  %v5802_v12 = vld [vmem:[%s6229_s2 + $0x10] sm:$0xff] }
0x21f5   :  { %4551 = vrcp.f32 %v2363_v42 }
0x2202   :  { %v4552_v44 = vpop.eup %4551 }
0x2203   :  { %v2377_v35 = vsub.f32 1.0, %v4552_v44  ;;  %v2383_v50 = vmul.f32 %v4552_v44, %v5591_v54 }
0x2255   :  { %v2368_v40 = vpop.permute.xlu1 %2367 }
0x2256   :  { %v2370_v0 = vmul.f32 %v4552_v44, %v2368_v40  ;;  %v5808_v44 = vld [vmem:[%s6229_s2 + $0x18] sm:$0xff] }
0x2258   :  { %2372 = vrot.lane.b32.xlu1 %v2370_v0, %s4732_s23 }
0x22ca   :  { %v2373_v48 = vpop.permute.xlu1 %2372 }
0x22cb   :  { %v2375_v45 = vadd.f32 %v2373_v48, %v2359_v11  ;;  %v5796_v11 = vld [vmem:[%s6229_s2 + $0x8] sm:$0xff]  ;;  %v5814_v48 = vld [vmem:[%s6233_s6] ss:$0 sm:$0xff] }
0x22cd   :  { %4553 = vtanh.f32 %v2375_v45 }
0x22da   :  { %v4554_v41 = vpop.eup %4553 }
0x22db   :  { %2379 = vrot.lane.b32.xlu1 %v4554_v41, %s4733_s19 }
0x234d   :  { %v2380_v49 = vpop.permute.xlu1 %2379 }
0x234e   :  { %v2382_v53 = vmul.f32 %v2380_v49, %v2377_v35 }
0x2350   :  { %v5758_v10 = vadd.f32 %v2383_v50, %v2382_v53 }
0x2352   :  { %2386 = vrot.lane.b32.xlu0 %v5758_v10, %s4733_s19 }
0x23c4   :  { %v2387_v23 = vpop.permute.xlu0 %2386 }
0x23c5   :  { %v2389_v27 = vsel %vm62_vm1, %v2387_v23, %v5626_v20 }
0x23c6   :  { %4285 = vmatmul.mubr.msk.f32.vlgmr.msra.gmra.mxu1 %vm495_vm6, %v2389_v27 }
0x23c7   :  { %4314 = vmatprep.mubr.msk.f32.mxu1 %vm4728_vm0, %v4727_v2 }
0x2486   :  { %v2467_v24 = vpop.f32.mrf.mxu1 }
0x2487   :  { %v2468_v4 = vadd.f32 %v5619_v13, %v2467_v24 }
0x2488   :  { %v4286_v46 = vpop.f32.mrf.mxu1 }
0x2489   :  { %2478 = vrot.lane.b32.xlu1 %v2468_v4, %s4731_s3  ;;  %v3913_v54 = vmul.f32 -1.442695, %v2468_v4 }
0x248b   :  { %4555 = vpow2.f32 %v3913_v54 }
0x2498   :  { %v4556_v30 = vpop.eup %4555 }
0x2499   :  { %v2474_v28 = vadd.f32 1.0, %v4556_v30 }
0x249b   :  { %4557 = vrcp.f32 %v2474_v28 }
0x24a8   :  { %v4558_v43 = vpop.eup %4557 }
0x24a9   :  { %v2488_v13 = vsub.f32 1.0, %v4558_v43  ;;  %v2494_v25 = vmul.f32 %v4558_v43, %v5626_v20 }
0x24fb   :  { %v2479_v57 = vpop.permute.xlu1 %2478 }
0x24fc   :  { %v2481_v51 = vmul.f32 %v4558_v43, %v2479_v57 }
0x24fe   :  { %2483 = vrot.lane.b32.xlu0 %v2481_v51, %s4732_s23 }
0x2570   :  { %v2484_v3 = vpop.permute.xlu0 %2483 }
0x2571   :  { %v2486_v14 = vadd.f32 %v2484_v3, %v2468_v4 }
0x2573   :  { %4559 = vtanh.f32 %v2486_v14 }
0x2580   :  { %v4560_v17 = vpop.eup %4559 }
0x2581   :  { %2490 = vrot.lane.b32.xlu1 %v4560_v17, %s4733_s19 }
0x25f3   :  { %v2491_v22 = vpop.permute.xlu1 %2490 }
0x25f4   :  { %v2493_v1 = vmul.f32 %v2491_v22, %v2488_v13 }
0x25f6   :  { %v5772_v37 = vadd.f32 %v2494_v25, %v2493_v1 }
0x25f8   :  { %2497 = vrot.lane.b32.xlu0 %v5772_v37, %s4733_s19 }
0x266a   :  { %v2498_v26 = vpop.permute.xlu0 %2497 }
0x266b   :  { %2500 = vst.msk [vmem:[#allocation2 + $0xc] sm:$0xf] %vm720_vm7, %v2498_v26  ;;  %4296 = vmatmul.mubr.msk.f32.vlgmr.msra.gmra.mxu0 %vm62_vm1, %v2498_v26 }
0x266c   :  { %4333 = vmatprep.mubr.msk.f32.mxu0 %vm4728_vm0, %v4727_v2 }
0x272b   :  { %v2569_v33 = vpop.f32.mrf.mxu0 }
0x272c   :  { %v2580_v47 = vrot.slane %v2569_v33, %v4872_v16 }
0x272d   :  { %v4297_v59 = vpop.f32.mrf.mxu0 }
0x272e   :  { %v2581_v31 = vcombine.high %v2580_v47, %v2580_v47  ;;  %v2588_v20 = vrot.slane %v2580_v47, %v4872_v16 }
0x2730   :  { %v2595_v32 = vrot.slane %v2581_v31, %v4872_v16  ;;  %v2596_v19 = vcombine.high %v2588_v20, %v2588_v20  ;;  %v2601_v34 = vrot.slane %v2588_v20, %v4875_v18 }
0x2732   :  { %v2597_v9 = vcombine.high %v2595_v32, %v2595_v32  ;;  %v2605_v29 = vrot.slane %v2595_v32, %v4875_v18  ;;  %v2609_v39 = vrot.slane %v2596_v19, %v4875_v18  ;;  %v2618_v38 = vadd.f32 %v5789_v61, %v2601_v34 }
0x2734   :  { %v2613_v63 = vrot.slane %v2597_v9, %v4875_v18  ;;  %v2619_v5 = vadd.f32 %v5796_v11, %v2605_v29  ;;  %v2620_v42 = vadd.f32 %v5802_v12, %v2609_v39  ;;  %4561 = vtanh.f32 %v2618_v38 }
0x2736   :  { %v2621_v40 = vadd.f32 %v5808_v44, %v2613_v63  ;;  %4563 = vtanh.f32 %v2619_v5 }
0x2737   :  { %4565 = vtanh.f32 %v2620_v42 }
0x2738   :  { %4567 = vtanh.f32 %v2621_v40 }
0x2741   :  { %v4562_v0 = vpop.eup %4561 }
0x2742   :  { %v2626_v45 = vmul.f32 %v5814_v48, %v4562_v0 }
0x2743   :  { %v4564_v41 = vpop.eup %4563 }
0x2744   :  { %v4566_v35 = vpop.eup %4565  ;;  %v2630_v49 = vsel %vm62_vm1, %v2626_v45, 0.0  ;;  %v2627_v50 = vmul.f32 %v5814_v48, %v4564_v41 }
0x2745   :  { %2631 = vadd.xlane.f32.xlu1 %v2630_v49  ;;  %v2628_v23 = vmul.f32 %v5814_v48, %v4566_v35  ;;  %v4568_v27 = vpop.eup %4567 }
0x2746   :  { %v2633_v53 = vsel %vm62_vm1, %v2627_v50, 0.0  ;;  %v2629_v4 = vmul.f32 %v5814_v48, %v4568_v27 }
0x2747   :  { %2634 = vadd.xlane.f32.xlu0 %v2633_v53  ;;  %v2636_v24 = vsel %vm62_vm1, %v2628_v23, 0.0 }
0x2748   :  { %v2639_v46 = vsel %vm62_vm1, %v2629_v4, 0.0 }
0x274b   :  { %2637 = vadd.xlane.f32.xlu0 %v2636_v24 }
0x274f   :  { %2640 = vadd.xlane.f32.xlu0 %v2639_v46 }
0x27ce   :  { %v2632_v54 = vpop.xlane.xlu1 %2631 }
0x27cf   :  { %v2642_v30 = vadd.f32 %v2632_v54, %v4933_v62 }
0x27d0   :  { %v2635_v28 = vpop.xlane.xlu0 %2634 }
0x27d1   :  { %v2643_v43 = vadd.f32 %v2635_v28, %v4928_v55  ;;  %2651 = vperm.xlu1 %4416, %v2642_v30  }
0x27d3   :  { %2654 = vperm.xlu0 %4415, %v2643_v43  }
0x27d4   :  { %v2638_v57 = vpop.xlane.xlu0 %2637 }
0x27d5   :  { %v2644_v51 = vadd.f32 %v2638_v57, %v4930_v56 }
0x27d7   :  { %2657 = vperm.xlu1 %4416, %v2644_v51  }
0x27d8   :  { %v2641_v3 = vpop.xlane.xlu0 %2640 }
0x27d9   :  { %v2645_v14 = vadd.f32 %v2641_v3, %v4937_v6 }
0x27db   :  { %2660 = vperm.xlu1 %4416, %v2645_v14  }
0x284c   :  { %v2652_v17 = vpop.permute.xlu1 %2651 }
0x284d   :  { %v2665_v26 = vrot.slane %v2652_v17, %v4942_v15 }
0x284e   :  { %v2655_v13 = vpop.permute.xlu0 %2654 }
0x284f   :  { %v2669_v25 = vrot.slane %v2655_v13, %v4942_v15 }
0x2851   :  { %v2678_v47 = vsel %vm282_vm2, %v2669_v25, %v2665_v26 }
0x2852   :  { %v2658_v22 = vpop.permute.xlu1 %2657 }
0x2853   :  { %v2673_v1 = vrot.slane %v2658_v22, %v4942_v15 }
0x2855   :  { %v2679_v31 = vsel %vm284_vm3, %v2673_v1, %v2678_v47 }
0x2856   :  { %v2661_v33 = vpop.permute.xlu1 %2660 }
0x2857   :  { %v2677_v59 = vrot.slane %v2661_v33, %v4942_v15 }
0x2859   :  { %v2680_v20 = vsel %vm286_vm4, %v2677_v59, %v2679_v31 }
0x285a   :  { %v2682_v32 = vsel %vm289_vm5, %v2680_v20, -inf }
0x285b   :  { %2683 = vmax.xlane.f32.xlu1 %v2682_v32 }
0x28e4   :  { %v2684_v19 = vpop.xlane.xlu1 %2683 }
0x28e5   :  { %v2689_v34 = vrot.slane %v2684_v19, %v4875_v18  ;;  %v2693_v9 = vrot.slane %v2684_v19, %v4843_v7  ;;  %v2697_v29 = vrot.slane %v2684_v19, %v4846_v8  ;;  %v2701_v5 = vrot.slane %v2684_v19, %v4922_v52  ;;  %v5855_v19 = vld [vmem:[%s6234_s7 + $0x38] sm:$0xff] }
0x28e6   :  { %4299 = vmatpush3.msra.mxu1 %v5855_v19 }
0x28e7   :  { %v2706_v39 = vsub.f32 %v2642_v30, %v2689_v34  ;;  %v2707_v38 = vsub.f32 %v2643_v43, %v2693_v9  ;;  %v2708_v42 = vsub.f32 %v2644_v51, %v2697_v29  ;;  %v2709_v0 = vsub.f32 %v2645_v14, %v2701_v5  ;;  %4300 = vmatprep.subr.mxu1 %v4727_v2  ;;  %v5862_v34 = vld [vmem:[%s6234_s7 + $0x30] sm:$0xff]  ;;  %v5869_v9 = vld [vmem:[%s6234_s7 + $0x28] sm:$0xff]  ;;  %v5876_v29 = vld [vmem:[%s6234_s7 + $0x20] sm:$0xff] }
0x28e8   :  { %4301 = vmatpush3.msra.mxu1 %v5862_v34  ;;  %v5902_v5 = vld [vmem:[%s6234_s7] sm:$0xff] }
0x28e9   :  { %v2710_v63 = vmul.f32 1.442695, %v2706_v39  ;;  %v2712_v40 = vmul.f32 1.442695, %v2707_v38  ;;  %v2714_v45 = vmul.f32 1.442695, %v2708_v42  ;;  %4302 = vmatprep.subr.mxu1 %v4727_v2 }
0x28ea   :  { %v2716_v41 = vmul.f32 1.442695, %v2709_v0  ;;  %4303 = vmatpush3.msra.mxu1 %v5869_v9  ;;  %v5883_v39 = vld [vmem:[%s6234_s7 + $0x18] sm:$0xff]  ;;  %v5889_v38 = vld [vmem:[%s6234_s7 + $0x10] sm:$0xff]  ;;  %v5911_v0 = vld [vmem:[%s6228_s1] sm:$0xff] }
0x28eb   :  { %4569 = vpow2.f32 %v2710_v63  ;;  %4304 = vmatprep.subr.mxu1 %v4727_v2  ;;  %v5895_v63 = vld [vmem:[%s6234_s7 + $0x8] sm:$0xff] }
0x28ec   :  { %4571 = vpow2.f32 %v2712_v40  ;;  %4305 = vmatpush3.msra.mxu1 %v5876_v29 }
0x28ed   :  { %4573 = vpow2.f32 %v2714_v45  ;;  %4306 = vmatprep.subr.mxu1 %v4727_v2 }
0x28ee   :  { %4575 = vpow2.f32 %v2716_v41  ;;  %4307 = vmatpush3.msra.mxu1 %v5883_v39  ;;  %v5917_v41 = vld [vmem:[%s6228_s1 + $0x8] sm:$0xff] }
0x28ef   :  { %4308 = vmatprep.subr.mxu1 %v4727_v2 }
0x28f0   :  { %4309 = vmatpush3.msra.mxu1 %v5889_v38 }
0x28f1   :  { %4310 = vmatprep.subr.mxu1 %v4727_v2 }
0x28f2   :  { %4311 = vmatpush3.msra.mxu1 %v5895_v63 }
0x28f3   :  { %4312 = vmatprep.subr.mxu1 %v4727_v2 }
0x28f4   :  { %4313 = vmatpush3.msra.mxu1 %v5902_v5 }
0x28f5   :  { %4336 = vmatprep.subr.mxu1 %v4727_v2 }
0x28f8   :  { %v4570_v35 = vpop.eup %4569 }
0x28f9   :  { %2723 = vperm.xlu0 %4415, %v4570_v35   ;;  %v4572_v49 = vpop.eup %4571 }
0x28fa   :  { %v4574_v50 = vpop.eup %4573 }
0x28fb   :  { %v4576_v53 = vpop.eup %4575 }
0x28fd   :  { %2726 = vperm.xlu0 %4415, %v4572_v49  }
0x2901   :  { %2729 = vperm.xlu0 %4415, %v4574_v50  }
0x2905   :  { %2732 = vperm.xlu0 %4415, %v4576_v53  }
0x2974   :  { %v2724_v23 = vpop.permute.xlu0 %2723 }
0x2975   :  { %v2737_v54 = vrot.slane %v2724_v23, %v4942_v15 }
0x2978   :  { %v2727_v27 = vpop.permute.xlu0 %2726 }
0x2979   :  { %v2741_v4 = vrot.slane %v2727_v27, %v4942_v15 }
0x297b   :  { %v2750_v28 = vsel %vm282_vm2, %v2741_v4, %v2737_v54 }
0x297c   :  { %v2730_v24 = vpop.permute.xlu0 %2729 }
0x297d   :  { %v2745_v46 = vrot.slane %v2730_v24, %v4942_v15 }
0x297f   :  { %v2751_v57 = vsel %vm284_vm3, %v2745_v46, %v2750_v28  ;;  %v5927_v46 = vld [vmem:[%s6228_s1 + $0x10] sm:$0xff] }
0x2980   :  { %v2733_v30 = vpop.permute.xlu0 %2732 }
0x2981   :  { %v2749_v43 = vrot.slane %v2733_v30, %v4942_v15 }
0x2983   :  { %v2752_v51 = vsel %vm286_vm4, %v2749_v43, %v2751_v57 }
0x2984   :  { %v2754_v3 = vsel %vm289_vm5, %v2752_v51, 0.0 }
0x2985   :  { %2755 = vadd.xlane.f32.xlu0 %v2754_v3 }
0x2a0e   :  { %v2756_v14 = vpop.xlane.xlu0 %2755 }
0x2a0f   :  { %v2761_v17 = vrot.slane %v2756_v14, %v4875_v18  ;;  %v2765_v13 = vrot.slane %v2756_v14, %v4843_v7  ;;  %v2769_v22 = vrot.slane %v2756_v14, %v4846_v8  ;;  %v2773_v25 = vrot.slane %v2756_v14, %v4922_v52 }
0x2a11   :  { %4577 = vrcp.f32 %v2761_v17 }
0x2a12   :  { %4579 = vrcp.f32 %v2765_v13 }
0x2a13   :  { %4581 = vrcp.f32 %v2769_v22 }
0x2a14   :  { %4583 = vrcp.f32 %v2773_v25  ;;  %v5937_v25 = vld [vmem:[%s6228_s1 + $0x18] sm:$0xff] }
0x2a1e   :  { %v4578_v1 = vpop.eup %4577 }
0x2a1f   :  { %v4580_v26 = vpop.eup %4579  ;;  %v2779_v33 = vmul.f32 %v4578_v1, %v4570_v35 }
0x2a20   :  { %v4582_v47 = vpop.eup %4581  ;;  %v2781_v59 = vmul.f32 %v4580_v26, %v4572_v49 }
0x2a21   :  { %2791 = vperm.xlu1 %4416, %v2779_v33   ;;  %v2783_v31 = vmul.f32 %v4582_v47, %v4574_v50  ;;  %v4584_v20 = vpop.eup %4583 }
0x2a22   :  { %2794 = vperm.xlu0 %4415, %v2781_v59   ;;  %v2785_v32 = vmul.f32 %v4584_v20, %v4576_v53 }
0x2a25   :  { %2797 = vperm.xlu1 %4416, %v2783_v31  }
0x2a29   :  { %2800 = vperm.xlu1 %4416, %v2785_v32  }
0x2a9c   :  { %v2792_v42 = vpop.permute.xlu1 %2791 }
0x2a9d   :  { %v2795_v40 = vpop.permute.xlu0 %2794  ;;  %v2828_v45 = vmul.f32 %v5911_v0, %v2792_v42  ;;  %v2805_v4 = vrot.slane %v2792_v42, %v4942_v15 }
0x2a9e   :  { %v2829_v35 = vmul.f32 %v5917_v41, %v2795_v40  ;;  %v2809_v27 = vrot.slane %v2795_v40, %v4942_v15 }
0x2a9f   :  { %v2832_v49 = vsel %vm62_vm1, %v2828_v45, 0.0 }
0x2aa0   :  { %v2839_v50 = vsel %vm62_vm1, %v2829_v35, 0.0  ;;  %v2833_v53 = vrot.slane %v2832_v49, 4  ;;  %v2798_v23 = vpop.permute.xlu1 %2797  ;;  %v2818_v13 = vsel %vm282_vm2, %v2809_v27, %v2805_v4 }
0x2aa1   :  { %v2840_v24 = vrot.slane %v2839_v50, 4  ;;  %v2830_v54 = vmul.f32 %v5927_v46, %v2798_v23  ;;  %v2813_v28 = vrot.slane %v2798_v23, %v4942_v15 }
0x2aa2   :  { %v2834_v30 = vadd.f32 %v2833_v53, %v2832_v49 }
0x2aa3   :  { %v2841_v43 = vadd.f32 %v2840_v24, %v2839_v50  ;;  %v2846_v57 = vsel %vm62_vm1, %v2830_v54, 0.0  ;;  %v2819_v33 = vsel %vm284_vm3, %v2813_v28, %v2818_v13 }
0x2aa4   :  { %v2835_v51 = vrot.slane %v2834_v30, 2  ;;  %v2847_v3 = vrot.slane %v2846_v57, 4  ;;  %v2801_v14 = vpop.permute.xlu1 %2800 }
0x2aa5   :  { %v2842_v17 = vrot.slane %v2841_v43, 2  ;;  %v2817_v22 = vrot.slane %v2801_v14, %v4942_v15  ;;  %v2831_v1 = vmul.f32 %v5937_v25, %v2801_v14 }
0x2aa6   :  { %v2836_v26 = vadd.f32 %v2835_v51, %v2834_v30  ;;  %v2848_v47 = vadd.f32 %v2847_v3, %v2846_v57 }
0x2aa7   :  { %v2843_v59 = vadd.f32 %v2842_v17, %v2841_v43  ;;  %v2820_v31 = vsel %vm286_vm4, %v2817_v22, %v2819_v33  ;;  %v2853_v20 = vsel %vm62_vm1, %v2831_v1, 0.0  ;;  %v5967_v17 = vld [vmem:[%s6235_s8] ss:$0 sm:$0xff] }
0x2aa8   :  { %v2849_v32 = vrot.slane %v2848_v47, 2  ;;  %2823 = vst.msk [vmem:[#allocation3 + $0x10] sm:$0xf] %vm289_vm5, %v2820_v31  ;;  %v2854_v42 = vrot.slane %v2853_v20, 4  ;;  %v2837_v45 = vrot.slane %v2836_v26, 1 }
0x2aa9   :  { %v2844_v40 = vrot.slane %v2843_v59, 1 }
0x2aaa   :  { %v2850_v35 = vadd.f32 %v2849_v32, %v2848_v47  ;;  %v2855_v49 = vadd.f32 %v2854_v42, %v2853_v20  ;;  %v2838_v27 = vadd.f32 %v2837_v45, %v2836_v26  ;;  %v5975_v20 = vld [vmem:[%s6234_s7 + $0x78] sm:$0xff]  ;;  %v5980_v32 = vld [vmem:[%s6234_s7 + $0x70] sm:$0xff]  ;;  %v5987_v42 = vld [vmem:[%s6234_s7 + $0x68] sm:$0xff] }
0x2aab   :  { %v2845_v23 = vadd.f32 %v2844_v40, %v2843_v59  ;;  %4318 = vmatpush3.msra.mxu0 %v5975_v20  ;;  %v5994_v40 = vld [vmem:[%s6234_s7 + $0x60] sm:$0xff]  ;;  %v6001_v45 = vld [vmem:[%s6234_s7 + $0x58] sm:$0xff] }
0x2aac   :  { %v2851_v50 = vrot.slane %v2850_v35, 1  ;;  %v2856_v53 = vrot.slane %v2855_v49, 2  ;;  %4319 = vmatprep.subr.mxu0 %v4727_v2 }
0x2aad   :  { %v2866_v43 = vsel %vm282_vm2, %v2845_v23, %v2838_v27  ;;  %4320 = vmatpush3.msra.mxu0 %v5980_v32 }
0x2aae   :  { %v2857_v24 = vadd.f32 %v2856_v53, %v2855_v49  ;;  %v2852_v4 = vadd.f32 %v2851_v50, %v2850_v35  ;;  %4321 = vmatprep.subr.mxu0 %v4727_v2  ;;  %v6008_v49 = vld [vmem:[%s6234_s7 + $0x50] sm:$0xff]  ;;  %v6016_v50 = vld [vmem:[%s6234_s7 + $0x48] sm:$0xff]  ;;  %v6025_v53 = vld [vmem:[%s6234_s7 + $0x40] sm:$0xff] }
0x2aaf   :  { %v3694_v54 = vld [vmem:[#allocation3 + $0x10] sm:$0xf]  ;;  %4322 = vmatpush3.msra.mxu0 %v5987_v42 }
0x2ab0   :  { %v2858_v30 = vrot.slane %v2857_v24, 1  ;;  %3700 = vst.msk [vmem:[#allocation6 + $0x10] sm:$0xf] %vm289_vm5, %v3694_v54  ;;  %v2867_v57 = vsel %vm284_vm3, %v2852_v4, %v2866_v43  ;;  %4323 = vmatprep.subr.mxu0 %v4727_v2 }
0x2ab1   :  { %4324 = vmatpush3.msra.mxu0 %v5994_v40 }
0x2ab2   :  { %v2859_v28 = vadd.f32 %v2858_v30, %v2857_v24  ;;  %4325 = vmatprep.subr.mxu0 %v4727_v2 }
0x2ab3   :  { %4326 = vmatpush3.msra.mxu0 %v6001_v45 }
0x2ab4   :  { %v2868_v51 = vsel %vm286_vm4, %v2859_v28, %v2867_v57  ;;  %4327 = vmatprep.subr.mxu0 %v4727_v2 }
0x2ab5   :  { %v2870_v3 = vsel %vm62_vm1, %v2868_v51, %v5758_v10  ;;  %4328 = vmatpush3.msra.mxu0 %v6008_v49 }
0x2ab6   :  { %4315 = vmatmul.mubr.msk.f32.vlgmr.msra.gmra.mxu1 %vm495_vm6, %v2870_v3  ;;  %4329 = vmatprep.subr.mxu0 %v4727_v2 }
0x2ab7   :  { %4337 = vmatpush3.msra.mxu1 %v5723_v36  ;;  %4344 = vmatprep.mubr.msk.f32.mxu1 %vm4728_vm0, %v4727_v2  ;;  %v3915_v36 = vld [vmem:[%s6227_s0 + $0x10] sm:$0xf] }
0x2ab8   :  { %4338 = vmatprep.subr.mxu1 %v4727_v2  ;;  %4330 = vmatpush3.msra.mxu0 %v6016_v50 }
0x2ab9   :  { %4339 = vmatpush3.msra.mxu1 %v5732_v60  ;;  %4331 = vmatprep.subr.mxu0 %v4727_v2 }
0x2aba   :  { %4340 = vmatprep.subr.mxu1 %v4727_v2  ;;  %4332 = vmatpush3.msra.mxu0 %v6025_v53 }
0x2abb   :  { %4341 = vmatpush3.msra.mxu1 %v5739_v21  ;;  %4347 = vmatprep.subr.mxu0 %v4727_v2 }
0x2abc   :  { %4342 = vmatprep.subr.mxu1 %v4727_v2 }
0x2abd   :  { %4343 = vmatpush3.msra.mxu1 %v5746_v58 }
0x2abe   :  { %4366 = vmatprep.subr.mxu1 %v4727_v2 }
0x2b76   :  { %v2948_v14 = vpop.f32.mrf.mxu1 }
0x2b77   :  { %v2949_v60 = vadd.f32 %v5967_v17, %v2948_v14 }
0x2b78   :  { %v4316_v13 = vpop.f32.mrf.mxu1 }
0x2b79   :  { %v2952_v21 = vadd.f32 %v3915_v36, %v2949_v60 }
0x2b7b   :  { %2960 = vrot.lane.b32.xlu1 %v2952_v21, %s4731_s3  ;;  %v3917_v22 = vmul.f32 -1.442695, %v2952_v21 }
0x2b7d   :  { %4585 = vpow2.f32 %v3917_v22 }
0x2b8a   :  { %v4586_v58 = vpop.eup %4585 }
0x2b8b   :  { %v2956_v1 = vadd.f32 1.0, %v4586_v58 }
0x2b8d   :  { %4587 = vrcp.f32 %v2956_v1 }
0x2b9a   :  { %v4588_v26 = vpop.eup %4587 }
0x2b9b   :  { %v2970_v23 = vsub.f32 1.0, %v4588_v26  ;;  %v2976_v24 = vmul.f32 %v4588_v26, %v5758_v10 }
0x2bed   :  { %v2961_v33 = vpop.permute.xlu1 %2960 }
0x2bee   :  { %v2963_v47 = vmul.f32 %v4588_v26, %v2961_v33 }
0x2bf0   :  { %2965 = vrot.lane.b32.xlu1 %v2963_v47, %s4732_s23 }
0x2c62   :  { %v2966_v59 = vpop.permute.xlu1 %2965 }
0x2c63   :  { %v2968_v31 = vadd.f32 %v2966_v59, %v2952_v21 }
0x2c65   :  { %4589 = vtanh.f32 %v2968_v31 }
0x2c72   :  { %v4590_v35 = vpop.eup %4589 }
0x2c73   :  { %2972 = vrot.lane.b32.xlu1 %v4590_v35, %s4733_s19 }
0x2ce5   :  { %v2973_v27 = vpop.permute.xlu1 %2972 }
0x2ce6   :  { %v2975_v4 = vmul.f32 %v2973_v27, %v2970_v23 }
0x2ce8   :  { %v6030_v54 = vadd.f32 %v2976_v24, %v2975_v4 }
0x2cea   :  { %2979 = vrot.lane.b32.xlu0 %v6030_v54, %s4733_s19 }
0x2d5c   :  { %v2980_v30 = vpop.permute.xlu0 %2979 }
0x2d5d   :  { %v2982_v28 = vsel %vm62_vm1, %v2980_v30, %v5772_v37 }
0x2d5e   :  { %4334 = vmatmul.mubr.msk.f32.vlgmr.msra.gmra.mxu0 %vm495_vm6, %v2982_v28 }
0x2d5f   :  { %4348 = vmatpush3.msra.mxu0 %v5855_v19  ;;  %4363 = vmatprep.mubr.msk.f32.mxu0 %vm4728_vm0, %v4727_v2  ;;  %v6058_v19 = vld [vmem:[%s6235_s8 + $0x1] ss:$0 sm:$0xff] }
0x2d60   :  { %4349 = vmatprep.subr.mxu0 %v4727_v2 }
0x2d61   :  { %4350 = vmatpush3.msra.mxu0 %v5862_v34 }
0x2d62   :  { %4351 = vmatprep.subr.mxu0 %v4727_v2 }
0x2d63   :  { %4352 = vmatpush3.msra.mxu0 %v5869_v9 }
0x2d64   :  { %4353 = vmatprep.subr.mxu0 %v4727_v2 }
0x2d65   :  { %4354 = vmatpush3.msra.mxu0 %v5876_v29 }
0x2d66   :  { %4355 = vmatprep.subr.mxu0 %v4727_v2 }
0x2d67   :  { %4356 = vmatpush3.msra.mxu0 %v5883_v39 }
0x2d68   :  { %4357 = vmatprep.subr.mxu0 %v4727_v2 }
0x2d69   :  { %4358 = vmatpush3.msra.mxu0 %v5889_v38 }
0x2d6a   :  { %4359 = vmatprep.subr.mxu0 %v4727_v2 }
0x2d6b   :  { %4360 = vmatpush3.msra.mxu0 %v5895_v63 }
0x2d6c   :  { %4361 = vmatprep.subr.mxu0 %v4727_v2 }
0x2d6d   :  { %4362 = vmatpush3.msra.mxu0 %v5902_v5 }
0x2d6e   :  { %4385 = vmatprep.subr.mxu0 %v4727_v2 }
0x2e1e   :  { %v3060_v10 = vpop.f32.mrf.mxu0 }
0x2e1f   :  { %v3061_v34 = vadd.f32 %v6058_v19, %v3060_v10 }
0x2e20   :  { %v4335_v9 = vpop.f32.mrf.mxu0 }
0x2e21   :  { %3071 = vrot.lane.b32.xlu1 %v3061_v34, %s4731_s3  ;;  %v3927_v29 = vmul.f32 -1.442695, %v3061_v34 }
0x2e23   :  { %4591 = vpow2.f32 %v3927_v29 }
0x2e30   :  { %v4592_v39 = vpop.eup %4591 }
0x2e31   :  { %v3067_v38 = vadd.f32 1.0, %v4592_v39 }
0x2e33   :  { %4593 = vrcp.f32 %v3067_v38 }
0x2e40   :  { %v4594_v63 = vpop.eup %4593 }
0x2e41   :  { %v3081_v36 = vsub.f32 1.0, %v4594_v63  ;;  %v3087_v60 = vmul.f32 %v4594_v63, %v5772_v37 }
0x2e93   :  { %v3072_v5 = vpop.permute.xlu1 %3071 }
0x2e94   :  { %v3074_v43 = vmul.f32 %v4594_v63, %v3072_v5 }
0x2e96   :  { %3076 = vrot.lane.b32.xlu0 %v3074_v43, %s4732_s23 }
0x2f08   :  { %v3077_v57 = vpop.permute.xlu0 %3076 }
0x2f09   :  { %v3079_v51 = vadd.f32 %v3077_v57, %v3061_v34 }
0x2f0b   :  { %4595 = vtanh.f32 %v3079_v51 }
0x2f18   :  { %v4596_v3 = vpop.eup %4595 }
0x2f19   :  { %3083 = vrot.lane.b32.xlu1 %v4596_v3, %s4733_s19 }
0x2f8b   :  { %v3084_v14 = vpop.permute.xlu1 %3083 }
0x2f8c   :  { %v3086_v13 = vmul.f32 %v3084_v14, %v3081_v36 }
0x2f8e   :  { %v6065_v21 = vadd.f32 %v3087_v60, %v3086_v13 }
0x2f90   :  { %3090 = vrot.lane.b32.xlu0 %v6065_v21, %s4733_s19 }
0x3002   :  { %v3091_v22 = vpop.permute.xlu0 %3090 }
0x3003   :  { %3093 = vst.msk [vmem:[#allocation2 + $0x10] sm:$0xf] %vm720_vm7, %v3091_v22  ;;  %4345 = vmatmul.mubr.msk.f32.vlgmr.msra.gmra.mxu1 %vm62_vm1, %v3091_v22 }
0x3004   :  { %4367 = vmatpush3.msra.mxu1 %v5975_v20  ;;  %4382 = vmatprep.mubr.msk.f32.mxu1 %vm4728_vm0, %v4727_v2 }
0x3005   :  { %4368 = vmatprep.subr.mxu1 %v4727_v2 }
0x3006   :  { %4369 = vmatpush3.msra.mxu1 %v5980_v32 }
0x3007   :  { %4370 = vmatprep.subr.mxu1 %v4727_v2 }
0x3008   :  { %4371 = vmatpush3.msra.mxu1 %v5987_v42 }
0x3009   :  { %4372 = vmatprep.subr.mxu1 %v4727_v2 }
0x300a   :  { %4373 = vmatpush3.msra.mxu1 %v5994_v40 }
0x300b   :  { %4374 = vmatprep.subr.mxu1 %v4727_v2 }
0x300c   :  { %4375 = vmatpush3.msra.mxu1 %v6001_v45 }
0x300d   :  { %4376 = vmatprep.subr.mxu1 %v4727_v2 }
0x300e   :  { %4377 = vmatpush3.msra.mxu1 %v6008_v49 }
0x300f   :  { %4378 = vmatprep.subr.mxu1 %v4727_v2 }
0x3010   :  { %4379 = vmatpush3.msra.mxu1 %v6016_v50 }
0x3011   :  { %4380 = vmatprep.subr.mxu1 %v4727_v2 }
0x3012   :  { %4381 = vmatpush3.msra.mxu1 %v6025_v53 }
0x30c3   :  { %v3162_v37 = vpop.f32.mrf.mxu1 }
0x30c4   :  { %v3173_v58 = vrot.slane %v3162_v37, %v4872_v16 }
0x30c5   :  { %v4346_v1 = vpop.f32.mrf.mxu1 }
0x30c6   :  { %v3174_v26 = vcombine.high %v3173_v58, %v3173_v58  ;;  %v3181_v33 = vrot.slane %v3173_v58, %v4872_v16 }
0x30c8   :  { %v3188_v47 = vrot.slane %v3174_v26, %v4872_v16  ;;  %v3189_v59 = vcombine.high %v3181_v33, %v3181_v33  ;;  %v3194_v31 = vrot.slane %v3181_v33, %v4875_v18 }
0x30ca   :  { %v3190_v20 = vcombine.high %v3188_v47, %v3188_v47  ;;  %v3198_v32 = vrot.slane %v3188_v47, %v4875_v18  ;;  %v3202_v42 = vrot.slane %v3189_v59, %v4875_v18  ;;  %v3211_v40 = vadd.f32 %v5789_v61, %v3194_v31 }
0x30cc   :  { %v3206_v45 = vrot.slane %v3190_v20, %v4875_v18  ;;  %v3212_v35 = vadd.f32 %v5796_v11, %v3198_v32  ;;  %v3213_v49 = vadd.f32 %v5802_v12, %v3202_v42  ;;  %4597 = vtanh.f32 %v3211_v40 }
0x30ce   :  { %v3214_v50 = vadd.f32 %v5808_v44, %v3206_v45  ;;  %4599 = vtanh.f32 %v3212_v35 }
0x30cf   :  { %4601 = vtanh.f32 %v3213_v49 }
0x30d0   :  { %4603 = vtanh.f32 %v3214_v50 }
0x30d9   :  { %v4598_v16 = vpop.eup %4597 }
0x30da   :  { %v3219_v53 = vmul.f32 %v5814_v48, %v4598_v16 }
0x30db   :  { %v4600_v23 = vpop.eup %4599 }
0x30dc   :  { %v4602_v27 = vpop.eup %4601  ;;  %v3223_v24 = vsel %vm62_vm1, %v3219_v53, 0.0  ;;  %v3220_v61 = vmul.f32 %v5814_v48, %v4600_v23 }
0x30dd   :  { %3224 = vadd.xlane.f32.xlu1 %v3223_v24  ;;  %v3221_v12 = vmul.f32 %v5814_v48, %v4602_v27  ;;  %v4604_v4 = vpop.eup %4603 }
0x30de   :  { %v3226_v11 = vsel %vm62_vm1, %v3220_v61, 0.0  ;;  %v3222_v30 = vmul.f32 %v5814_v48, %v4604_v4 }
0x30df   :  { %3227 = vadd.xlane.f32.xlu0 %v3226_v11  ;;  %v3229_v44 = vsel %vm62_vm1, %v3221_v12, 0.0 }
0x30e0   :  { %v3232_v28 = vsel %vm62_vm1, %v3222_v30, 0.0 }
0x30e3   :  { %3230 = vadd.xlane.f32.xlu0 %v3229_v44 }
0x30e7   :  { %3233 = vadd.xlane.f32.xlu0 %v3232_v28 }
0x3166   :  { %v3225_v10 = vpop.xlane.xlu1 %3224 }
0x3167   :  { %v3235_v34 = vadd.f32 %v3225_v10, %v4933_v62 }
0x3168   :  { %v3228_v9 = vpop.xlane.xlu0 %3227 }
0x3169   :  { %v3236_v29 = vadd.f32 %v3228_v9, %v4928_v55  ;;  %3244 = vperm.xlu1 %4416, %v3235_v34  }
0x316b   :  { %3247 = vperm.xlu0 %4415, %v3236_v29  }
0x316c   :  { %v3231_v39 = vpop.xlane.xlu0 %3230 }
0x316d   :  { %v3237_v38 = vadd.f32 %v3231_v39, %v4930_v56 }
0x316f   :  { %3250 = vperm.xlu1 %4416, %v3237_v38  }
0x3170   :  { %v3234_v63 = vpop.xlane.xlu0 %3233 }
0x3171   :  { %v3238_v5 = vadd.f32 %v3234_v63, %v4937_v6 }
0x3173   :  { %3253 = vperm.xlu1 %4416, %v3238_v5  }
0x31e4   :  { %v3245_v48 = vpop.permute.xlu1 %3244 }
0x31e5   :  { %v3258_v3 = vrot.slane %v3245_v48, %v4942_v15 }
0x31e6   :  { %v3248_v43 = vpop.permute.xlu0 %3247 }
0x31e7   :  { %v3262_v51 = vrot.slane %v3248_v43, %v4942_v15 }
0x31e9   :  { %v3271_v36 = vsel %vm282_vm2, %v3262_v51, %v3258_v3 }
0x31ea   :  { %v3251_v57 = vpop.permute.xlu1 %3250 }
0x31eb   :  { %v3266_v62 = vrot.slane %v3251_v57, %v4942_v15 }
0x31ed   :  { %v3272_v56 = vsel %vm284_vm3, %v3266_v62, %v3271_v36 }
0x31ee   :  { %v3254_v55 = vpop.permute.xlu1 %3253 }
0x31ef   :  { %v3270_v14 = vrot.slane %v3254_v55, %v4942_v15 }
0x31f1   :  { %v3273_v60 = vsel %vm286_vm4, %v3270_v14, %v3272_v56 }
0x31f2   :  { %v3275_v6 = vsel %vm289_vm5, %v3273_v60, -inf }
0x31f3   :  { %3276 = vmax.xlane.f32.xlu1 %v3275_v6 }
0x327c   :  { %v3277_v13 = vpop.xlane.xlu1 %3276 }
0x327d   :  { %v3282_v22 = vrot.slane %v3277_v13, %v4875_v18  ;;  %v3286_v37 = vrot.slane %v3277_v13, %v4843_v7  ;;  %v3290_v58 = vrot.slane %v3277_v13, %v4846_v8  ;;  %v3294_v47 = vrot.slane %v3277_v13, %v4922_v52 }
0x327f   :  { %v3299_v1 = vsub.f32 %v3235_v34, %v3282_v22  ;;  %v3300_v26 = vsub.f32 %v3236_v29, %v3286_v37  ;;  %v3301_v59 = vsub.f32 %v3237_v38, %v3290_v58  ;;  %v3302_v20 = vsub.f32 %v3238_v5, %v3294_v47 }
0x3281   :  { %v3303_v33 = vmul.f32 1.442695, %v3299_v1  ;;  %v3305_v31 = vmul.f32 1.442695, %v3300_v26  ;;  %v3307_v32 = vmul.f32 1.442695, %v3301_v59 }
0x3282   :  { %v3309_v42 = vmul.f32 1.442695, %v3302_v20 }
0x3283   :  { %4605 = vpow2.f32 %v3303_v33 }
0x3284   :  { %4607 = vpow2.f32 %v3305_v31 }
0x3285   :  { %4609 = vpow2.f32 %v3307_v32 }
0x3286   :  { %4611 = vpow2.f32 %v3309_v42 }
0x3290   :  { %v4606_v40 = vpop.eup %4605 }
0x3291   :  { %3316 = vperm.xlu0 %4415, %v4606_v40   ;;  %v4608_v45 = vpop.eup %4607 }
0x3292   :  { %v4610_v35 = vpop.eup %4609 }
0x3293   :  { %v4612_v49 = vpop.eup %4611 }
0x3295   :  { %3319 = vperm.xlu0 %4415, %v4608_v45  }
0x3299   :  { %3322 = vperm.xlu0 %4415, %v4610_v35  }
0x329d   :  { %3325 = vperm.xlu0 %4415, %v4612_v49  }
0x330c   :  { %v3317_v50 = vpop.permute.xlu0 %3316 }
0x330d   :  { %v3330_v24 = vrot.slane %v3317_v50, %v4942_v15 }
0x3310   :  { %v3320_v16 = vpop.permute.xlu0 %3319 }
0x3311   :  { %v3334_v23 = vrot.slane %v3320_v16, %v4942_v15 }
0x3313   :  { %v3343_v11 = vsel %vm282_vm2, %v3334_v23, %v3330_v24 }
0x3314   :  { %v3323_v53 = vpop.permute.xlu0 %3322 }
0x3315   :  { %v3338_v27 = vrot.slane %v3323_v53, %v4942_v15 }
0x3317   :  { %v3344_v4 = vsel %vm284_vm3, %v3338_v27, %v3343_v11 }
0x3318   :  { %v3326_v61 = vpop.permute.xlu0 %3325 }
0x3319   :  { %v3342_v12 = vrot.slane %v3326_v61, %v4942_v15 }
0x331b   :  { %v3345_v44 = vsel %vm286_vm4, %v3342_v12, %v3344_v4 }
0x331c   :  { %v3347_v30 = vsel %vm289_vm5, %v3345_v44, 0.0 }
0x331d   :  { %3348 = vadd.xlane.f32.xlu0 %v3347_v30 }
0x33a6   :  { %v3349_v28 = vpop.xlane.xlu0 %3348 }
0x33a7   :  { %v3354_v10 = vrot.slane %v3349_v28, %v4875_v18  ;;  %v3358_v34 = vrot.slane %v3349_v28, %v4843_v7  ;;  %v3362_v9 = vrot.slane %v3349_v28, %v4846_v8  ;;  %v3366_v29 = vrot.slane %v3349_v28, %v4922_v52 }
0x33a9   :  { %4613 = vrcp.f32 %v3354_v10  ;;  %v3708_v10 = vld [vmem:[%s6236_s9 + $0x18] sm:$0xff] }
0x33aa   :  { %4615 = vrcp.f32 %v3358_v34 }
0x33ab   :  { %4617 = vrcp.f32 %v3362_v9  ;;  %v3707_v9 = vld [vmem:[%s6236_s9 + $0x10] sm:$0xff] }
0x33ac   :  { %4619 = vrcp.f32 %v3366_v29  ;;  %v3706_v29 = vld [vmem:[%s6236_s9 + $0x8] sm:$0xff] }
0x33b6   :  { %v4614_v39 = vpop.eup %4613 }
0x33b7   :  { %v4616_v38 = vpop.eup %4615  ;;  %v3372_v63 = vmul.f32 %v4614_v39, %v4606_v40  ;;  %v3705_v39 = vld [vmem:[%s6236_s9] sm:$0xff] }
0x33b8   :  { %v4618_v5 = vpop.eup %4617  ;;  %v3374_v48 = vmul.f32 %v4616_v38, %v4608_v45  ;;  %v3702_v38 = vld [vmem:[#allocation2] sm:$0xff] }
0x33b9   :  { %3384 = vperm.xlu1 %4416, %v3372_v63   ;;  %v3376_v43 = vmul.f32 %v4618_v5, %v4610_v35  ;;  %v4620_v57 = vpop.eup %4619  ;;  %v3703_v63 = vld [vmem:[#allocation2 + $0x8] sm:$0xff]  ;;  %v3929_v5 = vld [vmem:[%s6227_s0 + $0x14] sm:$0xf]  ;;  %s4734_s0 = smov [#allocation6]  }
0x33ba   :  { %3387 = vperm.xlu0 %4415, %v3374_v48   ;;  %v3378_v18 = vmul.f32 %v4620_v57, %v4612_v49 }
0x33bd   :  { %3390 = vperm.xlu1 %4416, %v3376_v43  }
0x33c1   :  { %3393 = vperm.xlu1 %4416, %v3378_v18  }
0x3434   :  { %v3385_v7 = vpop.permute.xlu1 %3384 }
0x3435   :  { %v3388_v8 = vpop.permute.xlu0 %3387  ;;  %v3421_v51 = vmul.f32 %v5911_v0, %v3385_v7  ;;  %v3398_v60 = vrot.slane %v3385_v7, %v4942_v15  ;;  %v6189_v7 = vld [vmem:[%s6237_s10] ss:$0 sm:$0xff]  ;;  %s3825_s10 = sshll.u32 %s4734_s0, 4  ;;  %s3826_s10 = int_to_ptr.vmem [resolvable:$true] %s3825_s10 }
0x3436   :  { %v3422_v52 = vmul.f32 %v5917_v41, %v3388_v8  ;;  %v3402_v14 = vrot.slane %v3388_v8, %v4942_v15  ;;  %p4668_p1 = scmp.lt.s32.totalorder %s3826_s10, %s3826_s10 }
0x3437   :  { %v3425_v62 = vsel %vm62_vm1, %v3421_v51, 0.0 }
0x3438   :  { %v3432_v3 = vsel %vm62_vm1, %v3422_v52, 0.0  ;;  %v3426_v55 = vrot.slane %v3425_v62, 4  ;;  %v3391_v36 = vpop.permute.xlu1 %3390  ;;  %v3411_v33 = vsel %vm282_vm2, %v3402_v14, %v3398_v60 }
0x3439   :  { %v3433_v56 = vrot.slane %v3432_v3, 4  ;;  %v3423_v6 = vmul.f32 %v5927_v46, %v3391_v36  ;;  %v3406_v22 = vrot.slane %v3391_v36, %v4942_v15 }
0x343a   :  { %v3427_v13 = vadd.f32 %v3426_v55, %v3425_v62 }
0x343b   :  { %v3434_v37 = vadd.f32 %v3433_v56, %v3432_v3  ;;  %v3439_v0 = vsel %vm62_vm1, %v3423_v6, 0.0  ;;  %v3412_v20 = vsel %vm284_vm3, %v3406_v22, %v3411_v33 }
0x343c   :  { %v3428_v41 = vrot.slane %v3427_v13, 2  ;;  %v3440_v58 = vrot.slane %v3439_v0, 4  ;;  %v3394_v1 = vpop.permute.xlu1 %3393 }
0x343d   :  { %v3435_v26 = vrot.slane %v3434_v37, 2  ;;  %v3410_v47 = vrot.slane %v3394_v1, %v4942_v15  ;;  %v3424_v59 = vmul.f32 %v5937_v25, %v3394_v1 }
0x343e   :  { %v3429_v31 = vadd.f32 %v3428_v41, %v3427_v13  ;;  %v3441_v46 = vadd.f32 %v3440_v58, %v3439_v0 }
0x343f   :  { %v3436_v32 = vadd.f32 %v3435_v26, %v3434_v37  ;;  %v3413_v42 = vsel %vm286_vm4, %v3410_v47, %v3412_v20  ;;  %v3446_v40 = vsel %vm62_vm1, %v3424_v59, 0.0 }
0x3440   :  { %v3442_v45 = vrot.slane %v3441_v46, 2  ;;  %3416 = vst.msk [vmem:[#allocation3 + $0x14] sm:$0xf] %vm289_vm5, %v3413_v42  ;;  %v3447_v35 = vrot.slane %v3446_v40, 4  ;;  %v3430_v50 = vrot.slane %v3429_v31, 1 }
0x3441   :  { %v3437_v49 = vrot.slane %v3436_v32, 1 }
0x3442   :  { %v3443_v16 = vadd.f32 %v3442_v45, %v3441_v46  ;;  %v3448_v53 = vadd.f32 %v3447_v35, %v3446_v40  ;;  %v3431_v27 = vadd.f32 %v3430_v50, %v3429_v31 }
0x3443   :  { %v3438_v25 = vadd.f32 %v3437_v49, %v3436_v32 }
0x3444   :  { %v3444_v15 = vrot.slane %v3443_v16, 1  ;;  %v3449_v23 = vrot.slane %v3448_v53, 2 }
0x3445   :  { %v3459_v44 = vsel %vm282_vm2, %v3438_v25, %v3431_v27 }
0x3446   :  { %v3450_v24 = vadd.f32 %v3449_v23, %v3448_v53  ;;  %v3445_v61 = vadd.f32 %v3444_v15, %v3443_v16 }
0x3447   :  { %v3695_v11 = vld [vmem:[#allocation3 + $0x14] sm:$0xf] }
0x3448   :  { %v3451_v12 = vrot.slane %v3450_v24, 1  ;;  %3701 = vst.msk [vmem:[#allocation6 + $0x14] sm:$0xf] %vm289_vm5, %v3695_v11  ;;  %v3460_v30 = vsel %vm284_vm3, %v3445_v61, %v3459_v44 }
0x344a   :  { %v3452_v4 = vadd.f32 %v3451_v12, %v3450_v24 }
0x344c   :  { %v3461_v28 = vsel %vm286_vm4, %v3452_v4, %v3460_v30 }
0x344d   :  { %v3463_v34 = vsel %vm62_vm1, %v3461_v28, %v6030_v54 }
0x344e   :  { %4364 = vmatmul.mubr.msk.f32.vlgmr.msra.gmra.mxu0 %vm495_vm6, %v3463_v34 }
0x344f   :  { %4386 = vmatpush3.msra.mxu0 %v3708_v10  ;;  %4393 = vmatprep.mubr.msk.f32.mxu0 %vm4728_vm0, %v4727_v2 }
0x3450   :  { %4387 = vmatprep.subr.mxu0 %v4727_v2 }
0x3451   :  { %4388 = vmatpush3.msra.mxu0 %v3707_v9 }
0x3452   :  { %4389 = vmatprep.subr.mxu0 %v4727_v2 }
0x3453   :  { %4390 = vmatpush3.msra.mxu0 %v3706_v29 }
0x3454   :  { %4391 = vmatprep.subr.mxu0 %v4727_v2 }
0x3455   :  { %4392 = vmatpush3.msra.mxu0 %v3705_v39 }
0x3456   :  { %4394 = vmatmul.mubr.msk.f32.vlgmr.msra.gmra.mxu0 %vm62_vm1, %v3702_v38 }
0x3457   :  { %4396 = vmatprep.mubr.msk.f32.mxu0 %vm4728_vm0, %v4727_v2 }
0x345a   :  { %4397 = vmatmul.mubr.msk.f32.gmra.mxu0 %vm62_vm1, %v3703_v63 }
0x345b   :  { %4399 = vmatprep.mubr.msk.f32.mxu0 %vm4728_vm0, %v4727_v2 }
0x350e   :  { %v3541_v48 = vpop.f32.mrf.mxu0 }
0x350f   :  { %v3542_v43 = vadd.f32 %v5967_v17, %v3541_v48 }
0x3510   :  { %v4365_v57 = vpop.f32.mrf.mxu0 }
0x3511   :  { %v3545_v18 = vadd.f32 %v3929_v5, %v3542_v43 }
0x3513   :  { %3553 = vrot.lane.b32.xlu1 %v3545_v18, %s4731_s3  ;;  %v3931_v17 = vmul.f32 -1.442695, %v3545_v18 }
0x3515   :  { %4621 = vpow2.f32 %v3931_v17 }
0x3516   :  { %v3791_v8 = vpop.f32.mrf.mxu0 }
0x3517   :  { %v3792_v51 = vadd.f32 %v6189_v7, %v3791_v8 }
0x3518   :  { %v4395_v2 = vpop.f32.mrf.mxu0 }
0x3519   :  { %3805 = vst.msk [vmem:[#allocation4] sm:$0xff] %vm62_vm1, %v3792_v51 }
0x351a   :  { %v3796_v52 = vpop.f32.mrf.mxu0 }
0x351b   :  { %v3797_v62 = vadd.f32 %v6189_v7, %v3796_v52 }
0x351c   :  { %v4398_v3 = vpop.f32.mrf.mxu0 }
0x351d   :  { %3806 = vst.msk [vmem:[#allocation4 + $0x8] sm:$0xff] %vm62_vm1, %v3797_v62 }
0x3522   :  { %v4622_v55 = vpop.eup %4621 }
0x3523   :  { %v3549_v36 = vadd.f32 1.0, %v4622_v55 }
0x3525   :  { %4623 = vrcp.f32 %v3549_v36 }
0x3532   :  { %v4624_v14 = vpop.eup %4623 }
0x3533   :  { %v3563_v37 = vsub.f32 1.0, %v4624_v14  ;;  %v3569_v41 = vmul.f32 %v4624_v14, %v6030_v54 }
0x3585   :  { %v3554_v56 = vpop.permute.xlu1 %3553 }
0x3586   :  { %v3556_v60 = vmul.f32 %v4624_v14, %v3554_v56 }
0x3588   :  { %3558 = vrot.lane.b32.xlu1 %v3556_v60, %s4732_s23 }
0x35fa   :  { %v3559_v6 = vpop.permute.xlu1 %3558 }
0x35fb   :  { %v3561_v13 = vadd.f32 %v3559_v6, %v3545_v18 }
0x35fd   :  { %4625 = vtanh.f32 %v3561_v13 }
0x360a   :  { %v4626_v22 = vpop.eup %4625 }
0x360b   :  { %3565 = vrot.lane.b32.xlu1 %v4626_v22, %s4733_s19 }
0x367d   :  { %v3566_v0 = vpop.permute.xlu1 %3565 }
0x367e   :  { %v3568_v58 = vmul.f32 %v3566_v0, %v3563_v37 }
0x3680   :  { %v3570_v1 = vadd.f32 %v3569_v41, %v3568_v58 }
0x3682   :  { %3572 = vrot.lane.b32.xlu0 %v3570_v1, %s4733_s19 }
0x36f4   :  { %v3573_v26 = vpop.permute.xlu0 %3572 }
0x36f5   :  { %v3575_v33 = vsel %vm62_vm1, %v3573_v26, %v6065_v21  ;;  %3687 = vst.msk [vmem:[#allocation8] sm:$0xf] %vm720_vm7, %v3573_v26 }
0x36f6   :  { %4383 = vmatmul.mubr.msk.f32.vlgmr.msra.gmra.mxu1 %vm495_vm6, %v3575_v33 }
0x37b6   :  { %v3653_v47 = vpop.f32.mrf.mxu1 }
0x37b7   :  { %v3654_v59 = vadd.f32 %v6058_v19, %v3653_v47 }
0x37b8   :  { %v4384_v31 = vpop.f32.mrf.mxu1 }
0x37b9   :  { %3664 = vrot.lane.b32.xlu1 %v3654_v59, %s4731_s3  ;;  %v3941_v20 = vmul.f32 -1.442695, %v3654_v59  ;;  %s4663_s3 = scalar_lea.vmem %s3826_s10, 384 }
0x37ba   :  { %p4664_p0 = scmp.ne.s32.totalorder %s3826_s10, %s4663_s3  ;;  %p4669_p2 = scmp.lt.s32.totalorder %s4663_s3, %s4663_s3 }
0x37bb   :  { %4627 = vpow2.f32 %v3941_v20 }
0x37bc   :  { %p4670_p3 = por %p4669_p2, %p4668_p1 }
0x37be   :  { %p4671_p4 = pnand %p4670_p3, %p4664_p0 }
0x37c8   :  { %v4628_v54 = vpop.eup %4627 }
0x37c9   :  { %v3660_v46 = vadd.f32 1.0, %v4628_v54 }
0x37cb   :  { %4629 = vrcp.f32 %v3660_v46 }
0x37d8   :  { %v4630_v32 = vpop.eup %4629 }
0x37d9   :  { %v3674_v19 = vsub.f32 1.0, %v4630_v32  ;;  %v3680_v16 = vmul.f32 %v4630_v32, %v6065_v21 }
0x382b   :  { %v3665_v42 = vpop.permute.xlu1 %3664 }
0x382c   :  { %v3667_v40 = vmul.f32 %v4630_v32, %v3665_v42 }
0x382e   :  { %3669 = vrot.lane.b32.xlu0 %v3667_v40, %s4732_s23 }
0x38a0   :  { %v3670_v45 = vpop.permute.xlu0 %3669 }
0x38a1   :  { %v3672_v35 = vadd.f32 %v3670_v45, %v3654_v59 }
0x38a3   :  { %4631 = vtanh.f32 %v3672_v35 }
0x38b0   :  { %v4632_v49 = vpop.eup %4631 }
0x38b1   :  { %3676 = vrot.lane.b32.xlu1 %v4632_v49, %s4733_s19 }
0x3923   :  { %v3677_v50 = vpop.permute.xlu1 %3676 }
0x3924   :  { %v3679_v53 = vmul.f32 %v3677_v50, %v3674_v19 }
0x3926   :  { %v3681_v15 = vadd.f32 %v3680_v16, %v3679_v53 }
0x3928   :  { %3683 = vrot.lane.b32.xlu0 %v3681_v15, %s4733_s19 }
0x399a   :  { %v3684_v23 = vpop.permute.xlu0 %3683 }
0x399b   :  { %3686 = vst.msk [vmem:[#allocation2 + $0x14] sm:$0xf] %vm720_vm7, %v3684_v23  ;;  %3689 = vst.msk [vmem:[#allocation8 + $0x4] sm:$0xf] %vm720_vm7, %v3684_v23 }
0x39a2   :  { %v3704_v25 = vld [vmem:[#allocation2 + $0x10] sm:$0xff] }
0x39a3   :  { %4400 = vmatmul.mubr.msk.f32.gmra.mxu0 %vm62_vm1, %v3704_v25 }
0x39a4   :  { %4674 = shalt.err (!%p4671_p4)
}
0x39a5   :  { %s4735_s27 = smov 4   ;;  %s4736_s29 = smov [#allocation8]  }
0x39a6   :  { %3831 = dma.vmem_to_hbm [thread:$0]  %s3826_s10, 384, %s6239_s12, [#allocation7], %s4732_s23, %s4732_s23, %s4735_s27  }
0x39a7   :  { %s3837_s30 = sshll.u32 %s4736_s29, 4  ;;  %s3838_s30 = int_to_ptr.vmem [resolvable:$true] %s3837_s30 }
0x39a8   :  { %s4683_s2 = scalar_lea.vmem %s3838_s30, 128  ;;  %p4688_p6 = scmp.lt.s32.totalorder %s3838_s30, %s3838_s30 }
0x39a9   :  { %p4684_p5 = scmp.ne.s32.totalorder %s3838_s30, %s4683_s2  ;;  %p4689_p7 = scmp.lt.s32.totalorder %s4683_s2, %s4683_s2 }
0x39ab   :  { %p4690_p8 = por %p4689_p7, %p4688_p6 }
0x39ad   :  { %p4691_p9 = pnand %p4690_p8, %p4684_p5 }
0x39af   :  { %4694 = shalt.err (!%p4691_p9)
}
0x39b0   :  { %3843 = dma.vmem_to_hbm [thread:$0]  %s3838_s30, 128, %s6240_s13, [#allocation7], %s4732_s23, %s4732_s23, %s4735_s27  }
0x39b1   :  { %s4737_s15 = smov [#allocation4]  }
0x39b2   :  { %s3813_s16 = sshll.u32 %s4737_s15, 4  ;;  %s3814_s16 = int_to_ptr.vmem [resolvable:$true] %s3813_s16 }
0x39b3   :  { %s4703_s12 = scalar_lea.vmem %s3814_s16, 384  ;;  %p4708_p11 = scmp.lt.s32.totalorder %s3814_s16, %s3814_s16 }
0x39b4   :  { %p4704_p10 = scmp.ne.s32.totalorder %s3814_s16, %s4703_s12  ;;  %p4709_p12 = scmp.lt.s32.totalorder %s4703_s12, %s4703_s12 }
0x39b6   :  { %p4710_p13 = por %p4709_p12, %p4708_p11 }
0x39b8   :  { %p4711_p0 = pnand %p4710_p13, %p4704_p10 }
0x3a63   :  { %v3801_v21 = vpop.f32.mrf.mxu0 }
0x3a64   :  { %v3802_v27 = vadd.f32 %v6189_v7, %v3801_v21 }
0x3a65   :  { %v4401_v24 = vpop.f32.mrf.mxu0 }
0x3a66   :  { %3807 = vst.msk [vmem:[#allocation4 + $0x10] sm:$0xff] %vm62_vm1, %v3802_v27 }
0x3a67   :  { %4714 = shalt.err (!%p4711_p0)
}
0x3a68   :  { %s4738_s7 = smov 128   ;;  %s4739_s1 = smov 8  }
0x3a69   :  { %3819 = dma.vmem_to_hbm [thread:$0]  %s3814_s16, 384, %s6238_s11, [#allocation5], %s4738_s7, %s4738_s7, %s4739_s1  }
0x3a6a   :  { %4723 = dma.done.wait [#allocation5], 384  }
0x3a6b   :  { %4724 = vsyncadd [#allocation5], 4294966912 }
0x3a6c   :  { %4725 = dma.done.wait [#allocation7], 512  }
0x3a6d   :  { %4726 = vsyncadd [#allocation7], 4294966784 }
0x3a6e   :  { %3853 = vsyncpa [#allocation5], 1 }
0x3a6f   :  { %3854 = vsyncpa [#allocation7], 1 }

</bundles_post_ra>
